<compile_context>
chip_gen: v7x
topology: tpu7x:2x2x1
jax: 0.10.0
libtpu: 0.0.40
codegen_flags: <defaults>
</compile_context>

<pallas_src>
import functools
import random

import numpy as np

import jax
import jax.numpy as jnp
from jax.experimental import pallas as pl
from jax.experimental.pallas import tpu as pltpu


# ----------------------------------------------------------------------------
# Fused whole-encoder kernel (grid-less, everything VMEM/SMEM resident).
# ----------------------------------------------------------------------------
def _encoder_kernel(x_ref, pe_ref, ln1g_ref, ln1b_ref, g_ref,
                    ln2g_ref, ln2b_ref, sw_ref, o_ref):
    depth = g_ref.shape[0]
    HW = g_ref.shape[2]
    CHW = x_ref.shape[1]
    C = CHW // HW
    C2 = 2 * C

    # Offsets into the per-layer scalar-weight row held in SMEM.
    OFF_WV = 0                       # wv  (C, C)   row-major (cout, cin)
    OFF_BV = OFF_WV + C * C          # bv  (C,)
    OFF_W1 = OFF_BV + C              # w1  (2C, C)  row-major (k, cin)
    OFF_B1 = OFF_W1 + C2 * C         # b1  (2C,)
    OFF_W2 = OFF_B1 + C2             # w2  (C, 2C)  row-major (cout, k)
    OFF_B2 = OFF_W2 + C * C2         # b2  (C,)

    # Positional encoding fused in (added once, before the first layer only).
    x = x_ref[...] + pe_ref[...]                                # (L, C*HW) f32

    for d in range(depth):
        # ---------------- Residual(PreNorm(ConvAttention)) ----------------
        # LayerNorm over (C, H, W) per frame, vectorized over all frames.
        mu = jnp.mean(x, axis=1, keepdims=True)                 # (L, 1)
        var = jnp.mean(jnp.square(x - mu), axis=1, keepdims=True)
        y = (x - mu) * jax.lax.rsqrt(var + 1e-5)
        y = y * ln1g_ref[d:d + 1, :] + ln1b_ref[d:d + 1, :]     # (L, C*HW)

        # Attention logits over key frames: ONE bf16 MXU matmul.  The query
        # branch (convQ), conv_atten bias and convK bias cancel exactly in the
        # per-pixel softmax over frames, so only the folded key branch remains.
        logits = jnp.dot(y.astype(jnp.bfloat16), g_ref[d],
                         preferred_element_type=jnp.float32)    # (L, HW)

        # Per-pixel softmax over frames (sublane reductions).
        m = jnp.max(logits, axis=0, keepdims=True)              # (1, HW)
        e = jnp.exp(logits - m)
        s = jnp.sum(e, axis=0, keepdims=True)
        wsm = e * pl.reciprocal(s, approx=False)                # (L, HW)

        # attn[cout, p] = bv[cout] + sum_cin wv[cout, cin] * z[cin, p]
        # with z[cin, p] = sum_l wsm[l, p] * y[l, cin*HW + p].
        # (convV's bias passes straight through: softmax weights sum to 1.)
        # The attention map is identical for every query frame.
        z = [jnp.sum(wsm * y[:, c * HW:(c + 1) * HW], axis=0, keepdims=True)
             for c in range(C)]                                 # C x (1, HW)
        cols = []
        for co in range(C):
            acc = sw_ref[d, OFF_BV + co] + sw_ref[d, OFF_WV + co * C] * z[0]
            for ci in range(1, C):
                acc = acc + sw_ref[d, OFF_WV + co * C + ci] * z[ci]
            cols.append(acc)                                    # (1, HW)
        x = x + jnp.concatenate(cols, axis=1)                   # fused residual

        # ---------------- Residual(PreNorm(FeedForward)) -------------------
        mu = jnp.mean(x, axis=1, keepdims=True)
        var = jnp.mean(jnp.square(x - mu), axis=1, keepdims=True)
        y = (x - mu) * jax.lax.rsqrt(var + 1e-5)
        y = y * ln2g_ref[d:d + 1, :] + ln2b_ref[d:d + 1, :]

        # C<=8 channel contractions -> VPU broadcast-FMAs (too skinny for MXU).
        hs = []
        for k in range(C2):
            acc = sw_ref[d, OFF_B1 + k] + sw_ref[d, OFF_W1 + k * C] * y[:, 0:HW]
            for ci in range(1, C):
                acc = acc + sw_ref[d, OFF_W1 + k * C + ci] * y[:, ci * HW:(ci + 1) * HW]
            hs.append(jnp.where(acc >= 0.0, acc, 0.01 * acc))   # LeakyReLU(0.01)
        cols = []
        for co in range(C):
            acc = sw_ref[d, OFF_B2 + co] + sw_ref[d, OFF_W2 + co * C2] * hs[0]
            for k in range(1, C2):
                acc = acc + sw_ref[d, OFF_W2 + co * C2 + k] * hs[k]
            cols.append(x[:, co * HW:(co + 1) * HW] + acc)      # fused residual
        x = jnp.concatenate(cols, axis=1)

    o_ref[...] = x


def _encode_impl(x2, pe2, ln1g, ln1b, G, ln2g, ln2b, sw):
    L, CHW = x2.shape
    return pl.pallas_call(
        _encoder_kernel,
        out_shape=jax.ShapeDtypeStruct((L, CHW), jnp.float32),
        in_specs=[
            pl.BlockSpec(memory_space=pltpu.MemorySpace.VMEM),  # x
            pl.BlockSpec(memory_space=pltpu.MemorySpace.VMEM),  # pe
            pl.BlockSpec(memory_space=pltpu.MemorySpace.VMEM),  # ln1 gamma
            pl.BlockSpec(memory_space=pltpu.MemorySpace.VMEM),  # ln1 beta
            pl.BlockSpec(memory_space=pltpu.MemorySpace.VMEM),  # folded G (bf16)
            pl.BlockSpec(memory_space=pltpu.MemorySpace.VMEM),  # ln2 gamma
            pl.BlockSpec(memory_space=pltpu.MemorySpace.VMEM),  # ln2 beta
            pl.BlockSpec(memory_space=pltpu.MemorySpace.SMEM),  # small scalar weights
        ],
        out_specs=pl.BlockSpec(memory_space=pltpu.MemorySpace.VMEM),
    )(x2, pe2, ln1g, ln1b, G, ln2g, ln2b, sw)


_encode = jax.jit(_encode_impl)


# ----------------------------------------------------------------------------
# Host-side weight preprocessing (weights only, done ONCE and cached -- not in
# the jitted forward).
# ----------------------------------------------------------------------------
def _fold_key_conv(wa_key, wk, H, W):
    """Fold convK (1x1, (Cout,Cin)) with the key half of the 5x5 conv_atten
    (wa_key: (Cout,5,5)) into G2: (Cin*HW, HW) with
        logits[j, q] = sum_{cin,p} y[j, cin*HW + p] * G2[cin*HW + p, q]."""
    C = wk.shape[1]
    HW = H * W
    # wfold[cin, dh, dw] = sum_cout wa_key[cout, dh, dw] * wk[cout, cin]
    wfold = np.einsum('oij,oc->cij', wa_key, wk)
    G = np.zeros((C, HW, HW), np.float32)
    hh, ww = np.meshgrid(np.arange(H), np.arange(W), indexing='ij')
    q = (hh * W + ww).reshape(-1)
    for dh in range(5):
        for dw in range(5):
            hi = hh + dh - 2
            wi = ww + dw - 2
            valid = ((hi >= 0) & (hi < H) & (wi >= 0) & (wi < W)).reshape(-1)
            p = (np.clip(hi, 0, H - 1) * W + np.clip(wi, 0, W - 1)).reshape(-1)
            G[:, p[valid], q[valid]] += wfold[:, dh, dw][:, None]
    return G.reshape(C * HW, HW)


def _small_weight_row(p, C):
    row = np.concatenate([
        np.asarray(p['wv'], np.float32).reshape(-1),    # (C, C)
        np.asarray(p['bv'], np.float32).reshape(-1),    # (C,)
        np.asarray(p['w1'], np.float32).reshape(-1),    # (2C, C)
        np.asarray(p['b1'], np.float32).reshape(-1),    # (2C,)
        np.asarray(p['w2'], np.float32).reshape(-1),    # (C, 2C)
        np.asarray(p['b2'], np.float32).reshape(-1),    # (C,)
    ])
    width = ((row.size + 127) // 128) * 128
    out = np.zeros((width,), np.float32)
    out[:row.size] = row
    return out


def prepare_params(params, C, H, W):
    """Host-side, call once per weight set and reuse (fold is weights-only)."""
    CHW = C * H * W
    ln1g = np.stack([np.asarray(p['ln1_g'], np.float32).reshape(CHW) for p in params])
    ln1b = np.stack([np.asarray(p['ln1_b'], np.float32).reshape(CHW) for p in params])
    ln2g = np.stack([np.asarray(p['ln2_g'], np.float32).reshape(CHW) for p in params])
    ln2b = np.stack([np.asarray(p['ln2_b'], np.float32).reshape(CHW) for p in params])
    G = np.stack([_fold_key_conv(np.asarray(p['wa'], np.float32)[C:],
                                 np.asarray(p['wk'], np.float32), H, W)
                  for p in params])
    sw = np.stack([_small_weight_row(p, C) for p in params])
    return dict(ln1g=jnp.asarray(ln1g), ln1b=jnp.asarray(ln1b),
                ln2g=jnp.asarray(ln2g), ln2b=jnp.asarray(ln2b),
                G=jnp.asarray(G, dtype=jnp.bfloat16),
                sw=jnp.asarray(sw))


def sinusoid_pe_np(L, C):
    """pe[l, c] exactly as PositionalEncoding (constant over batch/H/W)."""
    pos = np.arange(L, dtype=np.float64)[:, None]
    hid = np.arange(C)
    denom = np.power(10000.0, 2.0 * (hid // 2) / C)
    ang = pos / denom[None, :]
    return np.where(hid[None, :] % 2 == 0, np.sin(ang), np.cos(ang)).astype(np.float32)


# ----------------------------------------------------------------------------
# Module forward
# ----------------------------------------------------------------------------
def fmnet_encoder_forward(frames, prep, small_length):
    """frames: (L, C, H, W); prep: prepare_params(...) output (cached host-side).
    Returns (enc_out, choose_frames) like the module."""
    L, C, H, W = frames.shape
    HW = H * W
    # TODO(synk): PositionalEncoding interpolate() branch (shape-mismatch case)
    # not implemented; shapes here match the pos table exactly.
    pe2 = jnp.asarray(np.repeat(sinusoid_pe_np(L, C), HW, axis=1))  # (L, C*HW)
    x2 = frames.reshape(L, C * HW).astype(jnp.float32)
    out = _encode(x2, pe2, prep["ln1g"], prep["ln1b"], prep["G"],
                  prep["ln2g"], prep["ln2b"], prep["sw"])
    enc_out = out.reshape(L, C, H, W)
    # TODO(synk): module uses unseeded random.sample; seeded for determinism.
    choose_frames = random.Random(0).sample(range(L), small_length)
    return enc_out, choose_frames


def init_params(key, depth, C, H, W):
    params = []
    for _ in range(depth):
        key, *ks = jax.random.split(key, 17)
        params.append(dict(
            ln1_g=1.0 + 0.1 * jax.random.normal(ks[12], (C, H, W), jnp.float32),
            ln1_b=0.1 * jax.random.normal(ks[13], (C, H, W), jnp.float32),
            # convQ (wq,bq), convK bias (bk) and conv_atten bias (ba) are real
            # module parameters but cancel exactly in the per-pixel softmax over
            # frames, so the fused kernel never reads them (the reference does).
            wq=0.1 * jax.random.normal(ks[0], (C, C), jnp.float32),
            bq=0.1 * jax.random.normal(ks[1], (C,), jnp.float32),
            wk=0.1 * jax.random.normal(ks[2], (C, C), jnp.float32),
            bk=0.1 * jax.random.normal(ks[3], (C,), jnp.float32),
            wv=0.1 * jax.random.normal(ks[4], (C, C), jnp.float32),
            bv=0.1 * jax.random.normal(ks[5], (C,), jnp.float32),
            wa=0.1 * jax.random.normal(ks[6], (2 * C, 5, 5), jnp.float32),
            ba=0.1 * jax.random.normal(ks[7], (), jnp.float32),
            ln2_g=1.0 + 0.1 * jax.random.normal(ks[14], (C, H, W), jnp.float32),
            ln2_b=0.1 * jax.random.normal(ks[15], (C, H, W), jnp.float32),
            w1=0.1 * jax.random.normal(ks[8], (2 * C, C), jnp.float32),
            b1=0.1 * jax.random.normal(ks[9], (2 * C,), jnp.float32),
            w2=0.1 * jax.random.normal(ks[10], (C, 2 * C), jnp.float32),
            b2=0.1 * jax.random.normal(ks[11], (C,), jnp.float32),
        ))
    return params


# ----------------------------------------------------------------------------
# Pure-JAX (XLA) literal port of the PyTorch module, for numerical validation
# of the folded/cancelled attention algebra.  Not a Pallas kernel.
# ----------------------------------------------------------------------------
def _layer_norm_ref(x, g, b):
    mu = jnp.mean(x, axis=(1, 2, 3), keepdims=True)
    var = jnp.mean(jnp.square(x - mu), axis=(1, 2, 3), keepdims=True)
    return (x - mu) * jax.lax.rsqrt(var + 1e-5) * g[None] + b[None]


def _conv1x1_ref(w, b, x):
    return jnp.einsum('oi,lihw->lohw', w, x) + b[None, :, None, None]


def _reference_layer(x, p):
    L, C, H, W = x.shape
    y = _layer_norm_ref(x, p['ln1_g'], p['ln1_b'])
    Q = _conv1x1_ref(p['wq'], p['bq'], y)
    K = _conv1x1_ref(p['wk'], p['bk'], y)
    V = _conv1x1_ref(p['wv'], p['bv'], y)
    # Literal cat([Q_i, K_j]) -> 5x5 conv -> softmax over key frames j.
    Qi = jnp.broadcast_to(Q[:, None], (L, L, C, H, W))
    Kj = jnp.broadcast_to(K[None, :], (L, L, C, H, W))
    pairs = jnp.concatenate([Qi, Kj], axis=2).reshape(L * L, 2 * C, H, W)
    logits = jax.lax.conv_general_dilated(
        pairs, p['wa'][None], (1, 1), 'SAME',
        dimension_numbers=('NCHW', 'OIHW', 'NCHW'))[:, 0] + p['ba']
    sm = jax.nn.softmax(logits.reshape(L, L, H, W), axis=1)
    x = x + jnp.einsum('ijhw,jchw->ichw', sm, V)
    y = _layer_norm_ref(x, p['ln2_g'], p['ln2_b'])
    h = _conv1x1_ref(p['w1'], p['b1'], y)
    h = jnp.where(h >= 0.0, h, 0.01 * h)
    return x + _conv1x1_ref(p['w2'], p['b2'], h)


@jax.jit
def _reference_forward(frames, params):
    L, C, H, W = frames.shape
    pe = jnp.asarray(sinusoid_pe_np(L, C))
    x = frames + pe[:, :, None, None]
    for p in params:
        x = _reference_layer(x, p)
    return x


if __name__ == "__main__":
    # Small shapes consistent with the module: input_length frames of
    # num_hidden[-1] channels at img_height x img_width.
    L, C, H, W = 8, 4, 16, 16          # input_length=8, num_hidden=[4]
    depth = 2                          # encoder_depth (small for the demo)
    small_length = 4

    key = jax.random.PRNGKey(0)
    k_frames, k_params = jax.random.split(key)
    frames = jax.random.normal(k_frames, (L, C, H, W), jnp.float32)
    params = init_params(k_params, depth, C, H, W)
    prep = prepare_params(params, C, H, W)     # host-side fold, done once

    enc_out, choose_frames = fmnet_encoder_forward(frames, prep, small_length)
    enc_out = jax.block_until_ready(enc_out)

    assert enc_out.shape == (L, C, H, W)
    assert enc_out.dtype == jnp.float32
    assert len(choose_frames) == small_length
    assert bool(jnp.all(jnp.isfinite(enc_out)))

    # Validate the fused/folded kernel against a literal JAX port of the
    # PyTorch module (explicit Q/K/conv_atten double loop).  Generous tolerance
    # covers the bf16 logits matmul; real bugs show up as O(1) errors.
    ref = jax.block_until_ready(_reference_forward(frames, params))
    max_err = float(jnp.max(jnp.abs(enc_out - ref)))
    assert max_err < 1e-1, f"max abs err vs reference: {max_err}"

    print("KERNEL_OK")
</pallas_src>

<mosaic_0001>
module attributes {stable_mosaic.version = 11 : i64} {
  func.func @_encoder_kernel(%arg0: memref<8x1024xf32, #tpu.memory_space<vmem>>, %arg1: memref<8x1024xf32, #tpu.memory_space<vmem>>, %arg2: memref<2x1024xf32, #tpu.memory_space<vmem>>, %arg3: memref<2x1024xf32, #tpu.memory_space<vmem>>, %arg4: memref<2x1024x256xbf16, #tpu.memory_space<vmem>>, %arg5: memref<2x1024xf32, #tpu.memory_space<vmem>>, %arg6: memref<2x1024xf32, #tpu.memory_space<vmem>>, %arg7: memref<2x128xf32, #tpu.memory_space<smem>>, %arg8: memref<8x1024xf32, #tpu.memory_space<vmem>>) attributes {dimension_semantics = [], scalar_prefetch = 0 : i64, scratch_operands = 0 : i64, tpu.core_type = #tpu.core_type<tc>} {
    %c0 = arith.constant 0 : index
    %c0_0 = arith.constant 0 : index
    %0 = vector.load %arg0[%c0, %c0_0] : memref<8x1024xf32, #tpu.memory_space<vmem>>, vector<8x1024xf32>
    %c0_1 = arith.constant 0 : index
    %c0_2 = arith.constant 0 : index
    %1 = vector.load %arg1[%c0_1, %c0_2] : memref<8x1024xf32, #tpu.memory_space<vmem>>, vector<8x1024xf32>
    %2 = arith.addf %0, %1 : vector<8x1024xf32>
    %cst = arith.constant dense<0.000000e+00> : vector<8xf32>
    %3 = vector.multi_reduction <add>, %2, %cst [1] : vector<8x1024xf32> to vector<8xf32>
    %4 = vector.shape_cast %3 : vector<8xf32> to vector<8x1xf32>
    %cst_3 = arith.constant 1.024000e+03 : f32
    %5 = vector.broadcast %cst_3 : f32 to vector<8x1xf32>
    %6 = arith.divf %4, %5 : vector<8x1xf32>
    %7 = vector.broadcast %6 : vector<8x1xf32> to vector<8x1024xf32>
    %8 = arith.subf %2, %7 : vector<8x1024xf32>
    %9 = arith.mulf %8, %8 : vector<8x1024xf32>
    %cst_4 = arith.constant dense<0.000000e+00> : vector<8xf32>
    %10 = vector.multi_reduction <add>, %9, %cst_4 [1] : vector<8x1024xf32> to vector<8xf32>
    %11 = vector.shape_cast %10 : vector<8xf32> to vector<8x1xf32>
    %cst_5 = arith.constant 1.024000e+03 : f32
    %12 = vector.broadcast %cst_5 : f32 to vector<8x1xf32>
    %13 = arith.divf %11, %12 : vector<8x1xf32>
    %14 = vector.broadcast %6 : vector<8x1xf32> to vector<8x1024xf32>
    %15 = arith.subf %2, %14 : vector<8x1024xf32>
    %cst_6 = arith.constant 9.99999974E-6 : f32
    %16 = vector.broadcast %cst_6 : f32 to vector<8x1xf32>
    %17 = arith.addf %13, %16 : vector<8x1xf32>
    %18 = math.rsqrt %17 : vector<8x1xf32>
    %19 = vector.broadcast %18 : vector<8x1xf32> to vector<8x1024xf32>
    %20 = arith.mulf %15, %19 : vector<8x1024xf32>
    %c0_7 = arith.constant 0 : index
    %c0_8 = arith.constant 0 : index
    %21 = vector.load %arg2[%c0_7, %c0_8] : memref<2x1024xf32, #tpu.memory_space<vmem>>, vector<1x1024xf32>
    %22 = vector.broadcast %21 : vector<1x1024xf32> to vector<8x1024xf32>
    %23 = arith.mulf %20, %22 : vector<8x1024xf32>
    %c0_9 = arith.constant 0 : index
    %c0_10 = arith.constant 0 : index
    %24 = vector.load %arg3[%c0_9, %c0_10] : memref<2x1024xf32, #tpu.memory_space<vmem>>, vector<1x1024xf32>
    %25 = vector.broadcast %24 : vector<1x1024xf32> to vector<8x1024xf32>
    %26 = arith.addf %23, %25 : vector<8x1024xf32>
    %27 = arith.truncf %26 : vector<8x1024xf32> to vector<8x1024xbf16>
    %c0_11 = arith.constant 0 : index
    %c0_12 = arith.constant 0 : index
    %c0_13 = arith.constant 0 : index
    %28 = vector.load %arg4[%c0_11, %c0_12, %c0_13] : memref<2x1024x256xbf16, #tpu.memory_space<vmem>>, vector<1x1024x256xbf16>
    %29 = vector.shape_cast %28 : vector<1x1024x256xbf16> to vector<1024x256xbf16>
    %cst_14 = arith.constant dense<0.000000e+00> : vector<8x256xf32>
    %30 = tpu.matmul %27, %29, %cst_14 {dimension_numbers = #tpu.dot_dimension_numbers<[1], [0], [0], [1], [0, 0, 1, 1], [], []>} : vector<8x1024xbf16>, vector<1024x256xbf16>, vector<8x256xf32> -> vector<8x256xf32>
    %cst_15 = arith.constant dense<0xFF800000> : vector<256xf32>
    %31 = vector.multi_reduction <maximumf>, %30, %cst_15 [0] : vector<8x256xf32> to vector<256xf32>
    %32 = vector.shape_cast %31 : vector<256xf32> to vector<1x256xf32>
    %33 = vector.broadcast %32 : vector<1x256xf32> to vector<8x256xf32>
    %34 = arith.subf %30, %33 : vector<8x256xf32>
    %35 = math.exp %34 : vector<8x256xf32>
    %cst_16 = arith.constant dense<0.000000e+00> : vector<256xf32>
    %36 = vector.multi_reduction <add>, %35, %cst_16 [0] : vector<8x256xf32> to vector<256xf32>
    %37 = vector.shape_cast %36 : vector<256xf32> to vector<1x256xf32>
    %38 = tpu.reciprocal %37 : vector<1x256xf32> -> vector<1x256xf32>
    %39 = vector.broadcast %38 : vector<1x256xf32> to vector<8x256xf32>
    %40 = arith.mulf %35, %39 : vector<8x256xf32>
    %41 = vector.extract_strided_slice %26 {offsets = [0, 0], sizes = [8, 256], strides = [1, 1]} : vector<8x1024xf32> to vector<8x256xf32>
    %42 = arith.mulf %40, %41 : vector<8x256xf32>
    %cst_17 = arith.constant dense<0.000000e+00> : vector<256xf32>
    %43 = vector.multi_reduction <add>, %42, %cst_17 [0] : vector<8x256xf32> to vector<256xf32>
    %44 = vector.shape_cast %43 : vector<256xf32> to vector<1x256xf32>
    %45 = vector.extract_strided_slice %26 {offsets = [0, 256], sizes = [8, 256], strides = [1, 1]} : vector<8x1024xf32> to vector<8x256xf32>
    %46 = arith.mulf %40, %45 : vector<8x256xf32>
    %cst_18 = arith.constant dense<0.000000e+00> : vector<256xf32>
    %47 = vector.multi_reduction <add>, %46, %cst_18 [0] : vector<8x256xf32> to vector<256xf32>
    %48 = vector.shape_cast %47 : vector<256xf32> to vector<1x256xf32>
    %49 = vector.extract_strided_slice %26 {offsets = [0, 512], sizes = [8, 256], strides = [1, 1]} : vector<8x1024xf32> to vector<8x256xf32>
    %50 = arith.mulf %40, %49 : vector<8x256xf32>
    %cst_19 = arith.constant dense<0.000000e+00> : vector<256xf32>
    %51 = vector.multi_reduction <add>, %50, %cst_19 [0] : vector<8x256xf32> to vector<256xf32>
    %52 = vector.shape_cast %51 : vector<256xf32> to vector<1x256xf32>
    %53 = vector.extract_strided_slice %26 {offsets = [0, 768], sizes = [8, 256], strides = [1, 1]} : vector<8x1024xf32> to vector<8x256xf32>
    %54 = arith.mulf %40, %53 : vector<8x256xf32>
    %cst_20 = arith.constant dense<0.000000e+00> : vector<256xf32>
    %55 = vector.multi_reduction <add>, %54, %cst_20 [0] : vector<8x256xf32> to vector<256xf32>
    %56 = vector.shape_cast %55 : vector<256xf32> to vector<1x256xf32>
    %c0_21 = arith.constant 0 : index
    %c16 = arith.constant 16 : index
    %57 = memref.load %arg7[%c0_21, %c16] : memref<2x128xf32, #tpu.memory_space<smem>>
    %c0_22 = arith.constant 0 : index
    %c0_23 = arith.constant 0 : index
    %58 = memref.load %arg7[%c0_22, %c0_23] : memref<2x128xf32, #tpu.memory_space<smem>>
    %59 = vector.broadcast %58 : f32 to vector<1x256xf32>
    %60 = arith.mulf %59, %44 : vector<1x256xf32>
    %61 = vector.broadcast %57 : f32 to vector<1x256xf32>
    %62 = arith.addf %61, %60 : vector<1x256xf32>
    %c0_24 = arith.constant 0 : index
    %c1 = arith.constant 1 : index
    %63 = memref.load %arg7[%c0_24, %c1] : memref<2x128xf32, #tpu.memory_space<smem>>
    %64 = vector.broadcast %63 : f32 to vector<1x256xf32>
    %65 = arith.mulf %64, %48 : vector<1x256xf32>
    %66 = arith.addf %62, %65 : vector<1x256xf32>
    %c0_25 = arith.constant 0 : index
    %c2 = arith.constant 2 : index
    %67 = memref.load %arg7[%c0_25, %c2] : memref<2x128xf32, #tpu.memory_space<smem>>
    %68 = vector.broadcast %67 : f32 to vector<1x256xf32>
    %69 = arith.mulf %68, %52 : vector<1x256xf32>
    %70 = arith.addf %66, %69 : vector<1x256xf32>
    %c0_26 = arith.constant 0 : index
    %c3 = arith.constant 3 : index
    %71 = memref.load %arg7[%c0_26, %c3] : memref<2x128xf32, #tpu.memory_space<smem>>
    %72 = vector.broadcast %71 : f32 to vector<1x256xf32>
    %73 = arith.mulf %72, %56 : vector<1x256xf32>
    %74 = arith.addf %70, %73 : vector<1x256xf32>
    %c0_27 = arith.constant 0 : index
    %c17 = arith.constant 17 : index
    %75 = memref.load %arg7[%c0_27, %c17] : memref<2x128xf32, #tpu.memory_space<smem>>
    %c0_28 = arith.constant 0 : index
    %c4 = arith.constant 4 : index
    %76 = memref.load %arg7[%c0_28, %c4] : memref<2x128xf32, #tpu.memory_space<smem>>
    %77 = vector.broadcast %76 : f32 to vector<1x256xf32>
    %78 = arith.mulf %77, %44 : vector<1x256xf32>
    %79 = vector.broadcast %75 : f32 to vector<1x256xf32>
    %80 = arith.addf %79, %78 : vector<1x256xf32>
    %c0_29 = arith.constant 0 : index
    %c5 = arith.constant 5 : index
    %81 = memref.load %arg7[%c0_29, %c5] : memref<2x128xf32, #tpu.memory_space<smem>>
    %82 = vector.broadcast %81 : f32 to vector<1x256xf32>
    %83 = arith.mulf %82, %48 : vector<1x256xf32>
    %84 = arith.addf %80, %83 : vector<1x256xf32>
    %c0_30 = arith.constant 0 : index
    %c6 = arith.constant 6 : index
    %85 = memref.load %arg7[%c0_30, %c6] : memref<2x128xf32, #tpu.memory_space<smem>>
    %86 = vector.broadcast %85 : f32 to vector<1x256xf32>
    %87 = arith.mulf %86, %52 : vector<1x256xf32>
    %88 = arith.addf %84, %87 : vector<1x256xf32>
    %c0_31 = arith.constant 0 : index
    %c7 = arith.constant 7 : index
    %89 = memref.load %arg7[%c0_31, %c7] : memref<2x128xf32, #tpu.memory_space<smem>>
    %90 = vector.broadcast %89 : f32 to vector<1x256xf32>
    %91 = arith.mulf %90, %56 : vector<1x256xf32>
    %92 = arith.addf %88, %91 : vector<1x256xf32>
    %c0_32 = arith.constant 0 : index
    %c18 = arith.constant 18 : index
    %93 = memref.load %arg7[%c0_32, %c18] : memref<2x128xf32, #tpu.memory_space<smem>>
    %c0_33 = arith.constant 0 : index
    %c8 = arith.constant 8 : index
    %94 = memref.load %arg7[%c0_33, %c8] : memref<2x128xf32, #tpu.memory_space<smem>>
    %95 = vector.broadcast %94 : f32 to vector<1x256xf32>
    %96 = arith.mulf %95, %44 : vector<1x256xf32>
    %97 = vector.broadcast %93 : f32 to vector<1x256xf32>
    %98 = arith.addf %97, %96 : vector<1x256xf32>
    %c0_34 = arith.constant 0 : index
    %c9 = arith.constant 9 : index
    %99 = memref.load %arg7[%c0_34, %c9] : memref<2x128xf32, #tpu.memory_space<smem>>
    %100 = vector.broadcast %99 : f32 to vector<1x256xf32>
    %101 = arith.mulf %100, %48 : vector<1x256xf32>
    %102 = arith.addf %98, %101 : vector<1x256xf32>
    %c0_35 = arith.constant 0 : index
    %c10 = arith.constant 10 : index
    %103 = memref.load %arg7[%c0_35, %c10] : memref<2x128xf32, #tpu.memory_space<smem>>
    %104 = vector.broadcast %103 : f32 to vector<1x256xf32>
    %105 = arith.mulf %104, %52 : vector<1x256xf32>
    %106 = arith.addf %102, %105 : vector<1x256xf32>
    %c0_36 = arith.constant 0 : index
    %c11 = arith.constant 11 : index
    %107 = memref.load %arg7[%c0_36, %c11] : memref<2x128xf32, #tpu.memory_space<smem>>
    %108 = vector.broadcast %107 : f32 to vector<1x256xf32>
    %109 = arith.mulf %108, %56 : vector<1x256xf32>
    %110 = arith.addf %106, %109 : vector<1x256xf32>
    %c0_37 = arith.constant 0 : index
    %c19 = arith.constant 19 : index
    %111 = memref.load %arg7[%c0_37, %c19] : memref<2x128xf32, #tpu.memory_space<smem>>
    %c0_38 = arith.constant 0 : index
    %c12 = arith.constant 12 : index
    %112 = memref.load %arg7[%c0_38, %c12] : memref<2x128xf32, #tpu.memory_space<smem>>
    %113 = vector.broadcast %112 : f32 to vector<1x256xf32>
    %114 = arith.mulf %113, %44 : vector<1x256xf32>
    %115 = vector.broadcast %111 : f32 to vector<1x256xf32>
    %116 = arith.addf %115, %114 : vector<1x256xf32>
    %c0_39 = arith.constant 0 : index
    %c13 = arith.constant 13 : index
    %117 = memref.load %arg7[%c0_39, %c13] : memref<2x128xf32, #tpu.memory_space<smem>>
    %118 = vector.broadcast %117 : f32 to vector<1x256xf32>
    %119 = arith.mulf %118, %48 : vector<1x256xf32>
    %120 = arith.addf %116, %119 : vector<1x256xf32>
    %c0_40 = arith.constant 0 : index
    %c14 = arith.constant 14 : index
    %121 = memref.load %arg7[%c0_40, %c14] : memref<2x128xf32, #tpu.memory_space<smem>>
    %122 = vector.broadcast %121 : f32 to vector<1x256xf32>
    %123 = arith.mulf %122, %52 : vector<1x256xf32>
    %124 = arith.addf %120, %123 : vector<1x256xf32>
    %c0_41 = arith.constant 0 : index
    %c15 = arith.constant 15 : index
    %125 = memref.load %arg7[%c0_41, %c15] : memref<2x128xf32, #tpu.memory_space<smem>>
    %126 = vector.broadcast %125 : f32 to vector<1x256xf32>
    %127 = arith.mulf %126, %56 : vector<1x256xf32>
    %128 = arith.addf %124, %127 : vector<1x256xf32>
    %129 = tpu.concatenate %74, %92, %110, %128 in 1 : vector<1x256xf32>, vector<1x256xf32>, vector<1x256xf32>, vector<1x256xf32> -> vector<1x1024xf32>
    %130 = vector.broadcast %129 : vector<1x1024xf32> to vector<8x1024xf32>
    %131 = arith.addf %2, %130 : vector<8x1024xf32>
    %cst_42 = arith.constant dense<0.000000e+00> : vector<8xf32>
    %132 = vector.multi_reduction <add>, %131, %cst_42 [1] : vector<8x1024xf32> to vector<8xf32>
    %133 = vector.shape_cast %132 : vector<8xf32> to vector<8x1xf32>
    %cst_43 = arith.constant 1.024000e+03 : f32
    %134 = vector.broadcast %cst_43 : f32 to vector<8x1xf32>
    %135 = arith.divf %133, %134 : vector<8x1xf32>
    %136 = vector.broadcast %135 : vector<8x1xf32> to vector<8x1024xf32>
    %137 = arith.subf %131, %136 : vector<8x1024xf32>
    %138 = arith.mulf %137, %137 : vector<8x1024xf32>
    %cst_44 = arith.constant dense<0.000000e+00> : vector<8xf32>
    %139 = vector.multi_reduction <add>, %138, %cst_44 [1] : vector<8x1024xf32> to vector<8xf32>
    %140 = vector.shape_cast %139 : vector<8xf32> to vector<8x1xf32>
    %cst_45 = arith.constant 1.024000e+03 : f32
    %141 = vector.broadcast %cst_45 : f32 to vector<8x1xf32>
    %142 = arith.divf %140, %141 : vector<8x1xf32>
    %143 = vector.broadcast %135 : vector<8x1xf32> to vector<8x1024xf32>
    %144 = arith.subf %131, %143 : vector<8x1024xf32>
    %cst_46 = arith.constant 9.99999974E-6 : f32
    %145 = vector.broadcast %cst_46 : f32 to vector<8x1xf32>
    %146 = arith.addf %142, %145 : vector<8x1xf32>
    %147 = math.rsqrt %146 : vector<8x1xf32>
    %148 = vector.broadcast %147 : vector<8x1xf32> to vector<8x1024xf32>
    %149 = arith.mulf %144, %148 : vector<8x1024xf32>
    %c0_47 = arith.constant 0 : index
    %c0_48 = arith.constant 0 : index
    %150 = vector.load %arg5[%c0_47, %c0_48] : memref<2x1024xf32, #tpu.memory_space<vmem>>, vector<1x1024xf32>
    %151 = vector.broadcast %150 : vector<1x1024xf32> to vector<8x1024xf32>
    %152 = arith.mulf %149, %151 : vector<8x1024xf32>
    %c0_49 = arith.constant 0 : index
    %c0_50 = arith.constant 0 : index
    %153 = vector.load %arg6[%c0_49, %c0_50] : memref<2x1024xf32, #tpu.memory_space<vmem>>, vector<1x1024xf32>
    %154 = vector.broadcast %153 : vector<1x1024xf32> to vector<8x1024xf32>
    %155 = arith.addf %152, %154 : vector<8x1024xf32>
    %c0_51 = arith.constant 0 : index
    %c52 = arith.constant 52 : index
    %156 = memref.load %arg7[%c0_51, %c52] : memref<2x128xf32, #tpu.memory_space<smem>>
    %c0_52 = arith.constant 0 : index
    %c20 = arith.constant 20 : index
    %157 = memref.load %arg7[%c0_52, %c20] : memref<2x128xf32, #tpu.memory_space<smem>>
    %158 = vector.extract_strided_slice %155 {offsets = [0, 0], sizes = [8, 256], strides = [1, 1]} : vector<8x1024xf32> to vector<8x256xf32>
    %159 = vector.broadcast %157 : f32 to vector<8x256xf32>
    %160 = arith.mulf %159, %158 : vector<8x256xf32>
    %161 = vector.broadcast %156 : f32 to vector<8x256xf32>
    %162 = arith.addf %161, %160 : vector<8x256xf32>
    %c0_53 = arith.constant 0 : index
    %c21 = arith.constant 21 : index
    %163 = memref.load %arg7[%c0_53, %c21] : memref<2x128xf32, #tpu.memory_space<smem>>
    %164 = vector.extract_strided_slice %155 {offsets = [0, 256], sizes = [8, 256], strides = [1, 1]} : vector<8x1024xf32> to vector<8x256xf32>
    %165 = vector.broadcast %163 : f32 to vector<8x256xf32>
    %166 = arith.mulf %165, %164 : vector<8x256xf32>
    %167 = arith.addf %162, %166 : vector<8x256xf32>
    %c0_54 = arith.constant 0 : index
    %c22 = arith.constant 22 : index
    %168 = memref.load %arg7[%c0_54, %c22] : memref<2x128xf32, #tpu.memory_space<smem>>
    %169 = vector.extract_strided_slice %155 {offsets = [0, 512], sizes = [8, 256], strides = [1, 1]} : vector<8x1024xf32> to vector<8x256xf32>
    %170 = vector.broadcast %168 : f32 to vector<8x256xf32>
    %171 = arith.mulf %170, %169 : vector<8x256xf32>
    %172 = arith.addf %167, %171 : vector<8x256xf32>
    %c0_55 = arith.constant 0 : index
    %c23 = arith.constant 23 : index
    %173 = memref.load %arg7[%c0_55, %c23] : memref<2x128xf32, #tpu.memory_space<smem>>
    %174 = vector.extract_strided_slice %155 {offsets = [0, 768], sizes = [8, 256], strides = [1, 1]} : vector<8x1024xf32> to vector<8x256xf32>
    %175 = vector.broadcast %173 : f32 to vector<8x256xf32>
    %176 = arith.mulf %175, %174 : vector<8x256xf32>
    %177 = arith.addf %172, %176 : vector<8x256xf32>
    %cst_56 = arith.constant 0.000000e+00 : f32
    %178 = vector.broadcast %cst_56 : f32 to vector<8x256xf32>
    %179 = arith.cmpf oge, %177, %178 : vector<8x256xf32>
    %cst_57 = arith.constant 0.00999999977 : f32
    %180 = vector.broadcast %cst_57 : f32 to vector<8x256xf32>
    %181 = arith.mulf %180, %177 : vector<8x256xf32>
    %182 = arith.select %179, %177, %181 : vector<8x256xi1>, vector<8x256xf32>
    %c0_58 = arith.constant 0 : index
    %c53 = arith.constant 53 : index
    %183 = memref.load %arg7[%c0_58, %c53] : memref<2x128xf32, #tpu.memory_space<smem>>
    %c0_59 = arith.constant 0 : index
    %c24 = arith.constant 24 : index
    %184 = memref.load %arg7[%c0_59, %c24] : memref<2x128xf32, #tpu.memory_space<smem>>
    %185 = vector.extract_strided_slice %155 {offsets = [0, 0], sizes = [8, 256], strides = [1, 1]} : vector<8x1024xf32> to vector<8x256xf32>
    %186 = vector.broadcast %184 : f32 to vector<8x256xf32>
    %187 = arith.mulf %186, %185 : vector<8x256xf32>
    %188 = vector.broadcast %183 : f32 to vector<8x256xf32>
    %189 = arith.addf %188, %187 : vector<8x256xf32>
    %c0_60 = arith.constant 0 : index
    %c25 = arith.constant 25 : index
    %190 = memref.load %arg7[%c0_60, %c25] : memref<2x128xf32, #tpu.memory_space<smem>>
    %191 = vector.extract_strided_slice %155 {offsets = [0, 256], sizes = [8, 256], strides = [1, 1]} : vector<8x1024xf32> to vector<8x256xf32>
    %192 = vector.broadcast %190 : f32 to vector<8x256xf32>
    %193 = arith.mulf %192, %191 : vector<8x256xf32>
    %194 = arith.addf %189, %193 : vector<8x256xf32>
    %c0_61 = arith.constant 0 : index
    %c26 = arith.constant 26 : index
    %195 = memref.load %arg7[%c0_61, %c26] : memref<2x128xf32, #tpu.memory_space<smem>>
    %196 = vector.extract_strided_slice %155 {offsets = [0, 512], sizes = [8, 256], strides = [1, 1]} : vector<8x1024xf32> to vector<8x256xf32>
    %197 = vector.broadcast %195 : f32 to vector<8x256xf32>
    %198 = arith.mulf %197, %196 : vector<8x256xf32>
    %199 = arith.addf %194, %198 : vector<8x256xf32>
    %c0_62 = arith.constant 0 : index
    %c27 = arith.constant 27 : index
    %200 = memref.load %arg7[%c0_62, %c27] : memref<2x128xf32, #tpu.memory_space<smem>>
    %201 = vector.extract_strided_slice %155 {offsets = [0, 768], sizes = [8, 256], strides = [1, 1]} : vector<8x1024xf32> to vector<8x256xf32>
    %202 = vector.broadcast %200 : f32 to vector<8x256xf32>
    %203 = arith.mulf %202, %201 : vector<8x256xf32>
    %204 = arith.addf %199, %203 : vector<8x256xf32>
    %cst_63 = arith.constant 0.000000e+00 : f32
    %205 = vector.broadcast %cst_63 : f32 to vector<8x256xf32>
    %206 = arith.cmpf oge, %204, %205 : vector<8x256xf32>
    %cst_64 = arith.constant 0.00999999977 : f32
    %207 = vector.broadcast %cst_64 : f32 to vector<8x256xf32>
    %208 = arith.mulf %207, %204 : vector<8x256xf32>
    %209 = arith.select %206, %204, %208 : vector<8x256xi1>, vector<8x256xf32>
    %c0_65 = arith.constant 0 : index
    %c54 = arith.constant 54 : index
    %210 = memref.load %arg7[%c0_65, %c54] : memref<2x128xf32, #tpu.memory_space<smem>>
    %c0_66 = arith.constant 0 : index
    %c28 = arith.constant 28 : index
    %211 = memref.load %arg7[%c0_66, %c28] : memref<2x128xf32, #tpu.memory_space<smem>>
    %212 = vector.extract_strided_slice %155 {offsets = [0, 0], sizes = [8, 256], strides = [1, 1]} : vector<8x1024xf32> to vector<8x256xf32>
    %213 = vector.broadcast %211 : f32 to vector<8x256xf32>
    %214 = arith.mulf %213, %212 : vector<8x256xf32>
    %215 = vector.broadcast %210 : f32 to vector<8x256xf32>
    %216 = arith.addf %215, %214 : vector<8x256xf32>
    %c0_67 = arith.constant 0 : index
    %c29 = arith.constant 29 : index
    %217 = memref.load %arg7[%c0_67, %c29] : memref<2x128xf32, #tpu.memory_space<smem>>
    %218 = vector.extract_strided_slice %155 {offsets = [0, 256], sizes = [8, 256], strides = [1, 1]} : vector<8x1024xf32> to vector<8x256xf32>
    %219 = vector.broadcast %217 : f32 to vector<8x256xf32>
    %220 = arith.mulf %219, %218 : vector<8x256xf32>
    %221 = arith.addf %216, %220 : vector<8x256xf32>
    %c0_68 = arith.constant 0 : index
    %c30 = arith.constant 30 : index
    %222 = memref.load %arg7[%c0_68, %c30] : memref<2x128xf32, #tpu.memory_space<smem>>
    %223 = vector.extract_strided_slice %155 {offsets = [0, 512], sizes = [8, 256], strides = [1, 1]} : vector<8x1024xf32> to vector<8x256xf32>
    %224 = vector.broadcast %222 : f32 to vector<8x256xf32>
    %225 = arith.mulf %224, %223 : vector<8x256xf32>
    %226 = arith.addf %221, %225 : vector<8x256xf32>
    %c0_69 = arith.constant 0 : index
    %c31 = arith.constant 31 : index
    %227 = memref.load %arg7[%c0_69, %c31] : memref<2x128xf32, #tpu.memory_space<smem>>
    %228 = vector.extract_strided_slice %155 {offsets = [0, 768], sizes = [8, 256], strides = [1, 1]} : vector<8x1024xf32> to vector<8x256xf32>
    %229 = vector.broadcast %227 : f32 to vector<8x256xf32>
    %230 = arith.mulf %229, %228 : vector<8x256xf32>
    %231 = arith.addf %226, %230 : vector<8x256xf32>
    %cst_70 = arith.constant 0.000000e+00 : f32
    %232 = vector.broadcast %cst_70 : f32 to vector<8x256xf32>
    %233 = arith.cmpf oge, %231, %232 : vector<8x256xf32>
    %cst_71 = arith.constant 0.00999999977 : f32
    %234 = vector.broadcast %cst_71 : f32 to vector<8x256xf32>
    %235 = arith.mulf %234, %231 : vector<8x256xf32>
    %236 = arith.select %233, %231, %235 : vector<8x256xi1>, vector<8x256xf32>
    %c0_72 = arith.constant 0 : index
    %c55 = arith.constant 55 : index
    %237 = memref.load %arg7[%c0_72, %c55] : memref<2x128xf32, #tpu.memory_space<smem>>
    %c0_73 = arith.constant 0 : index
    %c32 = arith.constant 32 : index
    %238 = memref.load %arg7[%c0_73, %c32] : memref<2x128xf32, #tpu.memory_space<smem>>
    %239 = vector.extract_strided_slice %155 {offsets = [0, 0], sizes = [8, 256], strides = [1, 1]} : vector<8x1024xf32> to vector<8x256xf32>
    %240 = vector.broadcast %238 : f32 to vector<8x256xf32>
    %241 = arith.mulf %240, %239 : vector<8x256xf32>
    %242 = vector.broadcast %237 : f32 to vector<8x256xf32>
    %243 = arith.addf %242, %241 : vector<8x256xf32>
    %c0_74 = arith.constant 0 : index
    %c33 = arith.constant 33 : index
    %244 = memref.load %arg7[%c0_74, %c33] : memref<2x128xf32, #tpu.memory_space<smem>>
    %245 = vector.extract_strided_slice %155 {offsets = [0, 256], sizes = [8, 256], strides = [1, 1]} : vector<8x1024xf32> to vector<8x256xf32>
    %246 = vector.broadcast %244 : f32 to vector<8x256xf32>
    %247 = arith.mulf %246, %245 : vector<8x256xf32>
    %248 = arith.addf %243, %247 : vector<8x256xf32>
    %c0_75 = arith.constant 0 : index
    %c34 = arith.constant 34 : index
    %249 = memref.load %arg7[%c0_75, %c34] : memref<2x128xf32, #tpu.memory_space<smem>>
    %250 = vector.extract_strided_slice %155 {offsets = [0, 512], sizes = [8, 256], strides = [1, 1]} : vector<8x1024xf32> to vector<8x256xf32>
    %251 = vector.broadcast %249 : f32 to vector<8x256xf32>
    %252 = arith.mulf %251, %250 : vector<8x256xf32>
    %253 = arith.addf %248, %252 : vector<8x256xf32>
    %c0_76 = arith.constant 0 : index
    %c35 = arith.constant 35 : index
    %254 = memref.load %arg7[%c0_76, %c35] : memref<2x128xf32, #tpu.memory_space<smem>>
    %255 = vector.extract_strided_slice %155 {offsets = [0, 768], sizes = [8, 256], strides = [1, 1]} : vector<8x1024xf32> to vector<8x256xf32>
    %256 = vector.broadcast %254 : f32 to vector<8x256xf32>
    %257 = arith.mulf %256, %255 : vector<8x256xf32>
    %258 = arith.addf %253, %257 : vector<8x256xf32>
    %cst_77 = arith.constant 0.000000e+00 : f32
    %259 = vector.broadcast %cst_77 : f32 to vector<8x256xf32>
    %260 = arith.cmpf oge, %258, %259 : vector<8x256xf32>
    %cst_78 = arith.constant 0.00999999977 : f32
    %261 = vector.broadcast %cst_78 : f32 to vector<8x256xf32>
    %262 = arith.mulf %261, %258 : vector<8x256xf32>
    %263 = arith.select %260, %258, %262 : vector<8x256xi1>, vector<8x256xf32>
    %c0_79 = arith.constant 0 : index
    %c56 = arith.constant 56 : index
    %264 = memref.load %arg7[%c0_79, %c56] : memref<2x128xf32, #tpu.memory_space<smem>>
    %c0_80 = arith.constant 0 : index
    %c36 = arith.constant 36 : index
    %265 = memref.load %arg7[%c0_80, %c36] : memref<2x128xf32, #tpu.memory_space<smem>>
    %266 = vector.extract_strided_slice %155 {offsets = [0, 0], sizes = [8, 256], strides = [1, 1]} : vector<8x1024xf32> to vector<8x256xf32>
    %267 = vector.broadcast %265 : f32 to vector<8x256xf32>
    %268 = arith.mulf %267, %266 : vector<8x256xf32>
    %269 = vector.broadcast %264 : f32 to vector<8x256xf32>
    %270 = arith.addf %269, %268 : vector<8x256xf32>
    %c0_81 = arith.constant 0 : index
    %c37 = arith.constant 37 : index
    %271 = memref.load %arg7[%c0_81, %c37] : memref<2x128xf32, #tpu.memory_space<smem>>
    %272 = vector.extract_strided_slice %155 {offsets = [0, 256], sizes = [8, 256], strides = [1, 1]} : vector<8x1024xf32> to vector<8x256xf32>
    %273 = vector.broadcast %271 : f32 to vector<8x256xf32>
    %274 = arith.mulf %273, %272 : vector<8x256xf32>
    %275 = arith.addf %270, %274 : vector<8x256xf32>
    %c0_82 = arith.constant 0 : index
    %c38 = arith.constant 38 : index
    %276 = memref.load %arg7[%c0_82, %c38] : memref<2x128xf32, #tpu.memory_space<smem>>
    %277 = vector.extract_strided_slice %155 {offsets = [0, 512], sizes = [8, 256], strides = [1, 1]} : vector<8x1024xf32> to vector<8x256xf32>
    %278 = vector.broadcast %276 : f32 to vector<8x256xf32>
    %279 = arith.mulf %278, %277 : vector<8x256xf32>
    %280 = arith.addf %275, %279 : vector<8x256xf32>
    %c0_83 = arith.constant 0 : index
    %c39 = arith.constant 39 : index
    %281 = memref.load %arg7[%c0_83, %c39] : memref<2x128xf32, #tpu.memory_space<smem>>
    %282 = vector.extract_strided_slice %155 {offsets = [0, 768], sizes = [8, 256], strides = [1, 1]} : vector<8x1024xf32> to vector<8x256xf32>
    %283 = vector.broadcast %281 : f32 to vector<8x256xf32>
    %284 = arith.mulf %283, %282 : vector<8x256xf32>
    %285 = arith.addf %280, %284 : vector<8x256xf32>
    %cst_84 = arith.constant 0.000000e+00 : f32
    %286 = vector.broadcast %cst_84 : f32 to vector<8x256xf32>
    %287 = arith.cmpf oge, %285, %286 : vector<8x256xf32>
    %cst_85 = arith.constant 0.00999999977 : f32
    %288 = vector.broadcast %cst_85 : f32 to vector<8x256xf32>
    %289 = arith.mulf %288, %285 : vector<8x256xf32>
    %290 = arith.select %287, %285, %289 : vector<8x256xi1>, vector<8x256xf32>
    %c0_86 = arith.constant 0 : index
    %c57 = arith.constant 57 : index
    %291 = memref.load %arg7[%c0_86, %c57] : memref<2x128xf32, #tpu.memory_space<smem>>
    %c0_87 = arith.constant 0 : index
    %c40 = arith.constant 40 : index
    %292 = memref.load %arg7[%c0_87, %c40] : memref<2x128xf32, #tpu.memory_space<smem>>
    %293 = vector.extract_strided_slice %155 {offsets = [0, 0], sizes = [8, 256], strides = [1, 1]} : vector<8x1024xf32> to vector<8x256xf32>
    %294 = vector.broadcast %292 : f32 to vector<8x256xf32>
    %295 = arith.mulf %294, %293 : vector<8x256xf32>
    %296 = vector.broadcast %291 : f32 to vector<8x256xf32>
    %297 = arith.addf %296, %295 : vector<8x256xf32>
    %c0_88 = arith.constant 0 : index
    %c41 = arith.constant 41 : index
    %298 = memref.load %arg7[%c0_88, %c41] : memref<2x128xf32, #tpu.memory_space<smem>>
    %299 = vector.extract_strided_slice %155 {offsets = [0, 256], sizes = [8, 256], strides = [1, 1]} : vector<8x1024xf32> to vector<8x256xf32>
    %300 = vector.broadcast %298 : f32 to vector<8x256xf32>
    %301 = arith.mulf %300, %299 : vector<8x256xf32>
    %302 = arith.addf %297, %301 : vector<8x256xf32>
    %c0_89 = arith.constant 0 : index
    %c42 = arith.constant 42 : index
    %303 = memref.load %arg7[%c0_89, %c42] : memref<2x128xf32, #tpu.memory_space<smem>>
    %304 = vector.extract_strided_slice %155 {offsets = [0, 512], sizes = [8, 256], strides = [1, 1]} : vector<8x1024xf32> to vector<8x256xf32>
    %305 = vector.broadcast %303 : f32 to vector<8x256xf32>
    %306 = arith.mulf %305, %304 : vector<8x256xf32>
    %307 = arith.addf %302, %306 : vector<8x256xf32>
    %c0_90 = arith.constant 0 : index
    %c43 = arith.constant 43 : index
    %308 = memref.load %arg7[%c0_90, %c43] : memref<2x128xf32, #tpu.memory_space<smem>>
    %309 = vector.extract_strided_slice %155 {offsets = [0, 768], sizes = [8, 256], strides = [1, 1]} : vector<8x1024xf32> to vector<8x256xf32>
    %310 = vector.broadcast %308 : f32 to vector<8x256xf32>
    %311 = arith.mulf %310, %309 : vector<8x256xf32>
    %312 = arith.addf %307, %311 : vector<8x256xf32>
    %cst_91 = arith.constant 0.000000e+00 : f32
    %313 = vector.broadcast %cst_91 : f32 to vector<8x256xf32>
    %314 = arith.cmpf oge, %312, %313 : vector<8x256xf32>
    %cst_92 = arith.constant 0.00999999977 : f32
    %315 = vector.broadcast %cst_92 : f32 to vector<8x256xf32>
    %316 = arith.mulf %315, %312 : vector<8x256xf32>
    %317 = arith.select %314, %312, %316 : vector<8x256xi1>, vector<8x256xf32>
    %c0_93 = arith.constant 0 : index
    %c58 = arith.constant 58 : index
    %318 = memref.load %arg7[%c0_93, %c58] : memref<2x128xf32, #tpu.memory_space<smem>>
    %c0_94 = arith.constant 0 : index
    %c44 = arith.constant 44 : index
    %319 = memref.load %arg7[%c0_94, %c44] : memref<2x128xf32, #tpu.memory_space<smem>>
    %320 = vector.extract_strided_slice %155 {offsets = [0, 0], sizes = [8, 256], strides = [1, 1]} : vector<8x1024xf32> to vector<8x256xf32>
    %321 = vector.broadcast %319 : f32 to vector<8x256xf32>
    %322 = arith.mulf %321, %320 : vector<8x256xf32>
    %323 = vector.broadcast %318 : f32 to vector<8x256xf32>
    %324 = arith.addf %323, %322 : vector<8x256xf32>
    %c0_95 = arith.constant 0 : index
    %c45 = arith.constant 45 : index
    %325 = memref.load %arg7[%c0_95, %c45] : memref<2x128xf32, #tpu.memory_space<smem>>
    %326 = vector.extract_strided_slice %155 {offsets = [0, 256], sizes = [8, 256], strides = [1, 1]} : vector<8x1024xf32> to vector<8x256xf32>
    %327 = vector.broadcast %325 : f32 to vector<8x256xf32>
    %328 = arith.mulf %327, %326 : vector<8x256xf32>
    %329 = arith.addf %324, %328 : vector<8x256xf32>
    %c0_96 = arith.constant 0 : index
    %c46 = arith.constant 46 : index
    %330 = memref.load %arg7[%c0_96, %c46] : memref<2x128xf32, #tpu.memory_space<smem>>
    %331 = vector.extract_strided_slice %155 {offsets = [0, 512], sizes = [8, 256], strides = [1, 1]} : vector<8x1024xf32> to vector<8x256xf32>
    %332 = vector.broadcast %330 : f32 to vector<8x256xf32>
    %333 = arith.mulf %332, %331 : vector<8x256xf32>
    %334 = arith.addf %329, %333 : vector<8x256xf32>
    %c0_97 = arith.constant 0 : index
    %c47 = arith.constant 47 : index
    %335 = memref.load %arg7[%c0_97, %c47] : memref<2x128xf32, #tpu.memory_space<smem>>
    %336 = vector.extract_strided_slice %155 {offsets = [0, 768], sizes = [8, 256], strides = [1, 1]} : vector<8x1024xf32> to vector<8x256xf32>
    %337 = vector.broadcast %335 : f32 to vector<8x256xf32>
    %338 = arith.mulf %337, %336 : vector<8x256xf32>
    %339 = arith.addf %334, %338 : vector<8x256xf32>
    %cst_98 = arith.constant 0.000000e+00 : f32
    %340 = vector.broadcast %cst_98 : f32 to vector<8x256xf32>
    %341 = arith.cmpf oge, %339, %340 : vector<8x256xf32>
    %cst_99 = arith.constant 0.00999999977 : f32
    %342 = vector.broadcast %cst_99 : f32 to vector<8x256xf32>
    %343 = arith.mulf %342, %339 : vector<8x256xf32>
    %344 = arith.select %341, %339, %343 : vector<8x256xi1>, vector<8x256xf32>
    %c0_100 = arith.constant 0 : index
    %c59 = arith.constant 59 : index
    %345 = memref.load %arg7[%c0_100, %c59] : memref<2x128xf32, #tpu.memory_space<smem>>
    %c0_101 = arith.constant 0 : index
    %c48 = arith.constant 48 : index
    %346 = memref.load %arg7[%c0_101, %c48] : memref<2x128xf32, #tpu.memory_space<smem>>
    %347 = vector.extract_strided_slice %155 {offsets = [0, 0], sizes = [8, 256], strides = [1, 1]} : vector<8x1024xf32> to vector<8x256xf32>
    %348 = vector.broadcast %346 : f32 to vector<8x256xf32>
    %349 = arith.mulf %348, %347 : vector<8x256xf32>
    %350 = vector.broadcast %345 : f32 to vector<8x256xf32>
    %351 = arith.addf %350, %349 : vector<8x256xf32>
    %c0_102 = arith.constant 0 : index
    %c49 = arith.constant 49 : index
    %352 = memref.load %arg7[%c0_102, %c49] : memref<2x128xf32, #tpu.memory_space<smem>>
    %353 = vector.extract_strided_slice %155 {offsets = [0, 256], sizes = [8, 256], strides = [1, 1]} : vector<8x1024xf32> to vector<8x256xf32>
    %354 = vector.broadcast %352 : f32 to vector<8x256xf32>
    %355 = arith.mulf %354, %353 : vector<8x256xf32>
    %356 = arith.addf %351, %355 : vector<8x256xf32>
    %c0_103 = arith.constant 0 : index
    %c50 = arith.constant 50 : index
    %357 = memref.load %arg7[%c0_103, %c50] : memref<2x128xf32, #tpu.memory_space<smem>>
    %358 = vector.extract_strided_slice %155 {offsets = [0, 512], sizes = [8, 256], strides = [1, 1]} : vector<8x1024xf32> to vector<8x256xf32>
    %359 = vector.broadcast %357 : f32 to vector<8x256xf32>
    %360 = arith.mulf %359, %358 : vector<8x256xf32>
    %361 = arith.addf %356, %360 : vector<8x256xf32>
    %c0_104 = arith.constant 0 : index
    %c51 = arith.constant 51 : index
    %362 = memref.load %arg7[%c0_104, %c51] : memref<2x128xf32, #tpu.memory_space<smem>>
    %363 = vector.extract_strided_slice %155 {offsets = [0, 768], sizes = [8, 256], strides = [1, 1]} : vector<8x1024xf32> to vector<8x256xf32>
    %364 = vector.broadcast %362 : f32 to vector<8x256xf32>
    %365 = arith.mulf %364, %363 : vector<8x256xf32>
    %366 = arith.addf %361, %365 : vector<8x256xf32>
    %cst_105 = arith.constant 0.000000e+00 : f32
    %367 = vector.broadcast %cst_105 : f32 to vector<8x256xf32>
    %368 = arith.cmpf oge, %366, %367 : vector<8x256xf32>
    %cst_106 = arith.constant 0.00999999977 : f32
    %369 = vector.broadcast %cst_106 : f32 to vector<8x256xf32>
    %370 = arith.mulf %369, %366 : vector<8x256xf32>
    %371 = arith.select %368, %366, %370 : vector<8x256xi1>, vector<8x256xf32>
    %c0_107 = arith.constant 0 : index
    %c92 = arith.constant 92 : index
    %372 = memref.load %arg7[%c0_107, %c92] : memref<2x128xf32, #tpu.memory_space<smem>>
    %c0_108 = arith.constant 0 : index
    %c60 = arith.constant 60 : index
    %373 = memref.load %arg7[%c0_108, %c60] : memref<2x128xf32, #tpu.memory_space<smem>>
    %374 = vector.broadcast %373 : f32 to vector<8x256xf32>
    %375 = arith.mulf %374, %182 : vector<8x256xf32>
    %376 = vector.broadcast %372 : f32 to vector<8x256xf32>
    %377 = arith.addf %376, %375 : vector<8x256xf32>
    %c0_109 = arith.constant 0 : index
    %c61 = arith.constant 61 : index
    %378 = memref.load %arg7[%c0_109, %c61] : memref<2x128xf32, #tpu.memory_space<smem>>
    %379 = vector.broadcast %378 : f32 to vector<8x256xf32>
    %380 = arith.mulf %379, %209 : vector<8x256xf32>
    %381 = arith.addf %377, %380 : vector<8x256xf32>
    %c0_110 = arith.constant 0 : index
    %c62 = arith.constant 62 : index
    %382 = memref.load %arg7[%c0_110, %c62] : memref<2x128xf32, #tpu.memory_space<smem>>
    %383 = vector.broadcast %382 : f32 to vector<8x256xf32>
    %384 = arith.mulf %383, %236 : vector<8x256xf32>
    %385 = arith.addf %381, %384 : vector<8x256xf32>
    %c0_111 = arith.constant 0 : index
    %c63 = arith.constant 63 : index
    %386 = memref.load %arg7[%c0_111, %c63] : memref<2x128xf32, #tpu.memory_space<smem>>
    %387 = vector.broadcast %386 : f32 to vector<8x256xf32>
    %388 = arith.mulf %387, %263 : vector<8x256xf32>
    %389 = arith.addf %385, %388 : vector<8x256xf32>
    %c0_112 = arith.constant 0 : index
    %c64 = arith.constant 64 : index
    %390 = memref.load %arg7[%c0_112, %c64] : memref<2x128xf32, #tpu.memory_space<smem>>
    %391 = vector.broadcast %390 : f32 to vector<8x256xf32>
    %392 = arith.mulf %391, %290 : vector<8x256xf32>
    %393 = arith.addf %389, %392 : vector<8x256xf32>
    %c0_113 = arith.constant 0 : index
    %c65 = arith.constant 65 : index
    %394 = memref.load %arg7[%c0_113, %c65] : memref<2x128xf32, #tpu.memory_space<smem>>
    %395 = vector.broadcast %394 : f32 to vector<8x256xf32>
    %396 = arith.mulf %395, %317 : vector<8x256xf32>
    %397 = arith.addf %393, %396 : vector<8x256xf32>
    %c0_114 = arith.constant 0 : index
    %c66 = arith.constant 66 : index
    %398 = memref.load %arg7[%c0_114, %c66] : memref<2x128xf32, #tpu.memory_space<smem>>
    %399 = vector.broadcast %398 : f32 to vector<8x256xf32>
    %400 = arith.mulf %399, %344 : vector<8x256xf32>
    %401 = arith.addf %397, %400 : vector<8x256xf32>
    %c0_115 = arith.constant 0 : index
    %c67 = arith.constant 67 : index
    %402 = memref.load %arg7[%c0_115, %c67] : memref<2x128xf32, #tpu.memory_space<smem>>
    %403 = vector.broadcast %402 : f32 to vector<8x256xf32>
    %404 = arith.mulf %403, %371 : vector<8x256xf32>
    %405 = arith.addf %401, %404 : vector<8x256xf32>
    %406 = vector.extract_strided_slice %131 {offsets = [0, 0], sizes = [8, 256], strides = [1, 1]} : vector<8x1024xf32> to vector<8x256xf32>
    %407 = arith.addf %406, %405 : vector<8x256xf32>
    %c0_116 = arith.constant 0 : index
    %c93 = arith.constant 93 : index
    %408 = memref.load %arg7[%c0_116, %c93] : memref<2x128xf32, #tpu.memory_space<smem>>
    %c0_117 = arith.constant 0 : index
    %c68 = arith.constant 68 : index
    %409 = memref.load %arg7[%c0_117, %c68] : memref<2x128xf32, #tpu.memory_space<smem>>
    %410 = vector.broadcast %409 : f32 to vector<8x256xf32>
    %411 = arith.mulf %410, %182 : vector<8x256xf32>
    %412 = vector.broadcast %408 : f32 to vector<8x256xf32>
    %413 = arith.addf %412, %411 : vector<8x256xf32>
    %c0_118 = arith.constant 0 : index
    %c69 = arith.constant 69 : index
    %414 = memref.load %arg7[%c0_118, %c69] : memref<2x128xf32, #tpu.memory_space<smem>>
    %415 = vector.broadcast %414 : f32 to vector<8x256xf32>
    %416 = arith.mulf %415, %209 : vector<8x256xf32>
    %417 = arith.addf %413, %416 : vector<8x256xf32>
    %c0_119 = arith.constant 0 : index
    %c70 = arith.constant 70 : index
    %418 = memref.load %arg7[%c0_119, %c70] : memref<2x128xf32, #tpu.memory_space<smem>>
    %419 = vector.broadcast %418 : f32 to vector<8x256xf32>
    %420 = arith.mulf %419, %236 : vector<8x256xf32>
    %421 = arith.addf %417, %420 : vector<8x256xf32>
    %c0_120 = arith.constant 0 : index
    %c71 = arith.constant 71 : index
    %422 = memref.load %arg7[%c0_120, %c71] : memref<2x128xf32, #tpu.memory_space<smem>>
    %423 = vector.broadcast %422 : f32 to vector<8x256xf32>
    %424 = arith.mulf %423, %263 : vector<8x256xf32>
    %425 = arith.addf %421, %424 : vector<8x256xf32>
    %c0_121 = arith.constant 0 : index
    %c72 = arith.constant 72 : index
    %426 = memref.load %arg7[%c0_121, %c72] : memref<2x128xf32, #tpu.memory_space<smem>>
    %427 = vector.broadcast %426 : f32 to vector<8x256xf32>
    %428 = arith.mulf %427, %290 : vector<8x256xf32>
    %429 = arith.addf %425, %428 : vector<8x256xf32>
    %c0_122 = arith.constant 0 : index
    %c73 = arith.constant 73 : index
    %430 = memref.load %arg7[%c0_122, %c73] : memref<2x128xf32, #tpu.memory_space<smem>>
    %431 = vector.broadcast %430 : f32 to vector<8x256xf32>
    %432 = arith.mulf %431, %317 : vector<8x256xf32>
    %433 = arith.addf %429, %432 : vector<8x256xf32>
    %c0_123 = arith.constant 0 : index
    %c74 = arith.constant 74 : index
    %434 = memref.load %arg7[%c0_123, %c74] : memref<2x128xf32, #tpu.memory_space<smem>>
    %435 = vector.broadcast %434 : f32 to vector<8x256xf32>
    %436 = arith.mulf %435, %344 : vector<8x256xf32>
    %437 = arith.addf %433, %436 : vector<8x256xf32>
    %c0_124 = arith.constant 0 : index
    %c75 = arith.constant 75 : index
    %438 = memref.load %arg7[%c0_124, %c75] : memref<2x128xf32, #tpu.memory_space<smem>>
    %439 = vector.broadcast %438 : f32 to vector<8x256xf32>
    %440 = arith.mulf %439, %371 : vector<8x256xf32>
    %441 = arith.addf %437, %440 : vector<8x256xf32>
    %442 = vector.extract_strided_slice %131 {offsets = [0, 256], sizes = [8, 256], strides = [1, 1]} : vector<8x1024xf32> to vector<8x256xf32>
    %443 = arith.addf %442, %441 : vector<8x256xf32>
    %c0_125 = arith.constant 0 : index
    %c94 = arith.constant 94 : index
    %444 = memref.load %arg7[%c0_125, %c94] : memref<2x128xf32, #tpu.memory_space<smem>>
    %c0_126 = arith.constant 0 : index
    %c76 = arith.constant 76 : index
    %445 = memref.load %arg7[%c0_126, %c76] : memref<2x128xf32, #tpu.memory_space<smem>>
    %446 = vector.broadcast %445 : f32 to vector<8x256xf32>
    %447 = arith.mulf %446, %182 : vector<8x256xf32>
    %448 = vector.broadcast %444 : f32 to vector<8x256xf32>
    %449 = arith.addf %448, %447 : vector<8x256xf32>
    %c0_127 = arith.constant 0 : index
    %c77 = arith.constant 77 : index
    %450 = memref.load %arg7[%c0_127, %c77] : memref<2x128xf32, #tpu.memory_space<smem>>
    %451 = vector.broadcast %450 : f32 to vector<8x256xf32>
    %452 = arith.mulf %451, %209 : vector<8x256xf32>
    %453 = arith.addf %449, %452 : vector<8x256xf32>
    %c0_128 = arith.constant 0 : index
    %c78 = arith.constant 78 : index
    %454 = memref.load %arg7[%c0_128, %c78] : memref<2x128xf32, #tpu.memory_space<smem>>
    %455 = vector.broadcast %454 : f32 to vector<8x256xf32>
    %456 = arith.mulf %455, %236 : vector<8x256xf32>
    %457 = arith.addf %453, %456 : vector<8x256xf32>
    %c0_129 = arith.constant 0 : index
    %c79 = arith.constant 79 : index
    %458 = memref.load %arg7[%c0_129, %c79] : memref<2x128xf32, #tpu.memory_space<smem>>
    %459 = vector.broadcast %458 : f32 to vector<8x256xf32>
    %460 = arith.mulf %459, %263 : vector<8x256xf32>
    %461 = arith.addf %457, %460 : vector<8x256xf32>
    %c0_130 = arith.constant 0 : index
    %c80 = arith.constant 80 : index
    %462 = memref.load %arg7[%c0_130, %c80] : memref<2x128xf32, #tpu.memory_space<smem>>
    %463 = vector.broadcast %462 : f32 to vector<8x256xf32>
    %464 = arith.mulf %463, %290 : vector<8x256xf32>
    %465 = arith.addf %461, %464 : vector<8x256xf32>
    %c0_131 = arith.constant 0 : index
    %c81 = arith.constant 81 : index
    %466 = memref.load %arg7[%c0_131, %c81] : memref<2x128xf32, #tpu.memory_space<smem>>
    %467 = vector.broadcast %466 : f32 to vector<8x256xf32>
    %468 = arith.mulf %467, %317 : vector<8x256xf32>
    %469 = arith.addf %465, %468 : vector<8x256xf32>
    %c0_132 = arith.constant 0 : index
    %c82 = arith.constant 82 : index
    %470 = memref.load %arg7[%c0_132, %c82] : memref<2x128xf32, #tpu.memory_space<smem>>
    %471 = vector.broadcast %470 : f32 to vector<8x256xf32>
    %472 = arith.mulf %471, %344 : vector<8x256xf32>
    %473 = arith.addf %469, %472 : vector<8x256xf32>
    %c0_133 = arith.constant 0 : index
    %c83 = arith.constant 83 : index
    %474 = memref.load %arg7[%c0_133, %c83] : memref<2x128xf32, #tpu.memory_space<smem>>
    %475 = vector.broadcast %474 : f32 to vector<8x256xf32>
    %476 = arith.mulf %475, %371 : vector<8x256xf32>
    %477 = arith.addf %473, %476 : vector<8x256xf32>
    %478 = vector.extract_strided_slice %131 {offsets = [0, 512], sizes = [8, 256], strides = [1, 1]} : vector<8x1024xf32> to vector<8x256xf32>
    %479 = arith.addf %478, %477 : vector<8x256xf32>
    %c0_134 = arith.constant 0 : index
    %c95 = arith.constant 95 : index
    %480 = memref.load %arg7[%c0_134, %c95] : memref<2x128xf32, #tpu.memory_space<smem>>
    %c0_135 = arith.constant 0 : index
    %c84 = arith.constant 84 : index
    %481 = memref.load %arg7[%c0_135, %c84] : memref<2x128xf32, #tpu.memory_space<smem>>
    %482 = vector.broadcast %481 : f32 to vector<8x256xf32>
    %483 = arith.mulf %482, %182 : vector<8x256xf32>
    %484 = vector.broadcast %480 : f32 to vector<8x256xf32>
    %485 = arith.addf %484, %483 : vector<8x256xf32>
    %c0_136 = arith.constant 0 : index
    %c85 = arith.constant 85 : index
    %486 = memref.load %arg7[%c0_136, %c85] : memref<2x128xf32, #tpu.memory_space<smem>>
    %487 = vector.broadcast %486 : f32 to vector<8x256xf32>
    %488 = arith.mulf %487, %209 : vector<8x256xf32>
    %489 = arith.addf %485, %488 : vector<8x256xf32>
    %c0_137 = arith.constant 0 : index
    %c86 = arith.constant 86 : index
    %490 = memref.load %arg7[%c0_137, %c86] : memref<2x128xf32, #tpu.memory_space<smem>>
    %491 = vector.broadcast %490 : f32 to vector<8x256xf32>
    %492 = arith.mulf %491, %236 : vector<8x256xf32>
    %493 = arith.addf %489, %492 : vector<8x256xf32>
    %c0_138 = arith.constant 0 : index
    %c87 = arith.constant 87 : index
    %494 = memref.load %arg7[%c0_138, %c87] : memref<2x128xf32, #tpu.memory_space<smem>>
    %495 = vector.broadcast %494 : f32 to vector<8x256xf32>
    %496 = arith.mulf %495, %263 : vector<8x256xf32>
    %497 = arith.addf %493, %496 : vector<8x256xf32>
    %c0_139 = arith.constant 0 : index
    %c88 = arith.constant 88 : index
    %498 = memref.load %arg7[%c0_139, %c88] : memref<2x128xf32, #tpu.memory_space<smem>>
    %499 = vector.broadcast %498 : f32 to vector<8x256xf32>
    %500 = arith.mulf %499, %290 : vector<8x256xf32>
    %501 = arith.addf %497, %500 : vector<8x256xf32>
    %c0_140 = arith.constant 0 : index
    %c89 = arith.constant 89 : index
    %502 = memref.load %arg7[%c0_140, %c89] : memref<2x128xf32, #tpu.memory_space<smem>>
    %503 = vector.broadcast %502 : f32 to vector<8x256xf32>
    %504 = arith.mulf %503, %317 : vector<8x256xf32>
    %505 = arith.addf %501, %504 : vector<8x256xf32>
    %c0_141 = arith.constant 0 : index
    %c90 = arith.constant 90 : index
    %506 = memref.load %arg7[%c0_141, %c90] : memref<2x128xf32, #tpu.memory_space<smem>>
    %507 = vector.broadcast %506 : f32 to vector<8x256xf32>
    %508 = arith.mulf %507, %344 : vector<8x256xf32>
    %509 = arith.addf %505, %508 : vector<8x256xf32>
    %c0_142 = arith.constant 0 : index
    %c91 = arith.constant 91 : index
    %510 = memref.load %arg7[%c0_142, %c91] : memref<2x128xf32, #tpu.memory_space<smem>>
    %511 = vector.broadcast %510 : f32 to vector<8x256xf32>
    %512 = arith.mulf %511, %371 : vector<8x256xf32>
    %513 = arith.addf %509, %512 : vector<8x256xf32>
    %514 = vector.extract_strided_slice %131 {offsets = [0, 768], sizes = [8, 256], strides = [1, 1]} : vector<8x1024xf32> to vector<8x256xf32>
    %515 = arith.addf %514, %513 : vector<8x256xf32>
    %516 = tpu.concatenate %407, %443, %479, %515 in 1 : vector<8x256xf32>, vector<8x256xf32>, vector<8x256xf32>, vector<8x256xf32> -> vector<8x1024xf32>
    %cst_143 = arith.constant dense<0.000000e+00> : vector<8xf32>
    %517 = vector.multi_reduction <add>, %516, %cst_143 [1] : vector<8x1024xf32> to vector<8xf32>
    %518 = vector.shape_cast %517 : vector<8xf32> to vector<8x1xf32>
    %cst_144 = arith.constant 1.024000e+03 : f32
    %519 = vector.broadcast %cst_144 : f32 to vector<8x1xf32>
    %520 = arith.divf %518, %519 : vector<8x1xf32>
    %521 = vector.broadcast %520 : vector<8x1xf32> to vector<8x1024xf32>
    %522 = arith.subf %516, %521 : vector<8x1024xf32>
    %523 = arith.mulf %522, %522 : vector<8x1024xf32>
    %cst_145 = arith.constant dense<0.000000e+00> : vector<8xf32>
    %524 = vector.multi_reduction <add>, %523, %cst_145 [1] : vector<8x1024xf32> to vector<8xf32>
    %525 = vector.shape_cast %524 : vector<8xf32> to vector<8x1xf32>
    %cst_146 = arith.constant 1.024000e+03 : f32
    %526 = vector.broadcast %cst_146 : f32 to vector<8x1xf32>
    %527 = arith.divf %525, %526 : vector<8x1xf32>
    %528 = vector.broadcast %520 : vector<8x1xf32> to vector<8x1024xf32>
    %529 = arith.subf %516, %528 : vector<8x1024xf32>
    %cst_147 = arith.constant 9.99999974E-6 : f32
    %530 = vector.broadcast %cst_147 : f32 to vector<8x1xf32>
    %531 = arith.addf %527, %530 : vector<8x1xf32>
    %532 = math.rsqrt %531 : vector<8x1xf32>
    %533 = vector.broadcast %532 : vector<8x1xf32> to vector<8x1024xf32>
    %534 = arith.mulf %529, %533 : vector<8x1024xf32>
    %c1_148 = arith.constant 1 : index
    %c0_149 = arith.constant 0 : index
    %535 = vector.load %arg2[%c1_148, %c0_149] : memref<2x1024xf32, #tpu.memory_space<vmem>>, vector<1x1024xf32>
    %536 = vector.broadcast %535 : vector<1x1024xf32> to vector<8x1024xf32>
    %537 = arith.mulf %534, %536 : vector<8x1024xf32>
    %c1_150 = arith.constant 1 : index
    %c0_151 = arith.constant 0 : index
    %538 = vector.load %arg3[%c1_150, %c0_151] : memref<2x1024xf32, #tpu.memory_space<vmem>>, vector<1x1024xf32>
    %539 = vector.broadcast %538 : vector<1x1024xf32> to vector<8x1024xf32>
    %540 = arith.addf %537, %539 : vector<8x1024xf32>
    %541 = arith.truncf %540 : vector<8x1024xf32> to vector<8x1024xbf16>
    %c1_152 = arith.constant 1 : index
    %c0_153 = arith.constant 0 : index
    %c0_154 = arith.constant 0 : index
    %542 = vector.load %arg4[%c1_152, %c0_153, %c0_154] : memref<2x1024x256xbf16, #tpu.memory_space<vmem>>, vector<1x1024x256xbf16>
    %543 = vector.shape_cast %542 : vector<1x1024x256xbf16> to vector<1024x256xbf16>
    %cst_155 = arith.constant dense<0.000000e+00> : vector<8x256xf32>
    %544 = tpu.matmul %541, %543, %cst_155 {dimension_numbers = #tpu.dot_dimension_numbers<[1], [0], [0], [1], [0, 0, 1, 1], [], []>} : vector<8x1024xbf16>, vector<1024x256xbf16>, vector<8x256xf32> -> vector<8x256xf32>
    %cst_156 = arith.constant dense<0xFF800000> : vector<256xf32>
    %545 = vector.multi_reduction <maximumf>, %544, %cst_156 [0] : vector<8x256xf32> to vector<256xf32>
    %546 = vector.shape_cast %545 : vector<256xf32> to vector<1x256xf32>
    %547 = vector.broadcast %546 : vector<1x256xf32> to vector<8x256xf32>
    %548 = arith.subf %544, %547 : vector<8x256xf32>
    %549 = math.exp %548 : vector<8x256xf32>
    %cst_157 = arith.constant dense<0.000000e+00> : vector<256xf32>
    %550 = vector.multi_reduction <add>, %549, %cst_157 [0] : vector<8x256xf32> to vector<256xf32>
    %551 = vector.shape_cast %550 : vector<256xf32> to vector<1x256xf32>
    %552 = tpu.reciprocal %551 : vector<1x256xf32> -> vector<1x256xf32>
    %553 = vector.broadcast %552 : vector<1x256xf32> to vector<8x256xf32>
    %554 = arith.mulf %549, %553 : vector<8x256xf32>
    %555 = vector.extract_strided_slice %540 {offsets = [0, 0], sizes = [8, 256], strides = [1, 1]} : vector<8x1024xf32> to vector<8x256xf32>
    %556 = arith.mulf %554, %555 : vector<8x256xf32>
    %cst_158 = arith.constant dense<0.000000e+00> : vector<256xf32>
    %557 = vector.multi_reduction <add>, %556, %cst_158 [0] : vector<8x256xf32> to vector<256xf32>
    %558 = vector.shape_cast %557 : vector<256xf32> to vector<1x256xf32>
    %559 = vector.extract_strided_slice %540 {offsets = [0, 256], sizes = [8, 256], strides = [1, 1]} : vector<8x1024xf32> to vector<8x256xf32>
    %560 = arith.mulf %554, %559 : vector<8x256xf32>
    %cst_159 = arith.constant dense<0.000000e+00> : vector<256xf32>
    %561 = vector.multi_reduction <add>, %560, %cst_159 [0] : vector<8x256xf32> to vector<256xf32>
    %562 = vector.shape_cast %561 : vector<256xf32> to vector<1x256xf32>
    %563 = vector.extract_strided_slice %540 {offsets = [0, 512], sizes = [8, 256], strides = [1, 1]} : vector<8x1024xf32> to vector<8x256xf32>
    %564 = arith.mulf %554, %563 : vector<8x256xf32>
    %cst_160 = arith.constant dense<0.000000e+00> : vector<256xf32>
    %565 = vector.multi_reduction <add>, %564, %cst_160 [0] : vector<8x256xf32> to vector<256xf32>
    %566 = vector.shape_cast %565 : vector<256xf32> to vector<1x256xf32>
    %567 = vector.extract_strided_slice %540 {offsets = [0, 768], sizes = [8, 256], strides = [1, 1]} : vector<8x1024xf32> to vector<8x256xf32>
    %568 = arith.mulf %554, %567 : vector<8x256xf32>
    %cst_161 = arith.constant dense<0.000000e+00> : vector<256xf32>
    %569 = vector.multi_reduction <add>, %568, %cst_161 [0] : vector<8x256xf32> to vector<256xf32>
    %570 = vector.shape_cast %569 : vector<256xf32> to vector<1x256xf32>
    %c1_162 = arith.constant 1 : index
    %c16_163 = arith.constant 16 : index
    %571 = memref.load %arg7[%c1_162, %c16_163] : memref<2x128xf32, #tpu.memory_space<smem>>
    %c1_164 = arith.constant 1 : index
    %c0_165 = arith.constant 0 : index
    %572 = memref.load %arg7[%c1_164, %c0_165] : memref<2x128xf32, #tpu.memory_space<smem>>
    %573 = vector.broadcast %572 : f32 to vector<1x256xf32>
    %574 = arith.mulf %573, %558 : vector<1x256xf32>
    %575 = vector.broadcast %571 : f32 to vector<1x256xf32>
    %576 = arith.addf %575, %574 : vector<1x256xf32>
    %c1_166 = arith.constant 1 : index
    %c1_167 = arith.constant 1 : index
    %577 = memref.load %arg7[%c1_166, %c1_167] : memref<2x128xf32, #tpu.memory_space<smem>>
    %578 = vector.broadcast %577 : f32 to vector<1x256xf32>
    %579 = arith.mulf %578, %562 : vector<1x256xf32>
    %580 = arith.addf %576, %579 : vector<1x256xf32>
    %c1_168 = arith.constant 1 : index
    %c2_169 = arith.constant 2 : index
    %581 = memref.load %arg7[%c1_168, %c2_169] : memref<2x128xf32, #tpu.memory_space<smem>>
    %582 = vector.broadcast %581 : f32 to vector<1x256xf32>
    %583 = arith.mulf %582, %566 : vector<1x256xf32>
    %584 = arith.addf %580, %583 : vector<1x256xf32>
    %c1_170 = arith.constant 1 : index
    %c3_171 = arith.constant 3 : index
    %585 = memref.load %arg7[%c1_170, %c3_171] : memref<2x128xf32, #tpu.memory_space<smem>>
    %586 = vector.broadcast %585 : f32 to vector<1x256xf32>
    %587 = arith.mulf %586, %570 : vector<1x256xf32>
    %588 = arith.addf %584, %587 : vector<1x256xf32>
    %c1_172 = arith.constant 1 : index
    %c17_173 = arith.constant 17 : index
    %589 = memref.load %arg7[%c1_172, %c17_173] : memref<2x128xf32, #tpu.memory_space<smem>>
    %c1_174 = arith.constant 1 : index
    %c4_175 = arith.constant 4 : index
    %590 = memref.load %arg7[%c1_174, %c4_175] : memref<2x128xf32, #tpu.memory_space<smem>>
    %591 = vector.broadcast %590 : f32 to vector<1x256xf32>
    %592 = arith.mulf %591, %558 : vector<1x256xf32>
    %593 = vector.broadcast %589 : f32 to vector<1x256xf32>
    %594 = arith.addf %593, %592 : vector<1x256xf32>
    %c1_176 = arith.constant 1 : index
    %c5_177 = arith.constant 5 : index
    %595 = memref.load %arg7[%c1_176, %c5_177] : memref<2x128xf32, #tpu.memory_space<smem>>
    %596 = vector.broadcast %595 : f32 to vector<1x256xf32>
    %597 = arith.mulf %596, %562 : vector<1x256xf32>
    %598 = arith.addf %594, %597 : vector<1x256xf32>
    %c1_178 = arith.constant 1 : index
    %c6_179 = arith.constant 6 : index
    %599 = memref.load %arg7[%c1_178, %c6_179] : memref<2x128xf32, #tpu.memory_space<smem>>
    %600 = vector.broadcast %599 : f32 to vector<1x256xf32>
    %601 = arith.mulf %600, %566 : vector<1x256xf32>
    %602 = arith.addf %598, %601 : vector<1x256xf32>
    %c1_180 = arith.constant 1 : index
    %c7_181 = arith.constant 7 : index
    %603 = memref.load %arg7[%c1_180, %c7_181] : memref<2x128xf32, #tpu.memory_space<smem>>
    %604 = vector.broadcast %603 : f32 to vector<1x256xf32>
    %605 = arith.mulf %604, %570 : vector<1x256xf32>
    %606 = arith.addf %602, %605 : vector<1x256xf32>
    %c1_182 = arith.constant 1 : index
    %c18_183 = arith.constant 18 : index
    %607 = memref.load %arg7[%c1_182, %c18_183] : memref<2x128xf32, #tpu.memory_space<smem>>
    %c1_184 = arith.constant 1 : index
    %c8_185 = arith.constant 8 : index
    %608 = memref.load %arg7[%c1_184, %c8_185] : memref<2x128xf32, #tpu.memory_space<smem>>
    %609 = vector.broadcast %608 : f32 to vector<1x256xf32>
    %610 = arith.mulf %609, %558 : vector<1x256xf32>
    %611 = vector.broadcast %607 : f32 to vector<1x256xf32>
    %612 = arith.addf %611, %610 : vector<1x256xf32>
    %c1_186 = arith.constant 1 : index
    %c9_187 = arith.constant 9 : index
    %613 = memref.load %arg7[%c1_186, %c9_187] : memref<2x128xf32, #tpu.memory_space<smem>>
    %614 = vector.broadcast %613 : f32 to vector<1x256xf32>
    %615 = arith.mulf %614, %562 : vector<1x256xf32>
    %616 = arith.addf %612, %615 : vector<1x256xf32>
    %c1_188 = arith.constant 1 : index
    %c10_189 = arith.constant 10 : index
    %617 = memref.load %arg7[%c1_188, %c10_189] : memref<2x128xf32, #tpu.memory_space<smem>>
    %618 = vector.broadcast %617 : f32 to vector<1x256xf32>
    %619 = arith.mulf %618, %566 : vector<1x256xf32>
    %620 = arith.addf %616, %619 : vector<1x256xf32>
    %c1_190 = arith.constant 1 : index
    %c11_191 = arith.constant 11 : index
    %621 = memref.load %arg7[%c1_190, %c11_191] : memref<2x128xf32, #tpu.memory_space<smem>>
    %622 = vector.broadcast %621 : f32 to vector<1x256xf32>
    %623 = arith.mulf %622, %570 : vector<1x256xf32>
    %624 = arith.addf %620, %623 : vector<1x256xf32>
    %c1_192 = arith.constant 1 : index
    %c19_193 = arith.constant 19 : index
    %625 = memref.load %arg7[%c1_192, %c19_193] : memref<2x128xf32, #tpu.memory_space<smem>>
    %c1_194 = arith.constant 1 : index
    %c12_195 = arith.constant 12 : index
    %626 = memref.load %arg7[%c1_194, %c12_195] : memref<2x128xf32, #tpu.memory_space<smem>>
    %627 = vector.broadcast %626 : f32 to vector<1x256xf32>
    %628 = arith.mulf %627, %558 : vector<1x256xf32>
    %629 = vector.broadcast %625 : f32 to vector<1x256xf32>
    %630 = arith.addf %629, %628 : vector<1x256xf32>
    %c1_196 = arith.constant 1 : index
    %c13_197 = arith.constant 13 : index
    %631 = memref.load %arg7[%c1_196, %c13_197] : memref<2x128xf32, #tpu.memory_space<smem>>
    %632 = vector.broadcast %631 : f32 to vector<1x256xf32>
    %633 = arith.mulf %632, %562 : vector<1x256xf32>
    %634 = arith.addf %630, %633 : vector<1x256xf32>
    %c1_198 = arith.constant 1 : index
    %c14_199 = arith.constant 14 : index
    %635 = memref.load %arg7[%c1_198, %c14_199] : memref<2x128xf32, #tpu.memory_space<smem>>
    %636 = vector.broadcast %635 : f32 to vector<1x256xf32>
    %637 = arith.mulf %636, %566 : vector<1x256xf32>
    %638 = arith.addf %634, %637 : vector<1x256xf32>
    %c1_200 = arith.constant 1 : index
    %c15_201 = arith.constant 15 : index
    %639 = memref.load %arg7[%c1_200, %c15_201] : memref<2x128xf32, #tpu.memory_space<smem>>
    %640 = vector.broadcast %639 : f32 to vector<1x256xf32>
    %641 = arith.mulf %640, %570 : vector<1x256xf32>
    %642 = arith.addf %638, %641 : vector<1x256xf32>
    %643 = tpu.concatenate %588, %606, %624, %642 in 1 : vector<1x256xf32>, vector<1x256xf32>, vector<1x256xf32>, vector<1x256xf32> -> vector<1x1024xf32>
    %644 = vector.broadcast %643 : vector<1x1024xf32> to vector<8x1024xf32>
    %645 = arith.addf %516, %644 : vector<8x1024xf32>
    %cst_202 = arith.constant dense<0.000000e+00> : vector<8xf32>
    %646 = vector.multi_reduction <add>, %645, %cst_202 [1] : vector<8x1024xf32> to vector<8xf32>
    %647 = vector.shape_cast %646 : vector<8xf32> to vector<8x1xf32>
    %cst_203 = arith.constant 1.024000e+03 : f32
    %648 = vector.broadcast %cst_203 : f32 to vector<8x1xf32>
    %649 = arith.divf %647, %648 : vector<8x1xf32>
    %650 = vector.broadcast %649 : vector<8x1xf32> to vector<8x1024xf32>
    %651 = arith.subf %645, %650 : vector<8x1024xf32>
    %652 = arith.mulf %651, %651 : vector<8x1024xf32>
    %cst_204 = arith.constant dense<0.000000e+00> : vector<8xf32>
    %653 = vector.multi_reduction <add>, %652, %cst_204 [1] : vector<8x1024xf32> to vector<8xf32>
    %654 = vector.shape_cast %653 : vector<8xf32> to vector<8x1xf32>
    %cst_205 = arith.constant 1.024000e+03 : f32
    %655 = vector.broadcast %cst_205 : f32 to vector<8x1xf32>
    %656 = arith.divf %654, %655 : vector<8x1xf32>
    %657 = vector.broadcast %649 : vector<8x1xf32> to vector<8x1024xf32>
    %658 = arith.subf %645, %657 : vector<8x1024xf32>
    %cst_206 = arith.constant 9.99999974E-6 : f32
    %659 = vector.broadcast %cst_206 : f32 to vector<8x1xf32>
    %660 = arith.addf %656, %659 : vector<8x1xf32>
    %661 = math.rsqrt %660 : vector<8x1xf32>
    %662 = vector.broadcast %661 : vector<8x1xf32> to vector<8x1024xf32>
    %663 = arith.mulf %658, %662 : vector<8x1024xf32>
    %c1_207 = arith.constant 1 : index
    %c0_208 = arith.constant 0 : index
    %664 = vector.load %arg5[%c1_207, %c0_208] : memref<2x1024xf32, #tpu.memory_space<vmem>>, vector<1x1024xf32>
    %665 = vector.broadcast %664 : vector<1x1024xf32> to vector<8x1024xf32>
    %666 = arith.mulf %663, %665 : vector<8x1024xf32>
    %c1_209 = arith.constant 1 : index
    %c0_210 = arith.constant 0 : index
    %667 = vector.load %arg6[%c1_209, %c0_210] : memref<2x1024xf32, #tpu.memory_space<vmem>>, vector<1x1024xf32>
    %668 = vector.broadcast %667 : vector<1x1024xf32> to vector<8x1024xf32>
    %669 = arith.addf %666, %668 : vector<8x1024xf32>
    %c1_211 = arith.constant 1 : index
    %c52_212 = arith.constant 52 : index
    %670 = memref.load %arg7[%c1_211, %c52_212] : memref<2x128xf32, #tpu.memory_space<smem>>
    %c1_213 = arith.constant 1 : index
    %c20_214 = arith.constant 20 : index
    %671 = memref.load %arg7[%c1_213, %c20_214] : memref<2x128xf32, #tpu.memory_space<smem>>
    %672 = vector.extract_strided_slice %669 {offsets = [0, 0], sizes = [8, 256], strides = [1, 1]} : vector<8x1024xf32> to vector<8x256xf32>
    %673 = vector.broadcast %671 : f32 to vector<8x256xf32>
    %674 = arith.mulf %673, %672 : vector<8x256xf32>
    %675 = vector.broadcast %670 : f32 to vector<8x256xf32>
    %676 = arith.addf %675, %674 : vector<8x256xf32>
    %c1_215 = arith.constant 1 : index
    %c21_216 = arith.constant 21 : index
    %677 = memref.load %arg7[%c1_215, %c21_216] : memref<2x128xf32, #tpu.memory_space<smem>>
    %678 = vector.extract_strided_slice %669 {offsets = [0, 256], sizes = [8, 256], strides = [1, 1]} : vector<8x1024xf32> to vector<8x256xf32>
    %679 = vector.broadcast %677 : f32 to vector<8x256xf32>
    %680 = arith.mulf %679, %678 : vector<8x256xf32>
    %681 = arith.addf %676, %680 : vector<8x256xf32>
    %c1_217 = arith.constant 1 : index
    %c22_218 = arith.constant 22 : index
    %682 = memref.load %arg7[%c1_217, %c22_218] : memref<2x128xf32, #tpu.memory_space<smem>>
    %683 = vector.extract_strided_slice %669 {offsets = [0, 512], sizes = [8, 256], strides = [1, 1]} : vector<8x1024xf32> to vector<8x256xf32>
    %684 = vector.broadcast %682 : f32 to vector<8x256xf32>
    %685 = arith.mulf %684, %683 : vector<8x256xf32>
    %686 = arith.addf %681, %685 : vector<8x256xf32>
    %c1_219 = arith.constant 1 : index
    %c23_220 = arith.constant 23 : index
    %687 = memref.load %arg7[%c1_219, %c23_220] : memref<2x128xf32, #tpu.memory_space<smem>>
    %688 = vector.extract_strided_slice %669 {offsets = [0, 768], sizes = [8, 256], strides = [1, 1]} : vector<8x1024xf32> to vector<8x256xf32>
    %689 = vector.broadcast %687 : f32 to vector<8x256xf32>
    %690 = arith.mulf %689, %688 : vector<8x256xf32>
    %691 = arith.addf %686, %690 : vector<8x256xf32>
    %cst_221 = arith.constant 0.000000e+00 : f32
    %692 = vector.broadcast %cst_221 : f32 to vector<8x256xf32>
    %693 = arith.cmpf oge, %691, %692 : vector<8x256xf32>
    %cst_222 = arith.constant 0.00999999977 : f32
    %694 = vector.broadcast %cst_222 : f32 to vector<8x256xf32>
    %695 = arith.mulf %694, %691 : vector<8x256xf32>
    %696 = arith.select %693, %691, %695 : vector<8x256xi1>, vector<8x256xf32>
    %c1_223 = arith.constant 1 : index
    %c53_224 = arith.constant 53 : index
    %697 = memref.load %arg7[%c1_223, %c53_224] : memref<2x128xf32, #tpu.memory_space<smem>>
    %c1_225 = arith.constant 1 : index
    %c24_226 = arith.constant 24 : index
    %698 = memref.load %arg7[%c1_225, %c24_226] : memref<2x128xf32, #tpu.memory_space<smem>>
    %699 = vector.extract_strided_slice %669 {offsets = [0, 0], sizes = [8, 256], strides = [1, 1]} : vector<8x1024xf32> to vector<8x256xf32>
    %700 = vector.broadcast %698 : f32 to vector<8x256xf32>
    %701 = arith.mulf %700, %699 : vector<8x256xf32>
    %702 = vector.broadcast %697 : f32 to vector<8x256xf32>
    %703 = arith.addf %702, %701 : vector<8x256xf32>
    %c1_227 = arith.constant 1 : index
    %c25_228 = arith.constant 25 : index
    %704 = memref.load %arg7[%c1_227, %c25_228] : memref<2x128xf32, #tpu.memory_space<smem>>
    %705 = vector.extract_strided_slice %669 {offsets = [0, 256], sizes = [8, 256], strides = [1, 1]} : vector<8x1024xf32> to vector<8x256xf32>
    %706 = vector.broadcast %704 : f32 to vector<8x256xf32>
    %707 = arith.mulf %706, %705 : vector<8x256xf32>
    %708 = arith.addf %703, %707 : vector<8x256xf32>
    %c1_229 = arith.constant 1 : index
    %c26_230 = arith.constant 26 : index
    %709 = memref.load %arg7[%c1_229, %c26_230] : memref<2x128xf32, #tpu.memory_space<smem>>
    %710 = vector.extract_strided_slice %669 {offsets = [0, 512], sizes = [8, 256], strides = [1, 1]} : vector<8x1024xf32> to vector<8x256xf32>
    %711 = vector.broadcast %709 : f32 to vector<8x256xf32>
    %712 = arith.mulf %711, %710 : vector<8x256xf32>
    %713 = arith.addf %708, %712 : vector<8x256xf32>
    %c1_231 = arith.constant 1 : index
    %c27_232 = arith.constant 27 : index
    %714 = memref.load %arg7[%c1_231, %c27_232] : memref<2x128xf32, #tpu.memory_space<smem>>
    %715 = vector.extract_strided_slice %669 {offsets = [0, 768], sizes = [8, 256], strides = [1, 1]} : vector<8x1024xf32> to vector<8x256xf32>
    %716 = vector.broadcast %714 : f32 to vector<8x256xf32>
    %717 = arith.mulf %716, %715 : vector<8x256xf32>
    %718 = arith.addf %713, %717 : vector<8x256xf32>
    %cst_233 = arith.constant 0.000000e+00 : f32
    %719 = vector.broadcast %cst_233 : f32 to vector<8x256xf32>
    %720 = arith.cmpf oge, %718, %719 : vector<8x256xf32>
    %cst_234 = arith.constant 0.00999999977 : f32
    %721 = vector.broadcast %cst_234 : f32 to vector<8x256xf32>
    %722 = arith.mulf %721, %718 : vector<8x256xf32>
    %723 = arith.select %720, %718, %722 : vector<8x256xi1>, vector<8x256xf32>
    %c1_235 = arith.constant 1 : index
    %c54_236 = arith.constant 54 : index
    %724 = memref.load %arg7[%c1_235, %c54_236] : memref<2x128xf32, #tpu.memory_space<smem>>
    %c1_237 = arith.constant 1 : index
    %c28_238 = arith.constant 28 : index
    %725 = memref.load %arg7[%c1_237, %c28_238] : memref<2x128xf32, #tpu.memory_space<smem>>
    %726 = vector.extract_strided_slice %669 {offsets = [0, 0], sizes = [8, 256], strides = [1, 1]} : vector<8x1024xf32> to vector<8x256xf32>
    %727 = vector.broadcast %725 : f32 to vector<8x256xf32>
    %728 = arith.mulf %727, %726 : vector<8x256xf32>
    %729 = vector.broadcast %724 : f32 to vector<8x256xf32>
    %730 = arith.addf %729, %728 : vector<8x256xf32>
    %c1_239 = arith.constant 1 : index
    %c29_240 = arith.constant 29 : index
    %731 = memref.load %arg7[%c1_239, %c29_240] : memref<2x128xf32, #tpu.memory_space<smem>>
    %732 = vector.extract_strided_slice %669 {offsets = [0, 256], sizes = [8, 256], strides = [1, 1]} : vector<8x1024xf32> to vector<8x256xf32>
    %733 = vector.broadcast %731 : f32 to vector<8x256xf32>
    %734 = arith.mulf %733, %732 : vector<8x256xf32>
    %735 = arith.addf %730, %734 : vector<8x256xf32>
    %c1_241 = arith.constant 1 : index
    %c30_242 = arith.constant 30 : index
    %736 = memref.load %arg7[%c1_241, %c30_242] : memref<2x128xf32, #tpu.memory_space<smem>>
    %737 = vector.extract_strided_slice %669 {offsets = [0, 512], sizes = [8, 256], strides = [1, 1]} : vector<8x1024xf32> to vector<8x256xf32>
    %738 = vector.broadcast %736 : f32 to vector<8x256xf32>
    %739 = arith.mulf %738, %737 : vector<8x256xf32>
    %740 = arith.addf %735, %739 : vector<8x256xf32>
    %c1_243 = arith.constant 1 : index
    %c31_244 = arith.constant 31 : index
    %741 = memref.load %arg7[%c1_243, %c31_244] : memref<2x128xf32, #tpu.memory_space<smem>>
    %742 = vector.extract_strided_slice %669 {offsets = [0, 768], sizes = [8, 256], strides = [1, 1]} : vector<8x1024xf32> to vector<8x256xf32>
    %743 = vector.broadcast %741 : f32 to vector<8x256xf32>
    %744 = arith.mulf %743, %742 : vector<8x256xf32>
    %745 = arith.addf %740, %744 : vector<8x256xf32>
    %cst_245 = arith.constant 0.000000e+00 : f32
    %746 = vector.broadcast %cst_245 : f32 to vector<8x256xf32>
    %747 = arith.cmpf oge, %745, %746 : vector<8x256xf32>
    %cst_246 = arith.constant 0.00999999977 : f32
    %748 = vector.broadcast %cst_246 : f32 to vector<8x256xf32>
    %749 = arith.mulf %748, %745 : vector<8x256xf32>
    %750 = arith.select %747, %745, %749 : vector<8x256xi1>, vector<8x256xf32>
    %c1_247 = arith.constant 1 : index
    %c55_248 = arith.constant 55 : index
    %751 = memref.load %arg7[%c1_247, %c55_248] : memref<2x128xf32, #tpu.memory_space<smem>>
    %c1_249 = arith.constant 1 : index
    %c32_250 = arith.constant 32 : index
    %752 = memref.load %arg7[%c1_249, %c32_250] : memref<2x128xf32, #tpu.memory_space<smem>>
    %753 = vector.extract_strided_slice %669 {offsets = [0, 0], sizes = [8, 256], strides = [1, 1]} : vector<8x1024xf32> to vector<8x256xf32>
    %754 = vector.broadcast %752 : f32 to vector<8x256xf32>
    %755 = arith.mulf %754, %753 : vector<8x256xf32>
    %756 = vector.broadcast %751 : f32 to vector<8x256xf32>
    %757 = arith.addf %756, %755 : vector<8x256xf32>
    %c1_251 = arith.constant 1 : index
    %c33_252 = arith.constant 33 : index
    %758 = memref.load %arg7[%c1_251, %c33_252] : memref<2x128xf32, #tpu.memory_space<smem>>
    %759 = vector.extract_strided_slice %669 {offsets = [0, 256], sizes = [8, 256], strides = [1, 1]} : vector<8x1024xf32> to vector<8x256xf32>
    %760 = vector.broadcast %758 : f32 to vector<8x256xf32>
    %761 = arith.mulf %760, %759 : vector<8x256xf32>
    %762 = arith.addf %757, %761 : vector<8x256xf32>
    %c1_253 = arith.constant 1 : index
    %c34_254 = arith.constant 34 : index
    %763 = memref.load %arg7[%c1_253, %c34_254] : memref<2x128xf32, #tpu.memory_space<smem>>
    %764 = vector.extract_strided_slice %669 {offsets = [0, 512], sizes = [8, 256], strides = [1, 1]} : vector<8x1024xf32> to vector<8x256xf32>
    %765 = vector.broadcast %763 : f32 to vector<8x256xf32>
    %766 = arith.mulf %765, %764 : vector<8x256xf32>
    %767 = arith.addf %762, %766 : vector<8x256xf32>
    %c1_255 = arith.constant 1 : index
    %c35_256 = arith.constant 35 : index
    %768 = memref.load %arg7[%c1_255, %c35_256] : memref<2x128xf32, #tpu.memory_space<smem>>
    %769 = vector.extract_strided_slice %669 {offsets = [0, 768], sizes = [8, 256], strides = [1, 1]} : vector<8x1024xf32> to vector<8x256xf32>
    %770 = vector.broadcast %768 : f32 to vector<8x256xf32>
    %771 = arith.mulf %770, %769 : vector<8x256xf32>
    %772 = arith.addf %767, %771 : vector<8x256xf32>
    %cst_257 = arith.constant 0.000000e+00 : f32
    %773 = vector.broadcast %cst_257 : f32 to vector<8x256xf32>
    %774 = arith.cmpf oge, %772, %773 : vector<8x256xf32>
    %cst_258 = arith.constant 0.00999999977 : f32
    %775 = vector.broadcast %cst_258 : f32 to vector<8x256xf32>
    %776 = arith.mulf %775, %772 : vector<8x256xf32>
    %777 = arith.select %774, %772, %776 : vector<8x256xi1>, vector<8x256xf32>
    %c1_259 = arith.constant 1 : index
    %c56_260 = arith.constant 56 : index
    %778 = memref.load %arg7[%c1_259, %c56_260] : memref<2x128xf32, #tpu.memory_space<smem>>
    %c1_261 = arith.constant 1 : index
    %c36_262 = arith.constant 36 : index
    %779 = memref.load %arg7[%c1_261, %c36_262] : memref<2x128xf32, #tpu.memory_space<smem>>
    %780 = vector.extract_strided_slice %669 {offsets = [0, 0], sizes = [8, 256], strides = [1, 1]} : vector<8x1024xf32> to vector<8x256xf32>
    %781 = vector.broadcast %779 : f32 to vector<8x256xf32>
    %782 = arith.mulf %781, %780 : vector<8x256xf32>
    %783 = vector.broadcast %778 : f32 to vector<8x256xf32>
    %784 = arith.addf %783, %782 : vector<8x256xf32>
    %c1_263 = arith.constant 1 : index
    %c37_264 = arith.constant 37 : index
    %785 = memref.load %arg7[%c1_263, %c37_264] : memref<2x128xf32, #tpu.memory_space<smem>>
    %786 = vector.extract_strided_slice %669 {offsets = [0, 256], sizes = [8, 256], strides = [1, 1]} : vector<8x1024xf32> to vector<8x256xf32>
    %787 = vector.broadcast %785 : f32 to vector<8x256xf32>
    %788 = arith.mulf %787, %786 : vector<8x256xf32>
    %789 = arith.addf %784, %788 : vector<8x256xf32>
    %c1_265 = arith.constant 1 : index
    %c38_266 = arith.constant 38 : index
    %790 = memref.load %arg7[%c1_265, %c38_266] : memref<2x128xf32, #tpu.memory_space<smem>>
    %791 = vector.extract_strided_slice %669 {offsets = [0, 512], sizes = [8, 256], strides = [1, 1]} : vector<8x1024xf32> to vector<8x256xf32>
    %792 = vector.broadcast %790 : f32 to vector<8x256xf32>
    %793 = arith.mulf %792, %791 : vector<8x256xf32>
    %794 = arith.addf %789, %793 : vector<8x256xf32>
    %c1_267 = arith.constant 1 : index
    %c39_268 = arith.constant 39 : index
    %795 = memref.load %arg7[%c1_267, %c39_268] : memref<2x128xf32, #tpu.memory_space<smem>>
    %796 = vector.extract_strided_slice %669 {offsets = [0, 768], sizes = [8, 256], strides = [1, 1]} : vector<8x1024xf32> to vector<8x256xf32>
    %797 = vector.broadcast %795 : f32 to vector<8x256xf32>
    %798 = arith.mulf %797, %796 : vector<8x256xf32>
    %799 = arith.addf %794, %798 : vector<8x256xf32>
    %cst_269 = arith.constant 0.000000e+00 : f32
    %800 = vector.broadcast %cst_269 : f32 to vector<8x256xf32>
    %801 = arith.cmpf oge, %799, %800 : vector<8x256xf32>
    %cst_270 = arith.constant 0.00999999977 : f32
    %802 = vector.broadcast %cst_270 : f32 to vector<8x256xf32>
    %803 = arith.mulf %802, %799 : vector<8x256xf32>
    %804 = arith.select %801, %799, %803 : vector<8x256xi1>, vector<8x256xf32>
    %c1_271 = arith.constant 1 : index
    %c57_272 = arith.constant 57 : index
    %805 = memref.load %arg7[%c1_271, %c57_272] : memref<2x128xf32, #tpu.memory_space<smem>>
    %c1_273 = arith.constant 1 : index
    %c40_274 = arith.constant 40 : index
    %806 = memref.load %arg7[%c1_273, %c40_274] : memref<2x128xf32, #tpu.memory_space<smem>>
    %807 = vector.extract_strided_slice %669 {offsets = [0, 0], sizes = [8, 256], strides = [1, 1]} : vector<8x1024xf32> to vector<8x256xf32>
    %808 = vector.broadcast %806 : f32 to vector<8x256xf32>
    %809 = arith.mulf %808, %807 : vector<8x256xf32>
    %810 = vector.broadcast %805 : f32 to vector<8x256xf32>
    %811 = arith.addf %810, %809 : vector<8x256xf32>
    %c1_275 = arith.constant 1 : index
    %c41_276 = arith.constant 41 : index
    %812 = memref.load %arg7[%c1_275, %c41_276] : memref<2x128xf32, #tpu.memory_space<smem>>
    %813 = vector.extract_strided_slice %669 {offsets = [0, 256], sizes = [8, 256], strides = [1, 1]} : vector<8x1024xf32> to vector<8x256xf32>
    %814 = vector.broadcast %812 : f32 to vector<8x256xf32>
    %815 = arith.mulf %814, %813 : vector<8x256xf32>
    %816 = arith.addf %811, %815 : vector<8x256xf32>
    %c1_277 = arith.constant 1 : index
    %c42_278 = arith.constant 42 : index
    %817 = memref.load %arg7[%c1_277, %c42_278] : memref<2x128xf32, #tpu.memory_space<smem>>
    %818 = vector.extract_strided_slice %669 {offsets = [0, 512], sizes = [8, 256], strides = [1, 1]} : vector<8x1024xf32> to vector<8x256xf32>
    %819 = vector.broadcast %817 : f32 to vector<8x256xf32>
    %820 = arith.mulf %819, %818 : vector<8x256xf32>
    %821 = arith.addf %816, %820 : vector<8x256xf32>
    %c1_279 = arith.constant 1 : index
    %c43_280 = arith.constant 43 : index
    %822 = memref.load %arg7[%c1_279, %c43_280] : memref<2x128xf32, #tpu.memory_space<smem>>
    %823 = vector.extract_strided_slice %669 {offsets = [0, 768], sizes = [8, 256], strides = [1, 1]} : vector<8x1024xf32> to vector<8x256xf32>
    %824 = vector.broadcast %822 : f32 to vector<8x256xf32>
    %825 = arith.mulf %824, %823 : vector<8x256xf32>
    %826 = arith.addf %821, %825 : vector<8x256xf32>
    %cst_281 = arith.constant 0.000000e+00 : f32
    %827 = vector.broadcast %cst_281 : f32 to vector<8x256xf32>
    %828 = arith.cmpf oge, %826, %827 : vector<8x256xf32>
    %cst_282 = arith.constant 0.00999999977 : f32
    %829 = vector.broadcast %cst_282 : f32 to vector<8x256xf32>
    %830 = arith.mulf %829, %826 : vector<8x256xf32>
    %831 = arith.select %828, %826, %830 : vector<8x256xi1>, vector<8x256xf32>
    %c1_283 = arith.constant 1 : index
    %c58_284 = arith.constant 58 : index
    %832 = memref.load %arg7[%c1_283, %c58_284] : memref<2x128xf32, #tpu.memory_space<smem>>
    %c1_285 = arith.constant 1 : index
    %c44_286 = arith.constant 44 : index
    %833 = memref.load %arg7[%c1_285, %c44_286] : memref<2x128xf32, #tpu.memory_space<smem>>
    %834 = vector.extract_strided_slice %669 {offsets = [0, 0], sizes = [8, 256], strides = [1, 1]} : vector<8x1024xf32> to vector<8x256xf32>
    %835 = vector.broadcast %833 : f32 to vector<8x256xf32>
    %836 = arith.mulf %835, %834 : vector<8x256xf32>
    %837 = vector.broadcast %832 : f32 to vector<8x256xf32>
    %838 = arith.addf %837, %836 : vector<8x256xf32>
    %c1_287 = arith.constant 1 : index
    %c45_288 = arith.constant 45 : index
    %839 = memref.load %arg7[%c1_287, %c45_288] : memref<2x128xf32, #tpu.memory_space<smem>>
    %840 = vector.extract_strided_slice %669 {offsets = [0, 256], sizes = [8, 256], strides = [1, 1]} : vector<8x1024xf32> to vector<8x256xf32>
    %841 = vector.broadcast %839 : f32 to vector<8x256xf32>
    %842 = arith.mulf %841, %840 : vector<8x256xf32>
    %843 = arith.addf %838, %842 : vector<8x256xf32>
    %c1_289 = arith.constant 1 : index
    %c46_290 = arith.constant 46 : index
    %844 = memref.load %arg7[%c1_289, %c46_290] : memref<2x128xf32, #tpu.memory_space<smem>>
    %845 = vector.extract_strided_slice %669 {offsets = [0, 512], sizes = [8, 256], strides = [1, 1]} : vector<8x1024xf32> to vector<8x256xf32>
    %846 = vector.broadcast %844 : f32 to vector<8x256xf32>
    %847 = arith.mulf %846, %845 : vector<8x256xf32>
    %848 = arith.addf %843, %847 : vector<8x256xf32>
    %c1_291 = arith.constant 1 : index
    %c47_292 = arith.constant 47 : index
    %849 = memref.load %arg7[%c1_291, %c47_292] : memref<2x128xf32, #tpu.memory_space<smem>>
    %850 = vector.extract_strided_slice %669 {offsets = [0, 768], sizes = [8, 256], strides = [1, 1]} : vector<8x1024xf32> to vector<8x256xf32>
    %851 = vector.broadcast %849 : f32 to vector<8x256xf32>
    %852 = arith.mulf %851, %850 : vector<8x256xf32>
    %853 = arith.addf %848, %852 : vector<8x256xf32>
    %cst_293 = arith.constant 0.000000e+00 : f32
    %854 = vector.broadcast %cst_293 : f32 to vector<8x256xf32>
    %855 = arith.cmpf oge, %853, %854 : vector<8x256xf32>
    %cst_294 = arith.constant 0.00999999977 : f32
    %856 = vector.broadcast %cst_294 : f32 to vector<8x256xf32>
    %857 = arith.mulf %856, %853 : vector<8x256xf32>
    %858 = arith.select %855, %853, %857 : vector<8x256xi1>, vector<8x256xf32>
    %c1_295 = arith.constant 1 : index
    %c59_296 = arith.constant 59 : index
    %859 = memref.load %arg7[%c1_295, %c59_296] : memref<2x128xf32, #tpu.memory_space<smem>>
    %c1_297 = arith.constant 1 : index
    %c48_298 = arith.constant 48 : index
    %860 = memref.load %arg7[%c1_297, %c48_298] : memref<2x128xf32, #tpu.memory_space<smem>>
    %861 = vector.extract_strided_slice %669 {offsets = [0, 0], sizes = [8, 256], strides = [1, 1]} : vector<8x1024xf32> to vector<8x256xf32>
    %862 = vector.broadcast %860 : f32 to vector<8x256xf32>
    %863 = arith.mulf %862, %861 : vector<8x256xf32>
    %864 = vector.broadcast %859 : f32 to vector<8x256xf32>
    %865 = arith.addf %864, %863 : vector<8x256xf32>
    %c1_299 = arith.constant 1 : index
    %c49_300 = arith.constant 49 : index
    %866 = memref.load %arg7[%c1_299, %c49_300] : memref<2x128xf32, #tpu.memory_space<smem>>
    %867 = vector.extract_strided_slice %669 {offsets = [0, 256], sizes = [8, 256], strides = [1, 1]} : vector<8x1024xf32> to vector<8x256xf32>
    %868 = vector.broadcast %866 : f32 to vector<8x256xf32>
    %869 = arith.mulf %868, %867 : vector<8x256xf32>
    %870 = arith.addf %865, %869 : vector<8x256xf32>
    %c1_301 = arith.constant 1 : index
    %c50_302 = arith.constant 50 : index
    %871 = memref.load %arg7[%c1_301, %c50_302] : memref<2x128xf32, #tpu.memory_space<smem>>
    %872 = vector.extract_strided_slice %669 {offsets = [0, 512], sizes = [8, 256], strides = [1, 1]} : vector<8x1024xf32> to vector<8x256xf32>
    %873 = vector.broadcast %871 : f32 to vector<8x256xf32>
    %874 = arith.mulf %873, %872 : vector<8x256xf32>
    %875 = arith.addf %870, %874 : vector<8x256xf32>
    %c1_303 = arith.constant 1 : index
    %c51_304 = arith.constant 51 : index
    %876 = memref.load %arg7[%c1_303, %c51_304] : memref<2x128xf32, #tpu.memory_space<smem>>
    %877 = vector.extract_strided_slice %669 {offsets = [0, 768], sizes = [8, 256], strides = [1, 1]} : vector<8x1024xf32> to vector<8x256xf32>
    %878 = vector.broadcast %876 : f32 to vector<8x256xf32>
    %879 = arith.mulf %878, %877 : vector<8x256xf32>
    %880 = arith.addf %875, %879 : vector<8x256xf32>
    %cst_305 = arith.constant 0.000000e+00 : f32
    %881 = vector.broadcast %cst_305 : f32 to vector<8x256xf32>
    %882 = arith.cmpf oge, %880, %881 : vector<8x256xf32>
    %cst_306 = arith.constant 0.00999999977 : f32
    %883 = vector.broadcast %cst_306 : f32 to vector<8x256xf32>
    %884 = arith.mulf %883, %880 : vector<8x256xf32>
    %885 = arith.select %882, %880, %884 : vector<8x256xi1>, vector<8x256xf32>
    %c1_307 = arith.constant 1 : index
    %c92_308 = arith.constant 92 : index
    %886 = memref.load %arg7[%c1_307, %c92_308] : memref<2x128xf32, #tpu.memory_space<smem>>
    %c1_309 = arith.constant 1 : index
    %c60_310 = arith.constant 60 : index
    %887 = memref.load %arg7[%c1_309, %c60_310] : memref<2x128xf32, #tpu.memory_space<smem>>
    %888 = vector.broadcast %887 : f32 to vector<8x256xf32>
    %889 = arith.mulf %888, %696 : vector<8x256xf32>
    %890 = vector.broadcast %886 : f32 to vector<8x256xf32>
    %891 = arith.addf %890, %889 : vector<8x256xf32>
    %c1_311 = arith.constant 1 : index
    %c61_312 = arith.constant 61 : index
    %892 = memref.load %arg7[%c1_311, %c61_312] : memref<2x128xf32, #tpu.memory_space<smem>>
    %893 = vector.broadcast %892 : f32 to vector<8x256xf32>
    %894 = arith.mulf %893, %723 : vector<8x256xf32>
    %895 = arith.addf %891, %894 : vector<8x256xf32>
    %c1_313 = arith.constant 1 : index
    %c62_314 = arith.constant 62 : index
    %896 = memref.load %arg7[%c1_313, %c62_314] : memref<2x128xf32, #tpu.memory_space<smem>>
    %897 = vector.broadcast %896 : f32 to vector<8x256xf32>
    %898 = arith.mulf %897, %750 : vector<8x256xf32>
    %899 = arith.addf %895, %898 : vector<8x256xf32>
    %c1_315 = arith.constant 1 : index
    %c63_316 = arith.constant 63 : index
    %900 = memref.load %arg7[%c1_315, %c63_316] : memref<2x128xf32, #tpu.memory_space<smem>>
    %901 = vector.broadcast %900 : f32 to vector<8x256xf32>
    %902 = arith.mulf %901, %777 : vector<8x256xf32>
    %903 = arith.addf %899, %902 : vector<8x256xf32>
    %c1_317 = arith.constant 1 : index
    %c64_318 = arith.constant 64 : index
    %904 = memref.load %arg7[%c1_317, %c64_318] : memref<2x128xf32, #tpu.memory_space<smem>>
    %905 = vector.broadcast %904 : f32 to vector<8x256xf32>
    %906 = arith.mulf %905, %804 : vector<8x256xf32>
    %907 = arith.addf %903, %906 : vector<8x256xf32>
    %c1_319 = arith.constant 1 : index
    %c65_320 = arith.constant 65 : index
    %908 = memref.load %arg7[%c1_319, %c65_320] : memref<2x128xf32, #tpu.memory_space<smem>>
    %909 = vector.broadcast %908 : f32 to vector<8x256xf32>
    %910 = arith.mulf %909, %831 : vector<8x256xf32>
    %911 = arith.addf %907, %910 : vector<8x256xf32>
    %c1_321 = arith.constant 1 : index
    %c66_322 = arith.constant 66 : index
    %912 = memref.load %arg7[%c1_321, %c66_322] : memref<2x128xf32, #tpu.memory_space<smem>>
    %913 = vector.broadcast %912 : f32 to vector<8x256xf32>
    %914 = arith.mulf %913, %858 : vector<8x256xf32>
    %915 = arith.addf %911, %914 : vector<8x256xf32>
    %c1_323 = arith.constant 1 : index
    %c67_324 = arith.constant 67 : index
    %916 = memref.load %arg7[%c1_323, %c67_324] : memref<2x128xf32, #tpu.memory_space<smem>>
    %917 = vector.broadcast %916 : f32 to vector<8x256xf32>
    %918 = arith.mulf %917, %885 : vector<8x256xf32>
    %919 = arith.addf %915, %918 : vector<8x256xf32>
    %920 = vector.extract_strided_slice %645 {offsets = [0, 0], sizes = [8, 256], strides = [1, 1]} : vector<8x1024xf32> to vector<8x256xf32>
    %921 = arith.addf %920, %919 : vector<8x256xf32>
    %c1_325 = arith.constant 1 : index
    %c93_326 = arith.constant 93 : index
    %922 = memref.load %arg7[%c1_325, %c93_326] : memref<2x128xf32, #tpu.memory_space<smem>>
    %c1_327 = arith.constant 1 : index
    %c68_328 = arith.constant 68 : index
    %923 = memref.load %arg7[%c1_327, %c68_328] : memref<2x128xf32, #tpu.memory_space<smem>>
    %924 = vector.broadcast %923 : f32 to vector<8x256xf32>
    %925 = arith.mulf %924, %696 : vector<8x256xf32>
    %926 = vector.broadcast %922 : f32 to vector<8x256xf32>
    %927 = arith.addf %926, %925 : vector<8x256xf32>
    %c1_329 = arith.constant 1 : index
    %c69_330 = arith.constant 69 : index
    %928 = memref.load %arg7[%c1_329, %c69_330] : memref<2x128xf32, #tpu.memory_space<smem>>
    %929 = vector.broadcast %928 : f32 to vector<8x256xf32>
    %930 = arith.mulf %929, %723 : vector<8x256xf32>
    %931 = arith.addf %927, %930 : vector<8x256xf32>
    %c1_331 = arith.constant 1 : index
    %c70_332 = arith.constant 70 : index
    %932 = memref.load %arg7[%c1_331, %c70_332] : memref<2x128xf32, #tpu.memory_space<smem>>
    %933 = vector.broadcast %932 : f32 to vector<8x256xf32>
    %934 = arith.mulf %933, %750 : vector<8x256xf32>
    %935 = arith.addf %931, %934 : vector<8x256xf32>
    %c1_333 = arith.constant 1 : index
    %c71_334 = arith.constant 71 : index
    %936 = memref.load %arg7[%c1_333, %c71_334] : memref<2x128xf32, #tpu.memory_space<smem>>
    %937 = vector.broadcast %936 : f32 to vector<8x256xf32>
    %938 = arith.mulf %937, %777 : vector<8x256xf32>
    %939 = arith.addf %935, %938 : vector<8x256xf32>
    %c1_335 = arith.constant 1 : index
    %c72_336 = arith.constant 72 : index
    %940 = memref.load %arg7[%c1_335, %c72_336] : memref<2x128xf32, #tpu.memory_space<smem>>
    %941 = vector.broadcast %940 : f32 to vector<8x256xf32>
    %942 = arith.mulf %941, %804 : vector<8x256xf32>
    %943 = arith.addf %939, %942 : vector<8x256xf32>
    %c1_337 = arith.constant 1 : index
    %c73_338 = arith.constant 73 : index
    %944 = memref.load %arg7[%c1_337, %c73_338] : memref<2x128xf32, #tpu.memory_space<smem>>
    %945 = vector.broadcast %944 : f32 to vector<8x256xf32>
    %946 = arith.mulf %945, %831 : vector<8x256xf32>
    %947 = arith.addf %943, %946 : vector<8x256xf32>
    %c1_339 = arith.constant 1 : index
    %c74_340 = arith.constant 74 : index
    %948 = memref.load %arg7[%c1_339, %c74_340] : memref<2x128xf32, #tpu.memory_space<smem>>
    %949 = vector.broadcast %948 : f32 to vector<8x256xf32>
    %950 = arith.mulf %949, %858 : vector<8x256xf32>
    %951 = arith.addf %947, %950 : vector<8x256xf32>
    %c1_341 = arith.constant 1 : index
    %c75_342 = arith.constant 75 : index
    %952 = memref.load %arg7[%c1_341, %c75_342] : memref<2x128xf32, #tpu.memory_space<smem>>
    %953 = vector.broadcast %952 : f32 to vector<8x256xf32>
    %954 = arith.mulf %953, %885 : vector<8x256xf32>
    %955 = arith.addf %951, %954 : vector<8x256xf32>
    %956 = vector.extract_strided_slice %645 {offsets = [0, 256], sizes = [8, 256], strides = [1, 1]} : vector<8x1024xf32> to vector<8x256xf32>
    %957 = arith.addf %956, %955 : vector<8x256xf32>
    %c1_343 = arith.constant 1 : index
    %c94_344 = arith.constant 94 : index
    %958 = memref.load %arg7[%c1_343, %c94_344] : memref<2x128xf32, #tpu.memory_space<smem>>
    %c1_345 = arith.constant 1 : index
    %c76_346 = arith.constant 76 : index
    %959 = memref.load %arg7[%c1_345, %c76_346] : memref<2x128xf32, #tpu.memory_space<smem>>
    %960 = vector.broadcast %959 : f32 to vector<8x256xf32>
    %961 = arith.mulf %960, %696 : vector<8x256xf32>
    %962 = vector.broadcast %958 : f32 to vector<8x256xf32>
    %963 = arith.addf %962, %961 : vector<8x256xf32>
    %c1_347 = arith.constant 1 : index
    %c77_348 = arith.constant 77 : index
    %964 = memref.load %arg7[%c1_347, %c77_348] : memref<2x128xf32, #tpu.memory_space<smem>>
    %965 = vector.broadcast %964 : f32 to vector<8x256xf32>
    %966 = arith.mulf %965, %723 : vector<8x256xf32>
    %967 = arith.addf %963, %966 : vector<8x256xf32>
    %c1_349 = arith.constant 1 : index
    %c78_350 = arith.constant 78 : index
    %968 = memref.load %arg7[%c1_349, %c78_350] : memref<2x128xf32, #tpu.memory_space<smem>>
    %969 = vector.broadcast %968 : f32 to vector<8x256xf32>
    %970 = arith.mulf %969, %750 : vector<8x256xf32>
    %971 = arith.addf %967, %970 : vector<8x256xf32>
    %c1_351 = arith.constant 1 : index
    %c79_352 = arith.constant 79 : index
    %972 = memref.load %arg7[%c1_351, %c79_352] : memref<2x128xf32, #tpu.memory_space<smem>>
    %973 = vector.broadcast %972 : f32 to vector<8x256xf32>
    %974 = arith.mulf %973, %777 : vector<8x256xf32>
    %975 = arith.addf %971, %974 : vector<8x256xf32>
    %c1_353 = arith.constant 1 : index
    %c80_354 = arith.constant 80 : index
    %976 = memref.load %arg7[%c1_353, %c80_354] : memref<2x128xf32, #tpu.memory_space<smem>>
    %977 = vector.broadcast %976 : f32 to vector<8x256xf32>
    %978 = arith.mulf %977, %804 : vector<8x256xf32>
    %979 = arith.addf %975, %978 : vector<8x256xf32>
    %c1_355 = arith.constant 1 : index
    %c81_356 = arith.constant 81 : index
    %980 = memref.load %arg7[%c1_355, %c81_356] : memref<2x128xf32, #tpu.memory_space<smem>>
    %981 = vector.broadcast %980 : f32 to vector<8x256xf32>
    %982 = arith.mulf %981, %831 : vector<8x256xf32>
    %983 = arith.addf %979, %982 : vector<8x256xf32>
    %c1_357 = arith.constant 1 : index
    %c82_358 = arith.constant 82 : index
    %984 = memref.load %arg7[%c1_357, %c82_358] : memref<2x128xf32, #tpu.memory_space<smem>>
    %985 = vector.broadcast %984 : f32 to vector<8x256xf32>
    %986 = arith.mulf %985, %858 : vector<8x256xf32>
    %987 = arith.addf %983, %986 : vector<8x256xf32>
    %c1_359 = arith.constant 1 : index
    %c83_360 = arith.constant 83 : index
    %988 = memref.load %arg7[%c1_359, %c83_360] : memref<2x128xf32, #tpu.memory_space<smem>>
    %989 = vector.broadcast %988 : f32 to vector<8x256xf32>
    %990 = arith.mulf %989, %885 : vector<8x256xf32>
    %991 = arith.addf %987, %990 : vector<8x256xf32>
    %992 = vector.extract_strided_slice %645 {offsets = [0, 512], sizes = [8, 256], strides = [1, 1]} : vector<8x1024xf32> to vector<8x256xf32>
    %993 = arith.addf %992, %991 : vector<8x256xf32>
    %c1_361 = arith.constant 1 : index
    %c95_362 = arith.constant 95 : index
    %994 = memref.load %arg7[%c1_361, %c95_362] : memref<2x128xf32, #tpu.memory_space<smem>>
    %c1_363 = arith.constant 1 : index
    %c84_364 = arith.constant 84 : index
    %995 = memref.load %arg7[%c1_363, %c84_364] : memref<2x128xf32, #tpu.memory_space<smem>>
    %996 = vector.broadcast %995 : f32 to vector<8x256xf32>
    %997 = arith.mulf %996, %696 : vector<8x256xf32>
    %998 = vector.broadcast %994 : f32 to vector<8x256xf32>
    %999 = arith.addf %998, %997 : vector<8x256xf32>
    %c1_365 = arith.constant 1 : index
    %c85_366 = arith.constant 85 : index
    %1000 = memref.load %arg7[%c1_365, %c85_366] : memref<2x128xf32, #tpu.memory_space<smem>>
    %1001 = vector.broadcast %1000 : f32 to vector<8x256xf32>
    %1002 = arith.mulf %1001, %723 : vector<8x256xf32>
    %1003 = arith.addf %999, %1002 : vector<8x256xf32>
    %c1_367 = arith.constant 1 : index
    %c86_368 = arith.constant 86 : index
    %1004 = memref.load %arg7[%c1_367, %c86_368] : memref<2x128xf32, #tpu.memory_space<smem>>
    %1005 = vector.broadcast %1004 : f32 to vector<8x256xf32>
    %1006 = arith.mulf %1005, %750 : vector<8x256xf32>
    %1007 = arith.addf %1003, %1006 : vector<8x256xf32>
    %c1_369 = arith.constant 1 : index
    %c87_370 = arith.constant 87 : index
    %1008 = memref.load %arg7[%c1_369, %c87_370] : memref<2x128xf32, #tpu.memory_space<smem>>
    %1009 = vector.broadcast %1008 : f32 to vector<8x256xf32>
    %1010 = arith.mulf %1009, %777 : vector<8x256xf32>
    %1011 = arith.addf %1007, %1010 : vector<8x256xf32>
    %c1_371 = arith.constant 1 : index
    %c88_372 = arith.constant 88 : index
    %1012 = memref.load %arg7[%c1_371, %c88_372] : memref<2x128xf32, #tpu.memory_space<smem>>
    %1013 = vector.broadcast %1012 : f32 to vector<8x256xf32>
    %1014 = arith.mulf %1013, %804 : vector<8x256xf32>
    %1015 = arith.addf %1011, %1014 : vector<8x256xf32>
    %c1_373 = arith.constant 1 : index
    %c89_374 = arith.constant 89 : index
    %1016 = memref.load %arg7[%c1_373, %c89_374] : memref<2x128xf32, #tpu.memory_space<smem>>
    %1017 = vector.broadcast %1016 : f32 to vector<8x256xf32>
    %1018 = arith.mulf %1017, %831 : vector<8x256xf32>
    %1019 = arith.addf %1015, %1018 : vector<8x256xf32>
    %c1_375 = arith.constant 1 : index
    %c90_376 = arith.constant 90 : index
    %1020 = memref.load %arg7[%c1_375, %c90_376] : memref<2x128xf32, #tpu.memory_space<smem>>
    %1021 = vector.broadcast %1020 : f32 to vector<8x256xf32>
    %1022 = arith.mulf %1021, %858 : vector<8x256xf32>
    %1023 = arith.addf %1019, %1022 : vector<8x256xf32>
    %c1_377 = arith.constant 1 : index
    %c91_378 = arith.constant 91 : index
    %1024 = memref.load %arg7[%c1_377, %c91_378] : memref<2x128xf32, #tpu.memory_space<smem>>
    %1025 = vector.broadcast %1024 : f32 to vector<8x256xf32>
    %1026 = arith.mulf %1025, %885 : vector<8x256xf32>
    %1027 = arith.addf %1023, %1026 : vector<8x256xf32>
    %1028 = vector.extract_strided_slice %645 {offsets = [0, 768], sizes = [8, 256], strides = [1, 1]} : vector<8x1024xf32> to vector<8x256xf32>
    %1029 = arith.addf %1028, %1027 : vector<8x256xf32>
    %1030 = tpu.concatenate %921, %957, %993, %1029 in 1 : vector<8x256xf32>, vector<8x256xf32>, vector<8x256xf32>, vector<8x256xf32> -> vector<8x1024xf32>
    %c0_379 = arith.constant 0 : index
    %c0_380 = arith.constant 0 : index
    %1031 = vector.load %arg8[%c0_379, %c0_380] : memref<8x1024xf32, #tpu.memory_space<vmem>>, vector<8x1024xf32>
    tpu.vector_store %arg8[%c0_379, %c0_380], %1030 {strides = array<i32>} : memref<8x1024xf32, #tpu.memory_space<vmem>>, vector<8x1024xf32>,
    return
  }
}

</mosaic_0001>

<bundles_post_ra>
// kernel: _encode_impl.1
= control target key start
LH: loop header
LB: loop body
LE: loop exit
PB: predicated region body
PF: predicated region fallthrough
CT: control target
= control target key end

     0   :  { %s7596_s0 = inlined_call_operand.hbm [shape: f32[8,1024], index: 0, kind: input, shape index: {}]   ;;  %s7597_s1 = inlined_call_operand.hbm [shape: f32[8,1024], index: 1, kind: input, shape index: {}]   ;;  %s7598_s2 = inlined_call_operand.hbm [shape: f32[2,1024], index: 2, kind: input, shape index: {}]   ;;  %s7599_s3 = inlined_call_operand.hbm [shape: f32[2,1024], index: 3, kind: input, shape index: {}]   ;;  %s7600_s4 = inlined_call_operand.hbm [shape: bf16[2,1024,256], index: 4, kind: input, shape index: {}]   ;;  %s7601_s5 = inlined_call_operand.vmem [shape: f32[2,1024], index: 5, kind: input, shape index: {}]   ;;  %s7602_s6 = inlined_call_operand.hbm [shape: f32[2,1024], index: 6, kind: input, shape index: {}]   ;;  %s7603_s7 = inlined_call_operand.vmem [shape: f32[2,128], index: 7, kind: input, shape index: {}]   ;;  %s7604_s8 = inlined_call_operand.hbm [shape: f32[8,1024], index: 8, kind: output, shape index: {}]  }
   0x1   :  { %7794 = sst [smem:[#allocation77_spill]] %s7601_s5 }
   0x2   :  { %7795 = sst [smem:[#allocation78_spill]] %s7604_s8 }
   0x3   :  { %13 = vsyncpa [#allocation3], 0 }
   0x4   :  { %14 = vsyncpa [#allocation7], 0 }
   0x5   :  { %15 = vsyncpa [#allocation10], 0 }
   0x6   :  { %16 = vsyncpa [#allocation13], 0 }
   0x7   :  { %17 = vsyncpa [#allocation5], 0 }
   0x8   :  { %18 = vsyncpa [#allocation4], 0  ;;  %s5100_s27 = smov [#allocation6]   ;;  %s5101_s29 = smov [#allocation9]  }
   0x9   :  { %s35_s28 = sshll.u32 %s5100_s27, 4  ;;  %s55_s30 = sshll.u32 %s5101_s29, 4  ;;  %s36_s28 = int_to_ptr.vmem [resolvable:$true] %s35_s28  ;;  %s56_s30 = int_to_ptr.vmem [resolvable:$true] %s55_s30 }
   0xa   :  { %s4922_s11 = scalar_lea.hbm %s7597_s1, 1024 }
   0xb   :  { %p4923_p0 = scmp.ne.s32.totalorder %s7597_s1, %s4922_s11  ;;  %p4926_p1 = scmp.lt.u32.totalorder %s4922_s11, %s7597_s1 }
   0xd   :  { %p4928_p2 = pnand %p4926_p1, %p4923_p0 }
   0xf   :  { %4931 = shalt.err (!%p4928_p2)
}
  0x10   :  { %s4932_s16 = scalar_lea.vmem %s36_s28, 1024  ;;  %p4937_p4 = scmp.lt.s32.totalorder %s36_s28, %s36_s28 }
  0x11   :  { %p4933_p3 = scmp.ne.s32.totalorder %s36_s28, %s4932_s16  ;;  %p4938_p5 = scmp.lt.s32.totalorder %s4932_s16, %s4932_s16 }
  0x13   :  { %p4939_p6 = por %p4938_p5, %p4937_p4 }
  0x15   :  { %p4940_p7 = pnand %p4939_p6, %p4933_p3 }
  0x17   :  { %4943 = shalt.err (!%p4940_p7)
}
  0x18   :  { %38 = dma.hbm_to_vmem [thread:$0]  %s7597_s1, 1024, %s36_s28, [#allocation7]  }
  0x19   :  { %s4944_s21 = scalar_lea.hbm %s7599_s3, 256 }
  0x1a   :  { %p4945_p8 = scmp.ne.s32.totalorder %s7599_s3, %s4944_s21  ;;  %p4948_p9 = scmp.lt.u32.totalorder %s4944_s21, %s7599_s3 }
  0x1c   :  { %p4950_p10 = pnand %p4948_p9, %p4945_p8 }
  0x1e   :  { %4953 = shalt.err (!%p4950_p10)
}
  0x1f   :  { %s4954_s26 = scalar_lea.vmem %s56_s30, 256  ;;  %p4959_p12 = scmp.lt.s32.totalorder %s56_s30, %s56_s30 }
  0x20   :  { %p4955_p11 = scmp.ne.s32.totalorder %s56_s30, %s4954_s26  ;;  %p4960_p13 = scmp.lt.s32.totalorder %s4954_s26, %s4954_s26 }
  0x22   :  { %p4961_p0 = por %p4960_p13, %p4959_p12 }
  0x24   :  { %p4962_p1 = pnand %p4961_p0, %p4955_p11 }
  0x26   :  { %4965 = shalt.err (!%p4962_p1)
}
  0x27   :  { %58 = dma.hbm_to_vmem [thread:$0]  %s7599_s3, 256, %s56_s30, [#allocation10]  }
  0x28   :  { %s5102_s28 = smov [#allocation2]   ;;  %s5103_s9 = smov [#allocation8]  }
  0x29   :  { %s25_s29 = sshll.u32 %s5102_s28, 4  ;;  %s45_s10 = sshll.u32 %s5103_s9, 4  ;;  %s26_s29 = int_to_ptr.vmem [resolvable:$true] %s25_s29  ;;  %s46_s10 = int_to_ptr.vmem [resolvable:$true] %s45_s10 }
  0x2a   :  { %s4966_s13 = scalar_lea.hbm %s7596_s0, 1024 }
  0x2b   :  { %p4967_p2 = scmp.ne.s32.totalorder %s7596_s0, %s4966_s13  ;;  %p4970_p3 = scmp.lt.u32.totalorder %s4966_s13, %s7596_s0 }
  0x2d   :  { %p4972_p4 = pnand %p4970_p3, %p4967_p2 }
  0x2f   :  { %4975 = shalt.err (!%p4972_p4)
}
  0x30   :  { %s4976_s3 = scalar_lea.vmem %s26_s29, 1024  ;;  %p4981_p6 = scmp.lt.s32.totalorder %s26_s29, %s26_s29 }
  0x31   :  { %p4977_p5 = scmp.ne.s32.totalorder %s26_s29, %s4976_s3  ;;  %p4982_p7 = scmp.lt.s32.totalorder %s4976_s3, %s4976_s3 }
  0x33   :  { %p4983_p8 = por %p4982_p7, %p4981_p6 }
  0x35   :  { %p4984_p9 = pnand %p4983_p8, %p4977_p5 }
  0x37   :  { %4987 = shalt.err (!%p4984_p9)
}
  0x38   :  { %28 = dma.hbm_to_vmem [thread:$0]  %s7596_s0, 1024, %s26_s29, [#allocation3]  }
  0x39   :  { %s4988_s21 = scalar_lea.hbm %s7598_s2, 256 }
  0x3a   :  { %p4989_p10 = scmp.ne.s32.totalorder %s7598_s2, %s4988_s21  ;;  %p4992_p11 = scmp.lt.u32.totalorder %s4988_s21, %s7598_s2 }
  0x3c   :  { %p4994_p12 = pnand %p4992_p11, %p4989_p10 }
  0x3e   :  { %4997 = shalt.err (!%p4994_p12)
}
  0x3f   :  { %s4998_s26 = scalar_lea.vmem %s46_s10, 256  ;;  %p5003_p0 = scmp.lt.s32.totalorder %s46_s10, %s46_s10 }
  0x40   :  { %p4999_p13 = scmp.ne.s32.totalorder %s46_s10, %s4998_s26  ;;  %p5004_p1 = scmp.lt.s32.totalorder %s4998_s26, %s4998_s26 }
  0x42   :  { %p5005_p2 = por %p5004_p1, %p5003_p0 }
  0x44   :  { %p5006_p3 = pnand %p5005_p2, %p4999_p13 }
  0x46   :  { %5009 = shalt.err (!%p5006_p3)
}
  0x47   :  { %48 = dma.hbm_to_vmem [thread:$0]  %s7598_s2, 256, %s46_s10, [#allocation7]  }
  0x48   :  { %s5104_s27 = smov [#allocation11]   ;;  %s5010_s11 = scalar_lea.hbm %s7600_s4, 32768 }
  0x49   :  { %s64_s28 = sshll.u32 %s5104_s27, 4  ;;  %p5011_p4 = scmp.ne.s32.totalorder %s7600_s4, %s5010_s11  ;;  %s65_s28 = int_to_ptr.vmem [resolvable:$true] %s64_s28 }
  0x4a   :  { %p5014_p5 = scmp.lt.u32.totalorder %s5010_s11, %s7600_s4 }
  0x4c   :  { %p5016_p6 = pnand %p5014_p5, %p5011_p4 }
  0x4e   :  { %5019 = shalt.err (!%p5016_p6)
}
  0x4f   :  { %s5020_s16 = scalar_lea.vmem %s65_s28, 32768  ;;  %p5025_p8 = scmp.lt.s32.totalorder %s65_s28, %s65_s28 }
  0x50   :  { %p5021_p7 = scmp.ne.s32.totalorder %s65_s28, %s5020_s16  ;;  %p5026_p9 = scmp.lt.s32.totalorder %s5020_s16, %s5020_s16 }
  0x52   :  { %p5027_p10 = por %p5026_p9, %p5025_p8 }
  0x54   :  { %p5028_p11 = pnand %p5027_p10, %p5021_p7 }
  0x56   :  { %5031 = shalt.err (!%p5028_p11)
}
  0x57   :  { %s5105_s2 = smov 128   ;;  %s5106_s10 = smov 8  }
  0x58   :  { %70 = dma.hbm_to_vmem [thread:$0]  %s7600_s4, 32768, %s65_s28, [#allocation10], %s5105_s2, %s5105_s2, %s5106_s10  }
  0x59   :  { %s5107_s30 = smov [#allocation12]   ;;  %s89_s21 = sshll.u32 %s7603_s7, 4  ;;  %s90_s21 = int_to_ptr.vmem [resolvable:$true] %s89_s21 }
  0x5a   :  { %s79_s18 = sshll.u32 %s5107_s30, 4  ;;  %s5032_s24 = scalar_lea.hbm %s7602_s6, 256  ;;  %s80_s18 = int_to_ptr.vmem [resolvable:$true] %s79_s18 }
  0x5b   :  { %p5033_p12 = scmp.ne.s32.totalorder %s7602_s6, %s5032_s24  ;;  %p5036_p13 = scmp.lt.u32.totalorder %s5032_s24, %s7602_s6 }
  0x5d   :  { %p5038_p0 = pnand %p5036_p13, %p5033_p12 }
  0x5f   :  { %5041 = shalt.err (!%p5038_p0)
}
  0x60   :  { %s5042_s4 = scalar_lea.vmem %s80_s18, 256  ;;  %p5047_p2 = scmp.lt.s32.totalorder %s80_s18, %s80_s18 }
  0x61   :  { %p5043_p1 = scmp.ne.s32.totalorder %s80_s18, %s5042_s4  ;;  %p5048_p3 = scmp.lt.s32.totalorder %s5042_s4, %s5042_s4 }
  0x63   :  { %p5049_p4 = por %p5048_p3, %p5047_p2 }
  0x65   :  { %p5050_p5 = pnand %p5049_p4, %p5043_p1 }
  0x67   :  { %5053 = shalt.err (!%p5050_p5)
}
  0x68   :  { %82 = dma.hbm_to_vmem [thread:$0]  %s7602_s6, 256, %s80_s18, [#allocation13]  }
  0x69   :  { %s5054_s28 = scalar_lea.vmem %s90_s21, 32  ;;  %p5059_p7 = scmp.lt.s32.totalorder %s90_s21, %s90_s21 }
  0x6a   :  { %p5055_p6 = scmp.ne.s32.totalorder %s90_s21, %s5054_s28  ;;  %p5060_p8 = scmp.lt.s32.totalorder %s5054_s28, %s5054_s28 }
  0x6c   :  { %p5061_p9 = por %p5060_p8, %p5059_p7 }
  0x6e   :  { %p5062_p10 = pnand %p5061_p9, %p5055_p6 }
  0x70   :  { %5065 = shalt.err (!%p5062_p10)
}
  0x71   :  { %s5108_s29 = smov [#allocation14]  }
  0x72   :  { %92 = dma.vmem_to_smem %s90_s21, 32, %s5108_s29, [#allocation5]  }
  0x73   :  { %5088 = dma.done.wait [#allocation3], 1024  }
  0x74   :  { %5089 = vsyncadd [#allocation3], 4294966272 }
  0x75   :  { %5090 = dma.done.wait [#allocation7], 1280  }
  0x76   :  { %5091 = vsyncadd [#allocation7], 4294966016 }
  0x77   :  { %5092 = dma.done.wait [#allocation10], 33024  }
  0x78   :  { %5093 = vsyncadd [#allocation10], 4294934272 }
  0x79   :  { %5094 = dma.done.wait [#allocation13], 256  }
  0x7a   :  { %5095 = vsyncadd [#allocation13], 4294967040 }
  0x7b   :  { %5096 = dma.done.wait [#allocation5], 32  }
  0x7c   :  { %5097 = vsyncadd [#allocation5], 4294967264 }
  0x7d   :  { %114 = sfence }
  0x7e   :  { %v115_v0 = vld [vmem:[#allocation2] sm:$0xff]  ;;  %v116_v1 = vld [vmem:[#allocation2 + $0x8] sm:$0xff]  ;;  %v117_v2 = vld [vmem:[#allocation2 + $0x10] sm:$0xff]  ;;  %s5366_s6 = sld [smem:[#allocation14]]  ;;  %s5368_s9 = sld [smem:[#allocation14 + $0x1]] }
  0x7f   :  { %v118_v3 = vld [vmem:[#allocation2 + $0x18] sm:$0xff]  ;;  %v123_v4 = vld [vmem:[#allocation6] sm:$0xff]  ;;  %v124_v5 = vld [vmem:[#allocation6 + $0x8] sm:$0xff]  ;;  %s5370_s11 = sld [smem:[#allocation14 + $0x2]]  ;;  %s5372_s12 = sld [smem:[#allocation14 + $0x3]] }
  0x80   :  { %v125_v6 = vld [vmem:[#allocation6 + $0x10] sm:$0xff]  ;;  %v126_v7 = vld [vmem:[#allocation6 + $0x18] sm:$0xff]  ;;  %v5230_v8 = vadd.f32 %v123_v4, %v115_v0  ;;  %v119_v9 = vld [vmem:[#allocation2 + $0x20] sm:$0xff]  ;;  %v5232_v11 = vadd.f32 %v124_v5, %v116_v1  ;;  %s5374_s13 = sld [smem:[#allocation14 + $0x10]]  ;;  %s5376_s14 = sld [smem:[#allocation14 + $0x11]] }
  0x81   :  { %v127_v10 = vld [vmem:[#allocation6 + $0x20] sm:$0xff]  ;;  %v5234_v12 = vadd.f32 %v125_v6, %v117_v2  ;;  %v120_v13 = vld [vmem:[#allocation2 + $0x28] sm:$0xff]  ;;  %v5236_v15 = vadd.f32 %v126_v7, %v118_v3  ;;  %v121_v17 = vld [vmem:[#allocation2 + $0x30] sm:$0xff]  ;;  %s5378_s15 = sld [smem:[#allocation14 + $0x4]]  ;;  %s5380_s16 = sld [smem:[#allocation14 + $0x5]] }
  0x82   :  { %v128_v14 = vld [vmem:[#allocation6 + $0x28] sm:$0xff]  ;;  %v139_v16 = vadd.f32 %v5232_v11, %v5230_v8  ;;  %v129_v18 = vld [vmem:[#allocation6 + $0x30] sm:$0xff]  ;;  %v5240_v19 = vadd.f32 %v127_v10, %v119_v9  ;;  %v122_v21 = vld [vmem:[#allocation2 + $0x38] sm:$0xff]  ;;  %s5382_s2 = sld [smem:[#allocation14 + $0x6]]  ;;  %s5384_s10 = sld [smem:[#allocation14 + $0x7]] }
  0x83   :  { %v130_v22 = vld [vmem:[#allocation6 + $0x38] sm:$0xff]  ;;  %v5243_v23 = vadd.f32 %v128_v14, %v120_v13  ;;  %v5246_v25 = vadd.f32 %v129_v18, %v121_v17  ;;  %v4514_v31 = vld [vmem:[#allocation11 + $0x4] ss:$8 sps:$4 sm:$0xff]   ;;  %v4516_v32 = vld [vmem:[#allocation11] ss:$8 sps:$4 sm:$0xff]   ;;  %s5386_s17 = sld [smem:[#allocation14 + $0x8]] }
  0x84   :  { %v140_v20 = vadd.f32 %v139_v16, %v5234_v12  ;;  %v5249_v27 = vadd.f32 %v130_v22, %v122_v21  ;;  %v4517_v33 = vld [vmem:[#allocation11 + $0x14] ss:$8 sps:$4 sm:$0xff]   ;;  %1062 = vmatprep.subr.bf16.mxu0 %v4514_v31  ;;  %v4519_v34 = vld [vmem:[#allocation11 + $0x10] ss:$8 sps:$4 sm:$0xff]   ;;  %v4520_v35 = vld [vmem:[#allocation11 + $0x24] ss:$8 sps:$4 sm:$0xff]  }
  0x85   :  { %1063 = vmatpush1.bf16.msra.mxu0 %v4516_v32  ;;  %v4522_v36 = vld [vmem:[#allocation11 + $0x20] ss:$8 sps:$4 sm:$0xff]   ;;  %v4523_v37 = vld [vmem:[#allocation11 + $0x34] ss:$8 sps:$4 sm:$0xff]   ;;  %v4525_v38 = vld [vmem:[#allocation11 + $0x30] ss:$8 sps:$4 sm:$0xff]  }
  0x86   :  { %v141_v24 = vadd.f32 %v140_v20, %v5236_v15  ;;  %1064 = vmatprep.subr.bf16.mxu0 %v4517_v33  ;;  %v4526_v39 = vld [vmem:[#allocation11 + $0x44] ss:$8 sps:$4 sm:$0xff]   ;;  %v4528_v40 = vld [vmem:[#allocation11 + $0x40] ss:$8 sps:$4 sm:$0xff]   ;;  %v4529_v41 = vld [vmem:[#allocation11 + $0x54] ss:$8 sps:$4 sm:$0xff]  }
  0x87   :  { %v4531_v42 = vld [vmem:[#allocation11 + $0x50] ss:$8 sps:$4 sm:$0xff]   ;;  %v4532_v43 = vld [vmem:[#allocation11 + $0x64] ss:$8 sps:$4 sm:$0xff]   ;;  %v4534_v44 = vld [vmem:[#allocation11 + $0x60] ss:$8 sps:$4 sm:$0xff]  }
  0x88   :  { %v142_v26 = vadd.f32 %v141_v24, %v5240_v19  ;;  %v4535_v45 = vld [vmem:[#allocation11 + $0x74] ss:$8 sps:$4 sm:$0xff]   ;;  %v4537_v46 = vld [vmem:[#allocation11 + $0x70] ss:$8 sps:$4 sm:$0xff]   ;;  %v4538_v47 = vld [vmem:[#allocation11 + $0x84] ss:$8 sps:$4 sm:$0xff]  }
  0x89   :  { %1065 = vmatpush1.bf16.msra.mxu0 %v4519_v34  ;;  %v4540_v48 = vld [vmem:[#allocation11 + $0x80] ss:$8 sps:$4 sm:$0xff]   ;;  %v4541_v49 = vld [vmem:[#allocation11 + $0x94] ss:$8 sps:$4 sm:$0xff]   ;;  %v4543_v50 = vld [vmem:[#allocation11 + $0x90] ss:$8 sps:$4 sm:$0xff]   ;;  %v188_v34 = vlaneseq }
  0x8a   :  { %v143_v28 = vadd.f32 %v142_v26, %v5243_v23  ;;  %1066 = vmatprep.subr.bf16.mxu0 %v4520_v35  ;;  %v4544_v51 = vld [vmem:[#allocation11 + $0xa4] ss:$8 sps:$4 sm:$0xff]   ;;  %v4546_v17 = vld [vmem:[#allocation11 + $0xa0] ss:$8 sps:$4 sm:$0xff]   ;;  %v4547_v18 = vld [vmem:[#allocation11 + $0xb4] ss:$8 sps:$4 sm:$0xff]  }
  0x8b   :  { %v4549_v20 = vld [vmem:[#allocation11 + $0xb0] ss:$8 sps:$4 sm:$0xff]   ;;  %v4550_v21 = vld [vmem:[#allocation11 + $0xc4] ss:$8 sps:$4 sm:$0xff]   ;;  %v4552_v22 = vld [vmem:[#allocation11 + $0xc0] ss:$8 sps:$4 sm:$0xff]  }
  0x8c   :  { %v144_v29 = vadd.f32 %v143_v28, %v5246_v25  ;;  %v4553_v24 = vld [vmem:[#allocation11 + $0xd4] ss:$8 sps:$4 sm:$0xff]   ;;  %v4555_v26 = vld [vmem:[#allocation11 + $0xd0] ss:$8 sps:$4 sm:$0xff]   ;;  %v4556_v28 = vld [vmem:[#allocation11 + $0xe4] ss:$8 sps:$4 sm:$0xff]  }
  0x8d   :  { %1067 = vmatpush1.bf16.msra.mxu0 %v4522_v36  ;;  %v4561_v31 = vld [vmem:[#allocation11 + $0xf0] ss:$8 sps:$4 sm:$0xff]   ;;  %v4564_v32 = vld [vmem:[#allocation11 + $0x104] ss:$8 sps:$4 sm:$0xff]   ;;  %s5388_s3 = sld [smem:[#allocation14 + $0x9]]  ;;  %s5390_s30 = sld [smem:[#allocation14 + $0x12]] }
  0x8e   :  { %v145_v30 = vadd.f32 %v144_v29, %v5249_v27  ;;  %1068 = vmatprep.subr.bf16.mxu0 %v4523_v37  ;;  %v4558_v29 = vld [vmem:[#allocation11 + $0xe0] ss:$8 sps:$4 sm:$0xff]   ;;  %v189_v37 = vshrl.u32 %v188_v34, 7  ;;  %s5392_s18 = sld [smem:[#allocation14 + $0xa]]  ;;  %s5394_s19 = sld [smem:[#allocation14 + $0xb]] }
  0x8f   :  { %v4562_v34 = vld [vmem:[#allocation11 + $0x100] ss:$8 sps:$4 sm:$0xff]   ;;  %s5396_s20 = sld [smem:[#allocation14 + $0xc]]  ;;  %s5422_s21 = sld [smem:[#allocation14 + $0xd]] }
  0x90   :  { %146 = vadd.xlane.f32.xlu0 %v145_v30  ;;  %v4559_v30 = vld [vmem:[#allocation11 + $0xf4] ss:$8 sps:$4 sm:$0xff]   ;;  %s5424_s22 = sld [smem:[#allocation14 + $0x13]]  ;;  %s5426_s23 = sld [smem:[#allocation14 + $0xe]] }
  0x91   :  { %1069 = vmatpush1.bf16.msra.mxu0 %v4525_v38  ;;  %v5294_v38 = vsub.s32 0, %v189_v37  ;;  %s5428_s24 = sld [smem:[#allocation14 + $0xf]]  ;;  %s5610_s25 = sld [smem:[#allocation14 + $0x34]] }
  0x92   :  { %1070 = vmatprep.subr.bf16.mxu0 %v4526_v39  ;;  %v5296_v39 = vsub.s32 1, %v189_v37  ;;  %s5612_s26 = sld [smem:[#allocation14 + $0x14]]  ;;  %s5614_s0 = sld [smem:[#allocation14 + $0x15]] }
  0x93   :  { %s5616_s1 = sld [smem:[#allocation14 + $0x16]]  ;;  %s5618_s4 = sld [smem:[#allocation14 + $0x17]] }
  0x94   :  { %s5620_s7 = sld [smem:[#allocation14 + $0x18]]  ;;  %s5622_s27 = sld [smem:[#allocation14 + $0x35]] }
  0x95   :  { %1071 = vmatpush1.bf16.msra.mxu0 %v4528_v40  ;;  %v5298_v40 = vsub.s32 3, %v189_v37  ;;  %s5624_s28 = sld [smem:[#allocation14 + $0x19]]  ;;  %s5626_s29 = sld [smem:[#allocation14 + $0x1a]] }
  0x96   :  { %1072 = vmatprep.subr.bf16.mxu0 %v4529_v41  ;;  %v5300_v41 = vsub.s32 2, %v189_v37  ;;  %s5668_s8 = sld [smem:[#allocation14 + $0x2b]] }
  0x97   :  { %7796 = sst [smem:[#allocation22_spill]] %s5610_s25  ;;  %s5759_s25 = sld [smem:[#allocation14 + $0x44]] }
  0x98   :  { %7797 = sst [smem:[#allocation23_spill]] %s5612_s26 }
  0x99   :  { %1073 = vmatpush1.bf16.msra.mxu0 %v4531_v42  ;;  %v186_v42 = vld [vmem:[#allocation8] ss:$2 sm:$0xff]  ;;  %7798 = sst [smem:[#allocation24_spill]] %s5614_s0 }
  0x9a   :  { %1074 = vmatprep.subr.bf16.mxu0 %v4532_v43  ;;  %v5302_v43 = vsub.s32 5, %v189_v37  ;;  %7799 = sst [smem:[#allocation25_spill]] %s5616_s1 }
  0x9b   :  { %7800 = sst [smem:[#allocation26_spill]] %s5618_s4 }
  0x9c   :  { %7801 = sst [smem:[#allocation27_spill]] %s5620_s7 }
  0x9d   :  { %1075 = vmatpush1.bf16.msra.mxu0 %v4534_v44  ;;  %v5304_v44 = vsub.s32 4, %v189_v37  ;;  %7802 = sst [smem:[#allocation28_spill]] %s5622_s27  ;;  %s5805_s27 = sld [smem:[#allocation14 + $0x4f]] }
  0x9e   :  { %1076 = vmatprep.subr.bf16.mxu0 %v4535_v45  ;;  %v5306_v45 = vsub.s32 7, %v189_v37  ;;  %7803 = sst [smem:[#allocation29_spill]] %s5624_s28 }
  0x9f   :  { %7804 = sst [smem:[#allocation30_spill]] %s5626_s29 }
  0xa0   :  { %7825 = sst [smem:[#allocation51_spill]] %s5668_s8  ;;  %s5689_s8 = sld [smem:[#allocation14 + $0x3b]] }
  0xa1   :  { %1077 = vmatpush1.bf16.msra.mxu0 %v4537_v46  ;;  %v5308_v46 = vsub.s32 6, %v189_v37  ;;  %s5774_s29 = sld [smem:[#allocation14 + $0x48]] }
  0xa2   :  { %1078 = vmatprep.subr.bf16.mxu0 %v4538_v47  ;;  %v236_v47 = vld [vmem:[#allocation9] ss:$2 sm:$0xff] }
  0xa5   :  { %1079 = vmatpush1.bf16.msra.mxu0 %v4540_v48  ;;  %v195_v48 = vrot.slane %v186_v42, %v5296_v39 }
  0xa6   :  { %1080 = vmatprep.subr.bf16.mxu0 %v4541_v49  ;;  %v191_v49 = vrot.slane %v186_v42, %v5294_v38  ;;  %7829 = sst [smem:[#allocation55_spill]] %s5689_s8 }
  0xa7   :  { %7848 = sst [smem:[#allocation68_spill]] %s5774_s29  ;;  %s5949_s29 = sld [smem:[#allocation14 + $0x52]] }
  0xa9   :  { %1081 = vmatpush1.bf16.msra.mxu0 %v4543_v50  ;;  %v203_v50 = vrot.slane %v186_v42, %v5298_v40 }
  0xaa   :  { %1082 = vmatprep.subr.bf16.mxu0 %v4544_v51  ;;  %v199_v51 = vrot.slane %v186_v42, %v5300_v41 }
  0xad   :  { %1083 = vmatpush1.bf16.msra.mxu0 %v4546_v17 }
  0xae   :  { %1084 = vmatprep.subr.bf16.mxu0 %v4547_v18 }
  0xb1   :  { %1085 = vmatpush1.bf16.msra.mxu0 %v4549_v20 }
  0xb2   :  { %1086 = vmatprep.subr.bf16.mxu0 %v4550_v21 }
  0xb5   :  { %1087 = vmatpush1.bf16.msra.mxu0 %v4552_v22 }
  0xb6   :  { %1088 = vmatprep.subr.bf16.mxu0 %v4553_v24 }
  0xb9   :  { %1089 = vmatpush1.bf16.msra.mxu0 %v4555_v26 }
  0xba   :  { %1090 = vmatprep.subr.bf16.mxu0 %v4556_v28 }
  0xbd   :  { %1091 = vmatpush1.bf16.msra.mxu0 %v4558_v29 }
  0xbe   :  { %1092 = vmatprep.subr.bf16.mxu0 %v4559_v30 }
  0xc1   :  { %1093 = vmatpush1.bf16.msra.mxu0 %v4561_v31 }
  0xc2   :  { %1103 = vmatprep.subr.bf16.mxu0 %v4564_v32 }
 0x11d   :  { %v147_v52 = vpop.xlane.xlu0 %146 }
 0x11e   :  { %v149_v53 = vmul.f32 0.0009765625, %v147_v52  ;;  %v211_v52 = vrot.slane %v186_v42, %v5302_v43 }
 0x120   :  { %v5255_v54 = vsub.f32 %v5230_v8, %v149_v53  ;;  %v5258_v55 = vsub.f32 %v5232_v11, %v149_v53  ;;  %v5261_v56 = vsub.f32 %v5234_v12, %v149_v53  ;;  %v5264_v57 = vsub.f32 %v5236_v15, %v149_v53 }
 0x121   :  { %v5271_v60 = vsub.f32 %v5240_v19, %v149_v53  ;;  %v5276_v63 = vsub.f32 %v5243_v23, %v149_v53  ;;  %v5281_v2 = vsub.f32 %v5246_v25, %v149_v53  ;;  %v5286_v5 = vsub.f32 %v5249_v27, %v149_v53 }
 0x122   :  { %v158_v58 = vmul.f32 %v5255_v54, %v5255_v54  ;;  %v159_v59 = vmul.f32 %v5258_v55, %v5258_v55  ;;  %v160_v61 = vmul.f32 %v5261_v56, %v5261_v56  ;;  %v161_v0 = vmul.f32 %v5264_v57, %v5264_v57 }
 0x123   :  { %v162_v3 = vmul.f32 %v5271_v60, %v5271_v60  ;;  %v163_v6 = vmul.f32 %v5276_v63, %v5276_v63  ;;  %v164_v9 = vmul.f32 %v5281_v2, %v5281_v2  ;;  %v165_v13 = vmul.f32 %v5286_v5, %v5286_v5 }
 0x124   :  { %v166_v62 = vadd.f32 %v159_v59, %v158_v58  ;;  %v207_v53 = vrot.slane %v186_v42, %v5304_v44  ;;  %v219_v58 = vrot.slane %v186_v42, %v5306_v45  ;;  %v215_v59 = vrot.slane %v186_v42, %v5308_v46  ;;  %v4565_v42 = vld [vmem:[#allocation11 + $0x110] ss:$8 sps:$4 sm:$0xff]  }
 0x126   :  { %v167_v1 = vadd.f32 %v166_v62, %v160_v61  ;;  %v245_v61 = vrot.slane %v236_v47, %v5296_v39  ;;  %v241_v62 = vrot.slane %v236_v47, %v5294_v38 }
 0x128   :  { %v168_v4 = vadd.f32 %v167_v1, %v161_v0  ;;  %v253_v0 = vrot.slane %v236_v47, %v5298_v40  ;;  %v249_v1 = vrot.slane %v236_v47, %v5300_v41 }
 0x12a   :  { %v169_v7 = vadd.f32 %v168_v4, %v162_v3  ;;  %v261_v4 = vrot.slane %v236_v47, %v5302_v43 }
 0x12c   :  { %v170_v10 = vadd.f32 %v169_v7, %v163_v6  ;;  %v257_v6 = vrot.slane %v236_v47, %v5304_v44  ;;  %v269_v7 = vrot.slane %v236_v47, %v5306_v45 }
 0x12e   :  { %v171_v14 = vadd.f32 %v170_v10, %v164_v9  ;;  %v265_v9 = vrot.slane %v236_v47, %v5308_v46  ;;  %v4570_v47 = vld [vmem:[#allocation11 + $0x124] ss:$8 sps:$4 sm:$0xff]  }
 0x130   :  { %v172_v16 = vadd.f32 %v171_v14, %v165_v13 }
 0x132   :  { %173 = vadd.xlane.f32.xlu0 %v172_v16 }
 0x1bf   :  { %v174_v33 = vpop.xlane.xlu0 %173 }
 0x1c0   :  { %v175_v35 = vmul.f32 0.0009765625, %v174_v33 }
 0x1c2   :  { %v176_v36 = vadd.f32 1e-05, %v175_v35 }
 0x1c4   :  { %4898 = vrsqrt.f32 %v176_v36  ;;  %v4567_v36 = vld [vmem:[#allocation11 + $0x114] ss:$8 sps:$4 sm:$0xff]  }
 0x1ce   :  { %v4899_v3 = vpop.eup %4898 }
 0x1cf   :  { %v179_v10 = vmul.f32 %v4899_v3, %v5258_v55  ;;  %v178_v13 = vmul.f32 %v4899_v3, %v5255_v54  ;;  %v181_v14 = vmul.f32 %v4899_v3, %v5264_v57  ;;  %v180_v16 = vmul.f32 %v4899_v3, %v5261_v56 }
 0x1d0   :  { %v183_v17 = vmul.f32 %v4899_v3, %v5276_v63  ;;  %v182_v18 = vmul.f32 %v4899_v3, %v5271_v60  ;;  %v185_v20 = vmul.f32 %v4899_v3, %v5286_v5  ;;  %v184_v21 = vmul.f32 %v4899_v3, %v5281_v2  ;;  %v4586_v3 = vld [vmem:[#allocation11 + $0x180] ss:$8 sps:$4 sm:$0xff]  }
 0x1d1   :  { %v229_v22 = vmul.f32 %v195_v48, %v179_v10  ;;  %v228_v24 = vmul.f32 %v191_v49, %v178_v13  ;;  %v231_v26 = vmul.f32 %v203_v50, %v181_v14  ;;  %v230_v28 = vmul.f32 %v199_v51, %v180_v16  ;;  %v4568_v48 = vld [vmem:[#allocation11 + $0x120] ss:$8 sps:$4 sm:$0xff]   ;;  %v4573_v49 = vld [vmem:[#allocation11 + $0x134] ss:$8 sps:$4 sm:$0xff]   ;;  %v4571_v50 = vld [vmem:[#allocation11 + $0x130] ss:$8 sps:$4 sm:$0xff]  }
 0x1d2   :  { %v233_v29 = vmul.f32 %v211_v52, %v183_v17  ;;  %v232_v55 = vmul.f32 %v207_v53, %v182_v18  ;;  %v235_v30 = vmul.f32 %v219_v58, %v185_v20  ;;  %v234_v54 = vmul.f32 %v215_v59, %v184_v21  ;;  %v4576_v51 = vld [vmem:[#allocation11 + $0x144] ss:$8 sps:$4 sm:$0xff]   ;;  %v4574_v52 = vld [vmem:[#allocation11 + $0x140] ss:$8 sps:$4 sm:$0xff]   ;;  %v4579_v53 = vld [vmem:[#allocation11 + $0x154] ss:$8 sps:$4 sm:$0xff]  }
 0x1d3   :  { %v5334_v31 = vadd.f32 %v245_v61, %v229_v22  ;;  %v5336_v57 = vadd.f32 %v241_v62, %v228_v24  ;;  %v5338_v56 = vadd.f32 %v253_v0, %v231_v26  ;;  %v5340_v63 = vadd.f32 %v249_v1, %v230_v28  ;;  %v4577_v58 = vld [vmem:[#allocation11 + $0x150] ss:$8 sps:$4 sm:$0xff]   ;;  %v4582_v59 = vld [vmem:[#allocation11 + $0x164] ss:$8 sps:$4 sm:$0xff]   ;;  %v4580_v61 = vld [vmem:[#allocation11 + $0x160] ss:$8 sps:$4 sm:$0xff]  }
 0x1d4   :  { %v5342_v60 = vadd.f32 %v261_v4, %v233_v29  ;;  %v5344_v5 = vadd.f32 %v257_v6, %v232_v55  ;;  %v5346_v2 = vadd.f32 %v269_v7, %v235_v30  ;;  %v5348_v32 = vadd.f32 %v265_v9, %v234_v54  ;;  %v4585_v62 = vld [vmem:[#allocation11 + $0x174] ss:$8 sps:$4 sm:$0xff]   ;;  %v4583_v0 = vld [vmem:[#allocation11 + $0x170] ss:$8 sps:$4 sm:$0xff]   ;;  %v4588_v1 = vld [vmem:[#allocation11 + $0x184] ss:$8 sps:$4 sm:$0xff]  }
 0x1d5   :  { %v287_v33 = vpack.c.bf16 %v5334_v31, %v5334_v31  ;;  %v286_v35 = vpack.c.bf16 %v5336_v57, %v5336_v57  ;;  %v289_v37 = vpack.c.bf16 %v5338_v56, %v5338_v56  ;;  %v4591_v4 = vld [vmem:[#allocation11 + $0x194] ss:$8 sps:$4 sm:$0xff]   ;;  %v4589_v6 = vld [vmem:[#allocation11 + $0x190] ss:$8 sps:$4 sm:$0xff]   ;;  %v4594_v7 = vld [vmem:[#allocation11 + $0x1a4] ss:$8 sps:$4 sm:$0xff]   ;;  %v288_v29 = vpack.c.bf16 %v5340_v63, %v5340_v63 }
 0x1d6   :  { %v4592_v9 = vld [vmem:[#allocation11 + $0x1a0] ss:$8 sps:$4 sm:$0xff]   ;;  %v4597_v10 = vld [vmem:[#allocation11 + $0x1b4] ss:$8 sps:$4 sm:$0xff]   ;;  %v4595_v13 = vld [vmem:[#allocation11 + $0x1b0] ss:$8 sps:$4 sm:$0xff]   ;;  %v291_v30 = vpack.c.bf16 %v5342_v60, %v5342_v60 }
 0x1d7   :  { %1094 = vmatprep.mubr.bf16.mxu0 %v287_v33  ;;  %v4600_v14 = vld [vmem:[#allocation11 + $0x1c4] ss:$8 sps:$4 sm:$0xff]   ;;  %v4598_v16 = vld [vmem:[#allocation11 + $0x1c0] ss:$8 sps:$4 sm:$0xff]   ;;  %v4603_v17 = vld [vmem:[#allocation11 + $0x1d4] ss:$8 sps:$4 sm:$0xff]  }
 0x1d8   :  { %1095 = vmatmul.mubr.bf16.vlgmr.msra.gmra.mrb[0].mxu0 %v286_v35  ;;  %v4601_v18 = vld [vmem:[#allocation11 + $0x1d0] ss:$8 sps:$4 sm:$0xff]   ;;  %v4606_v20 = vld [vmem:[#allocation11 + $0x1e4] ss:$8 sps:$4 sm:$0xff]   ;;  %v4604_v21 = vld [vmem:[#allocation11 + $0x1e0] ss:$8 sps:$4 sm:$0xff]  }
 0x1d9   :  { %1104 = vmatpush1.bf16.msra.mxu0 %v4562_v34  ;;  %1135 = vmatprep.mubr.bf16.mxu0 %v289_v37  ;;  %v4609_v22 = vld [vmem:[#allocation11 + $0x1f4] ss:$8 sps:$4 sm:$0xff]   ;;  %v4607_v24 = vld [vmem:[#allocation11 + $0x1f0] ss:$8 sps:$4 sm:$0xff]   ;;  %v4612_v26 = vld [vmem:[#allocation11 + $0x204] ss:$8 sps:$4 sm:$0xff]  }
 0x1da   :  { %1105 = vmatprep.subr.bf16.mxu0 %v4567_v36  ;;  %v4610_v28 = vld [vmem:[#allocation11 + $0x200] ss:$8 sps:$4 sm:$0xff]   ;;  %v4615_v55 = vld [vmem:[#allocation11 + $0x214] ss:$8 sps:$4 sm:$0xff]   ;;  %v4613_v54 = vld [vmem:[#allocation11 + $0x210] ss:$8 sps:$4 sm:$0xff]  }
 0x1db   :  { %v4618_v33 = vld [vmem:[#allocation11 + $0x224] ss:$8 sps:$4 sm:$0xff]   ;;  %v4616_v34 = vld [vmem:[#allocation11 + $0x220] ss:$8 sps:$4 sm:$0xff]   ;;  %v4621_v35 = vld [vmem:[#allocation11 + $0x234] ss:$8 sps:$4 sm:$0xff]  }
 0x1dc   :  { %v4619_v36 = vld [vmem:[#allocation11 + $0x230] ss:$8 sps:$4 sm:$0xff]   ;;  %v4624_v37 = vld [vmem:[#allocation11 + $0x244] ss:$8 sps:$4 sm:$0xff]  }
 0x1dd   :  { %1106 = vmatpush1.bf16.msra.mxu0 %v4565_v42  ;;  %v4622_v42 = vld [vmem:[#allocation11 + $0x240] ss:$8 sps:$4 sm:$0xff]  }
 0x1de   :  { %1107 = vmatprep.subr.bf16.mxu0 %v4570_v47  ;;  %v4627_v47 = vld [vmem:[#allocation11 + $0x254] ss:$8 sps:$4 sm:$0xff]  }
 0x1e1   :  { %1108 = vmatpush1.bf16.msra.mxu0 %v4568_v48  ;;  %v4625_v48 = vld [vmem:[#allocation11 + $0x250] ss:$8 sps:$4 sm:$0xff]  }
 0x1e2   :  { %1109 = vmatprep.subr.bf16.mxu0 %v4573_v49  ;;  %v4630_v49 = vld [vmem:[#allocation11 + $0x264] ss:$8 sps:$4 sm:$0xff]  }
 0x1e5   :  { %1110 = vmatpush1.bf16.msra.mxu0 %v4571_v50  ;;  %v4628_v50 = vld [vmem:[#allocation11 + $0x260] ss:$8 sps:$4 sm:$0xff]  }
 0x1e6   :  { %1111 = vmatprep.subr.bf16.mxu0 %v4576_v51  ;;  %v4633_v51 = vld [vmem:[#allocation11 + $0x274] ss:$8 sps:$4 sm:$0xff]  }
 0x1e9   :  { %1112 = vmatpush1.bf16.msra.mxu0 %v4574_v52  ;;  %v4631_v52 = vld [vmem:[#allocation11 + $0x270] ss:$8 sps:$4 sm:$0xff]  }
 0x1ea   :  { %1113 = vmatprep.subr.bf16.mxu0 %v4579_v53  ;;  %v4636_v53 = vld [vmem:[#allocation11 + $0x284] ss:$8 sps:$4 sm:$0xff]  }
 0x1ed   :  { %1114 = vmatpush1.bf16.msra.mxu0 %v4577_v58  ;;  %v4634_v58 = vld [vmem:[#allocation11 + $0x280] ss:$8 sps:$4 sm:$0xff]  }
 0x1ee   :  { %1115 = vmatprep.subr.bf16.mxu0 %v4582_v59  ;;  %v4639_v59 = vld [vmem:[#allocation11 + $0x294] ss:$8 sps:$4 sm:$0xff]  }
 0x1f1   :  { %1116 = vmatpush1.bf16.msra.mxu0 %v4580_v61  ;;  %v4637_v61 = vld [vmem:[#allocation11 + $0x290] ss:$8 sps:$4 sm:$0xff]  }
 0x1f2   :  { %1117 = vmatprep.subr.bf16.mxu0 %v4585_v62  ;;  %v4642_v62 = vld [vmem:[#allocation11 + $0x2a4] ss:$8 sps:$4 sm:$0xff]  }
 0x1f5   :  { %1118 = vmatpush1.bf16.msra.mxu0 %v4583_v0  ;;  %v4640_v0 = vld [vmem:[#allocation11 + $0x2a0] ss:$8 sps:$4 sm:$0xff]  }
 0x1f6   :  { %1119 = vmatprep.subr.bf16.mxu0 %v4588_v1  ;;  %v4645_v1 = vld [vmem:[#allocation11 + $0x2b4] ss:$8 sps:$4 sm:$0xff]  }
 0x1f9   :  { %1120 = vmatpush1.bf16.msra.mxu0 %v4586_v3  ;;  %v4643_v3 = vld [vmem:[#allocation11 + $0x2b0] ss:$8 sps:$4 sm:$0xff]  }
 0x1fa   :  { %1121 = vmatprep.subr.bf16.mxu0 %v4591_v4  ;;  %v4648_v4 = vld [vmem:[#allocation11 + $0x2c4] ss:$8 sps:$4 sm:$0xff]  }
 0x1fd   :  { %1122 = vmatpush1.bf16.msra.mxu0 %v4589_v6  ;;  %v4646_v6 = vld [vmem:[#allocation11 + $0x2c0] ss:$8 sps:$4 sm:$0xff]  }
 0x1fe   :  { %1123 = vmatprep.subr.bf16.mxu0 %v4594_v7  ;;  %v4651_v7 = vld [vmem:[#allocation11 + $0x2d4] ss:$8 sps:$4 sm:$0xff]  }
 0x201   :  { %1124 = vmatpush1.bf16.msra.mxu0 %v4592_v9  ;;  %v4649_v9 = vld [vmem:[#allocation11 + $0x2d0] ss:$8 sps:$4 sm:$0xff]  }
 0x202   :  { %1125 = vmatprep.subr.bf16.mxu0 %v4597_v10  ;;  %v4654_v10 = vld [vmem:[#allocation11 + $0x2e4] ss:$8 sps:$4 sm:$0xff]  }
 0x205   :  { %1126 = vmatpush1.bf16.msra.mxu0 %v4595_v13  ;;  %v4652_v13 = vld [vmem:[#allocation11 + $0x2e0] ss:$8 sps:$4 sm:$0xff]  }
 0x206   :  { %1127 = vmatprep.subr.bf16.mxu0 %v4600_v14  ;;  %v4657_v14 = vld [vmem:[#allocation11 + $0x2f4] ss:$8 sps:$4 sm:$0xff]  }
 0x209   :  { %1128 = vmatpush1.bf16.msra.mxu0 %v4598_v16  ;;  %v4655_v16 = vld [vmem:[#allocation11 + $0x2f0] ss:$8 sps:$4 sm:$0xff]  }
 0x20a   :  { %1129 = vmatprep.subr.bf16.mxu0 %v4603_v17  ;;  %v4660_v17 = vld [vmem:[#allocation11 + $0x304] ss:$8 sps:$4 sm:$0xff]  }
 0x20d   :  { %1130 = vmatpush1.bf16.msra.mxu0 %v4601_v18  ;;  %v4658_v18 = vld [vmem:[#allocation11 + $0x300] ss:$8 sps:$4 sm:$0xff]  }
 0x20e   :  { %1131 = vmatprep.subr.bf16.mxu0 %v4606_v20  ;;  %v290_v20 = vpack.c.bf16 %v5344_v5, %v5344_v5 }
 0x211   :  { %1132 = vmatpush1.bf16.msra.mxu0 %v4604_v21  ;;  %v4663_v21 = vld [vmem:[#allocation11 + $0x314] ss:$8 sps:$4 sm:$0xff]  }
 0x212   :  { %1133 = vmatprep.subr.bf16.mxu0 %v4609_v22  ;;  %v293_v22 = vpack.c.bf16 %v5346_v2, %v5346_v2 }
 0x215   :  { %1134 = vmatpush1.bf16.msra.mxu0 %v4607_v24  ;;  %v4661_v24 = vld [vmem:[#allocation11 + $0x310] ss:$8 sps:$4 sm:$0xff]  }
 0x216   :  { %1144 = vmatprep.subr.bf16.mxu0 %v4612_v26  ;;  %v4666_v26 = vld [vmem:[#allocation11 + $0x324] ss:$8 sps:$4 sm:$0xff]  }
 0x218   :  { %1136 = vmatmul.mubr.bf16.vlgmr.msra.gmra.mrb[0].mxu0 %v288_v29  ;;  %v4669_v29 = vld [vmem:[#allocation11 + $0x334] ss:$8 sps:$4 sm:$0xff]  }
 0x219   :  { %1145 = vmatpush1.bf16.msra.mxu0 %v4610_v28  ;;  %1176 = vmatprep.mubr.bf16.mxu0 %v291_v30  ;;  %v4664_v28 = vld [vmem:[#allocation11 + $0x320] ss:$8 sps:$4 sm:$0xff]   ;;  %v4672_v30 = vld [vmem:[#allocation11 + $0x344] ss:$8 sps:$4 sm:$0xff]  }
 0x21a   :  { %1146 = vmatprep.subr.bf16.mxu0 %v4615_v55  ;;  %v4667_v55 = vld [vmem:[#allocation11 + $0x330] ss:$8 sps:$4 sm:$0xff]  }
 0x21d   :  { %1147 = vmatpush1.bf16.msra.mxu0 %v4613_v54  ;;  %v4670_v54 = vld [vmem:[#allocation11 + $0x340] ss:$8 sps:$4 sm:$0xff]  }
 0x21e   :  { %1148 = vmatprep.subr.bf16.mxu0 %v4618_v33  ;;  %v4675_v33 = vld [vmem:[#allocation11 + $0x354] ss:$8 sps:$4 sm:$0xff]  }
 0x221   :  { %1149 = vmatpush1.bf16.msra.mxu0 %v4616_v34  ;;  %v4673_v34 = vld [vmem:[#allocation11 + $0x350] ss:$8 sps:$4 sm:$0xff]  }
 0x222   :  { %1150 = vmatprep.subr.bf16.mxu0 %v4621_v35  ;;  %v4678_v35 = vld [vmem:[#allocation11 + $0x364] ss:$8 sps:$4 sm:$0xff]  }
 0x225   :  { %1151 = vmatpush1.bf16.msra.mxu0 %v4619_v36  ;;  %v4676_v36 = vld [vmem:[#allocation11 + $0x360] ss:$8 sps:$4 sm:$0xff]  }
 0x226   :  { %1152 = vmatprep.subr.bf16.mxu0 %v4624_v37  ;;  %v4681_v37 = vld [vmem:[#allocation11 + $0x374] ss:$8 sps:$4 sm:$0xff]  }
 0x229   :  { %1153 = vmatpush1.bf16.msra.mxu0 %v4622_v42  ;;  %v4679_v42 = vld [vmem:[#allocation11 + $0x370] ss:$8 sps:$4 sm:$0xff]  }
 0x22a   :  { %1154 = vmatprep.subr.bf16.mxu0 %v4627_v47  ;;  %v4684_v47 = vld [vmem:[#allocation11 + $0x384] ss:$8 sps:$4 sm:$0xff]  }
 0x22d   :  { %1155 = vmatpush1.bf16.msra.mxu0 %v4625_v48  ;;  %v4682_v48 = vld [vmem:[#allocation11 + $0x380] ss:$8 sps:$4 sm:$0xff]  }
 0x22e   :  { %1156 = vmatprep.subr.bf16.mxu0 %v4630_v49  ;;  %v4687_v49 = vld [vmem:[#allocation11 + $0x394] ss:$8 sps:$4 sm:$0xff]  }
 0x231   :  { %1157 = vmatpush1.bf16.msra.mxu0 %v4628_v50  ;;  %v4685_v50 = vld [vmem:[#allocation11 + $0x390] ss:$8 sps:$4 sm:$0xff]  }
 0x232   :  { %1158 = vmatprep.subr.bf16.mxu0 %v4633_v51  ;;  %v4690_v51 = vld [vmem:[#allocation11 + $0x3a4] ss:$8 sps:$4 sm:$0xff]  }
 0x235   :  { %1159 = vmatpush1.bf16.msra.mxu0 %v4631_v52  ;;  %v4688_v52 = vld [vmem:[#allocation11 + $0x3a0] ss:$8 sps:$4 sm:$0xff]  }
 0x236   :  { %1160 = vmatprep.subr.bf16.mxu0 %v4636_v53  ;;  %v4693_v53 = vld [vmem:[#allocation11 + $0x3b4] ss:$8 sps:$4 sm:$0xff]  }
 0x239   :  { %1161 = vmatpush1.bf16.msra.mxu0 %v4634_v58  ;;  %v4691_v58 = vld [vmem:[#allocation11 + $0x3b0] ss:$8 sps:$4 sm:$0xff]  }
 0x23a   :  { %1162 = vmatprep.subr.bf16.mxu0 %v4639_v59  ;;  %v4696_v59 = vld [vmem:[#allocation11 + $0x3c4] ss:$8 sps:$4 sm:$0xff]  }
 0x23d   :  { %1163 = vmatpush1.bf16.msra.mxu0 %v4637_v61  ;;  %v4694_v61 = vld [vmem:[#allocation11 + $0x3c0] ss:$8 sps:$4 sm:$0xff]  }
 0x23e   :  { %1164 = vmatprep.subr.bf16.mxu0 %v4642_v62  ;;  %v4699_v62 = vld [vmem:[#allocation11 + $0x3d4] ss:$8 sps:$4 sm:$0xff]  }
 0x241   :  { %1165 = vmatpush1.bf16.msra.mxu0 %v4640_v0  ;;  %v4697_v0 = vld [vmem:[#allocation11 + $0x3d0] ss:$8 sps:$4 sm:$0xff]  }
 0x242   :  { %1166 = vmatprep.subr.bf16.mxu0 %v4645_v1  ;;  %v4702_v1 = vld [vmem:[#allocation11 + $0x3e4] ss:$8 sps:$4 sm:$0xff]  }
 0x245   :  { %1167 = vmatpush1.bf16.msra.mxu0 %v4643_v3  ;;  %v4700_v3 = vld [vmem:[#allocation11 + $0x3e0] ss:$8 sps:$4 sm:$0xff]  }
 0x246   :  { %1168 = vmatprep.subr.bf16.mxu0 %v4648_v4  ;;  %v4705_v4 = vld [vmem:[#allocation11 + $0x3f4] ss:$8 sps:$4 sm:$0xff]  }
 0x249   :  { %1169 = vmatpush1.bf16.msra.mxu0 %v4646_v6  ;;  %v4703_v6 = vld [vmem:[#allocation11 + $0x3f0] ss:$8 sps:$4 sm:$0xff]  }
 0x24a   :  { %1170 = vmatprep.subr.bf16.mxu0 %v4651_v7  ;;  %v292_v7 = vpack.c.bf16 %v5348_v32, %v5348_v32 }
 0x24d   :  { %1171 = vmatpush1.bf16.msra.mxu0 %v4649_v9 }
 0x24e   :  { %1172 = vmatprep.subr.bf16.mxu0 %v4654_v10 }
 0x251   :  { %1173 = vmatpush1.bf16.msra.mxu0 %v4652_v13 }
 0x252   :  { %1174 = vmatprep.subr.bf16.mxu0 %v4657_v14 }
 0x255   :  { %1175 = vmatpush1.bf16.msra.mxu0 %v4655_v16 }
 0x256   :  { %1185 = vmatprep.subr.bf16.mxu0 %v4660_v17 }
 0x258   :  { %1177 = vmatmul.mubr.bf16.vlgmr.msra.gmra.mrb[0].mxu0 %v290_v20 }
 0x259   :  { %1186 = vmatpush1.bf16.msra.mxu0 %v4658_v18  ;;  %1217 = vmatprep.mubr.bf16.mxu0 %v293_v22 }
 0x25a   :  { %1187 = vmatprep.subr.bf16.mxu0 %v4663_v21 }
 0x25d   :  { %1188 = vmatpush1.bf16.msra.mxu0 %v4661_v24 }
 0x25e   :  { %1189 = vmatprep.subr.bf16.mxu0 %v4666_v26 }
 0x261   :  { %1190 = vmatpush1.bf16.msra.mxu0 %v4664_v28 }
 0x262   :  { %1191 = vmatprep.subr.bf16.mxu0 %v4669_v29 }
 0x265   :  { %1192 = vmatpush1.bf16.msra.mxu0 %v4667_v55 }
 0x266   :  { %1193 = vmatprep.subr.bf16.mxu0 %v4672_v30 }
 0x269   :  { %1194 = vmatpush1.bf16.msra.mxu0 %v4670_v54 }
 0x26a   :  { %1195 = vmatprep.subr.bf16.mxu0 %v4675_v33 }
 0x26d   :  { %1196 = vmatpush1.bf16.msra.mxu0 %v4673_v34 }
 0x26e   :  { %1197 = vmatprep.subr.bf16.mxu0 %v4678_v35 }
 0x271   :  { %1198 = vmatpush1.bf16.msra.mxu0 %v4676_v36 }
 0x272   :  { %1199 = vmatprep.subr.bf16.mxu0 %v4681_v37 }
 0x275   :  { %1200 = vmatpush1.bf16.msra.mxu0 %v4679_v42 }
 0x276   :  { %1201 = vmatprep.subr.bf16.mxu0 %v4684_v47 }
 0x279   :  { %1202 = vmatpush1.bf16.msra.mxu0 %v4682_v48 }
 0x27a   :  { %1203 = vmatprep.subr.bf16.mxu0 %v4687_v49 }
 0x27d   :  { %1204 = vmatpush1.bf16.msra.mxu0 %v4685_v50 }
 0x27e   :  { %1205 = vmatprep.subr.bf16.mxu0 %v4690_v51 }
 0x281   :  { %1206 = vmatpush1.bf16.msra.mxu0 %v4688_v52 }
 0x282   :  { %1207 = vmatprep.subr.bf16.mxu0 %v4693_v53 }
 0x285   :  { %1208 = vmatpush1.bf16.msra.mxu0 %v4691_v58 }
 0x286   :  { %1209 = vmatprep.subr.bf16.mxu0 %v4696_v59 }
 0x289   :  { %1210 = vmatpush1.bf16.msra.mxu0 %v4694_v61 }
 0x28a   :  { %1211 = vmatprep.subr.bf16.mxu0 %v4699_v62 }
 0x28d   :  { %1212 = vmatpush1.bf16.msra.mxu0 %v4697_v0  ;;  %v1318_v0 = vstv %s5366_s6  ;;  %s5628_s6 = sld [smem:[#allocation14 + $0x1b]] }
 0x28e   :  { %1213 = vmatprep.subr.bf16.mxu0 %v4702_v1  ;;  %v1325_v1 = vstv %s5368_s9  ;;  %s5630_s9 = sld [smem:[#allocation14 + $0x36]] }
 0x291   :  { %1214 = vmatpush1.bf16.msra.mxu0 %v4700_v3  ;;  %v1321_v3 = vstv %s5374_s13  ;;  %s5636_s13 = sld [smem:[#allocation14 + $0x1e]] }
 0x292   :  { %1215 = vmatprep.subr.bf16.mxu0 %v4705_v4  ;;  %v1331_v4 = vstv %s5370_s11  ;;  %s5632_s11 = sld [smem:[#allocation14 + $0x1c]] }
 0x293   :  { %7805 = sst [smem:[#allocation31_spill]] %s5628_s6 }
 0x294   :  { %7806 = sst [smem:[#allocation32_spill]] %s5630_s9 }
 0x295   :  { %1216 = vmatpush1.bf16.msra.mxu0 %v4703_v6  ;;  %v1337_v6 = vstv %s5372_s12  ;;  %s5634_s12 = sld [smem:[#allocation14 + $0x1d]]  ;;  %s5782_s9 = sld [smem:[#allocation14 + $0x4a]] }
 0x296   :  { %s7897_s8 = sld [smem:[#allocation32_spill]] }
 0x297   :  { %7809 = sst [smem:[#allocation35_spill]] %s5636_s13 }
 0x298   :  { %1218 = vmatmul.mubr.bf16.vlgmr.msra.gmra.mrb[0].mxu0 %v292_v7  ;;  %v1344_v7 = vstv %s5378_s15  ;;  %7807 = sst [smem:[#allocation33_spill]] %s5632_s11  ;;  %s5640_s15 = sld [smem:[#allocation14 + $0x37]] }
 0x299   :  { %s5776_s11 = sld [smem:[#allocation14 + $0x49]] }
 0x29b   :  { %7808 = sst [smem:[#allocation34_spill]] %s5634_s12  ;;  %s5985_s12 = sld [smem:[#allocation14 + $0x56]] }
 0x29c   :  { %7853 = sst [smem:[#allocation70_spill]] %s5782_s9 }
 0x29d   :  { %s7881_s9 = sld [smem:[#allocation22_spill]] }
 0x29e   :  { %7811 = sst [smem:[#allocation37_spill]] %s5640_s15  ;;  %s5789_s15 = sld [smem:[#allocation14 + $0x5e]] }
 0x29f   :  { %7850 = sst [smem:[#allocation69_spill]] %s5776_s11  ;;  %s7884_s11 = sld [smem:[#allocation30_spill]] }
 0x2a4   :  { %7856 = sst [smem:[#allocation71_spill]] %s5789_s15 }
 0x36b   :  { %v1219_v9 = vpop.f32.mrb[0].mxu0 }
 0x36c   :  { %v1226_v10 = vrot.slane %v1219_v9, 4  ;;  %v1221_v13 = vpop.f32.mrb[1].mxu0 }
 0x36d   :  { %v1232_v14 = vrot.slane %v1221_v13, 4  ;;  %v1223_v16 = vpop.f32.mrb[2].mxu0 }
 0x36e   :  { %v1227_v17 = vmax.f32 %v1219_v9, %v1226_v10  ;;  %v1224_v18 = vpop.f32.mrb[3].mxu0  ;;  %v1347_v10 = vstv %s5376_s14  ;;  %v1363_v16 = vstv %s5384_s10  ;;  %s5638_s14 = sld [smem:[#allocation14 + $0x1f]]  ;;  %s5646_s10 = sld [smem:[#allocation14 + $0x22]] }
 0x36f   :  { %v1233_v20 = vmax.f32 %v1221_v13, %v1232_v14  ;;  %v1357_v14 = vstv %s5382_s2  ;;  %s5644_s2 = sld [smem:[#allocation14 + $0x21]] }
 0x370   :  { %v1228_v21 = vrot.slane %v1227_v17, 2 }
 0x371   :  { %v1234_v22 = vrot.slane %v1233_v20, 2 }
 0x372   :  { %v1229_v24 = vmax.f32 %v1227_v17, %v1228_v21  ;;  %v1377_v21 = vstv %s5388_s3  ;;  %s5650_s3 = sld [smem:[#allocation14 + $0x38]] }
 0x373   :  { %v1235_v26 = vmax.f32 %v1233_v20, %v1234_v22  ;;  %v1370_v20 = vstv %s5386_s17  ;;  %v1383_v22 = vstv %s5392_s18  ;;  %s5648_s17 = sld [smem:[#allocation14 + $0x23]]  ;;  %s5654_s18 = sld [smem:[#allocation14 + $0x25]] }
 0x374   :  { %v1230_v28 = vrot.slane %v1229_v24, 1  ;;  %7810 = sst [smem:[#allocation36_spill]] %s5638_s14  ;;  %s5784_s14 = sld [smem:[#allocation14 + $0x4b]] }
 0x375   :  { %v1236_v29 = vrot.slane %v1235_v26, 1  ;;  %7813 = sst [smem:[#allocation39_spill]] %s5644_s2 }
 0x376   :  { %v1231_v55 = vmax.f32 %v1229_v24, %v1230_v28  ;;  %v1389_v28 = vstv %s5394_s19  ;;  %7814 = sst [smem:[#allocation40_spill]] %s5646_s10  ;;  %s5656_s19 = sld [smem:[#allocation14 + $0x26]] }
 0x377   :  { %v1237_v30 = vmax.f32 %v1235_v26, %v1236_v29  ;;  %v1373_v26 = vstv %s5390_s30  ;;  %v1396_v29 = vstv %s5396_s20  ;;  %s5652_s30 = sld [smem:[#allocation14 + $0x24]]  ;;  %s5658_s20 = sld [smem:[#allocation14 + $0x27]] }
 0x378   :  { %v1238_v54 = vsub.f32 %v1219_v9, %v1231_v55  ;;  %7816 = sst [smem:[#allocation42_spill]] %s5650_s3  ;;  %s5672_s3 = sld [smem:[#allocation14 + $0x2d]] }
 0x379   :  { %v1239_v33 = vsub.f32 %v1221_v13, %v1237_v30  ;;  %v1351_v13 = vstv %s5380_s16  ;;  %s5642_s16 = sld [smem:[#allocation14 + $0x20]]  ;;  %7815 = sst [smem:[#allocation41_spill]] %s5648_s17 }
 0x37a   :  { %v1240_v34 = vmul.f32 1.442695, %v1238_v54  ;;  %7818 = sst [smem:[#allocation44_spill]] %s5654_s18  ;;  %s5670_s17 = sld [smem:[#allocation14 + $0x2c]] }
 0x37b   :  { %v1242_v35 = vmul.f32 1.442695, %v1239_v33  ;;  %s5701_s18 = sld [smem:[#allocation14 + $0x33]]  ;;  %s5791_s10 = sld [smem:[#allocation14 + $0x4c]] }
 0x37c   :  { %4900 = vpow2.f32 %v1240_v34  ;;  %7819 = sst [smem:[#allocation45_spill]] %s5656_s19 }
 0x37d   :  { %4902 = vpow2.f32 %v1242_v35  ;;  %7817 = sst [smem:[#allocation43_spill]] %s5652_s30  ;;  %s5699_s30 = sld [smem:[#allocation14 + $0x32]] }
 0x37e   :  { %7820 = sst [smem:[#allocation46_spill]] %s5658_s20  ;;  %s5679_s20 = sld [smem:[#allocation14 + $0x3a]] }
 0x37f   :  { %7812 = sst [smem:[#allocation38_spill]] %s5642_s16  ;;  %s5797_s16 = sld [smem:[#allocation14 + $0x4d]] }
 0x380   :  { %7826 = sst [smem:[#allocation52_spill]] %s5670_s17  ;;  %s5691_s17 = sld [smem:[#allocation14 + $0x31]] }
 0x381   :  { %7827 = sst [smem:[#allocation53_spill]] %s5672_s3  ;;  %s5947_s3 = sld [smem:[#allocation14 + $0x51]] }
 0x382   :  { %7832 = sst [smem:[#allocation58_spill]] %s5701_s18  ;;  %s5723_s18 = sld [smem:[#allocation14 + $0x3e]] }
 0x383   :  { %7831 = sst [smem:[#allocation57_spill]] %s5699_s30  ;;  %s5746_s30 = sld [smem:[#allocation14 + $0x42]] }
 0x384   :  { %7857 = sst [smem:[#allocation72_spill]] %s5791_s10  ;;  %s7859_s7 = sld [smem:[#allocation57_spill]] }
 0x385   :  { %s7860_s2 = sld [smem:[#allocation58_spill]] }
 0x386   :  { %v4901_v36 = vpop.eup %4900  ;;  %7830 = sst [smem:[#allocation56_spill]] %s5691_s17  ;;  %s5713_s17 = sld [smem:[#allocation14 + $0x3d]] }
 0x387   :  { %v4903_v37 = vpop.eup %4902  ;;  %v1244_v42 = vrot.slane %v4901_v36, 4  ;;  %7868 = sst [smem:[#allocation58_spill]] %s5805_s27  ;;  %s7891_s27 = sld [smem:[#allocation33_spill]] }
 0x388   :  { %v1250_v47 = vrot.slane %v4903_v37, 4  ;;  %7835 = sst [smem:[#allocation61_spill]] %s5723_s18  ;;  %s5737_s18 = sld [smem:[#allocation14 + $0x40]] }
 0x389   :  { %v1245_v48 = vadd.f32 %v4901_v36, %v1244_v42  ;;  %s7865_s15 = sld [smem:[#allocation61_spill]] }
 0x38a   :  { %v1251_v49 = vadd.f32 %v4903_v37, %v1250_v47 }
 0x38b   :  { %v1246_v50 = vrot.slane %v1245_v48, 2 }
 0x38c   :  { %v1252_v51 = vrot.slane %v1251_v49, 2  ;;  %7834 = sst [smem:[#allocation60_spill]] %s5713_s17  ;;  %s5735_s17 = sld [smem:[#allocation14 + $0x5c]] }
 0x38d   :  { %v1247_v52 = vadd.f32 %v1246_v50, %v1245_v48  ;;  %s7864_s19 = sld [smem:[#allocation60_spill]] }
 0x38e   :  { %v1253_v53 = vadd.f32 %v1252_v51, %v1251_v49  ;;  %7837 = sst [smem:[#allocation63_spill]] %s5737_s18  ;;  %s5752_s18 = sld [smem:[#allocation14 + $0x43]] }
 0x38f   :  { %v1248_v58 = vrot.slane %v1247_v52, 1  ;;  %s7867_s6 = sld [smem:[#allocation63_spill]]  ;;  %7892 = sst [smem:[#allocation60_spill]] %s5949_s29 }
 0x390   :  { %v1254_v59 = vrot.slane %v1253_v53, 1  ;;  %s7931_s29 = sld [smem:[#allocation45_spill]] }
 0x391   :  { %v1249_v61 = vadd.f32 %v1248_v58, %v1247_v52 }
 0x392   :  { %v1255_v62 = vadd.f32 %v1254_v59, %v1253_v53 }
 0x393   :  { %4904 = vrcp.f32 %v1249_v61 }
 0x394   :  { %4906 = vrcp.f32 %v1255_v62  ;;  %7838 = sst [smem:[#allocation64_spill]] %s5752_s18  ;;  %s5769_s18 = sld [smem:[#allocation14 + $0x47]] }
 0x39a   :  { %7845 = sst [smem:[#allocation67_spill]] %s5769_s18  ;;  %s7854_s18 = sld [smem:[#allocation52_spill]] }
 0x39b   :  { %7855 = sst [smem:[#allocation52_spill]] %s5784_s14  ;;  %s7873_s13 = sld [smem:[#allocation67_spill]] }
 0x39d   :  { %v4905_v9 = vpop.eup %4904 }
 0x39e   :  { %v4907_v17 = vpop.eup %4906  ;;  %v1258_v18 = vmul.f32 %v4905_v9, %v4901_v36 }
 0x39f   :  { %v1259_v24 = vmul.f32 %v4907_v17, %v4903_v37 }
 0x3a0   :  { %v1260_v55 = vmul.f32 %v1258_v18, %v5336_v57  ;;  %v1274_v30 = vmul.f32 %v1258_v18, %v5340_v63  ;;  %v1288_v54 = vmul.f32 %v1258_v18, %v5344_v5  ;;  %v1302_v33 = vmul.f32 %v1258_v18, %v5348_v32 }
 0x3a1   :  { %v1261_v34 = vmul.f32 %v1259_v24, %v5334_v31  ;;  %v1275_v35 = vmul.f32 %v1259_v24, %v5338_v56  ;;  %v1289_v36 = vmul.f32 %v1259_v24, %v5342_v60  ;;  %v1303_v42 = vmul.f32 %v1259_v24, %v5346_v2 }
 0x3a2   :  { %v1262_v37 = vrot.slane %v1260_v55, 4  ;;  %v1276_v47 = vrot.slane %v1274_v30, 4  ;;  %v1290_v48 = vrot.slane %v1288_v54, 4  ;;  %v1304_v49 = vrot.slane %v1302_v33, 4 }
 0x3a3   :  { %v1268_v50 = vrot.slane %v1261_v34, 4  ;;  %v1282_v57 = vrot.slane %v1275_v35, 4  ;;  %v1296_v51 = vrot.slane %v1289_v36, 4  ;;  %v1310_v63 = vrot.slane %v1303_v42, 4 }
 0x3a4   :  { %v1263_v52 = vadd.f32 %v1262_v37, %v1260_v55  ;;  %v1277_v5 = vadd.f32 %v1276_v47, %v1274_v30  ;;  %v1291_v53 = vadd.f32 %v1290_v48, %v1288_v54  ;;  %v1305_v32 = vadd.f32 %v1304_v49, %v1302_v33 }
 0x3a5   :  { %v1269_v31 = vadd.f32 %v1268_v50, %v1261_v34  ;;  %v1283_v56 = vadd.f32 %v1282_v57, %v1275_v35  ;;  %v1297_v58 = vadd.f32 %v1296_v51, %v1289_v36  ;;  %v1311_v60 = vadd.f32 %v1310_v63, %v1303_v42 }
 0x3a6   :  { %v1264_v2 = vrot.slane %v1263_v52, 2  ;;  %v1278_v59 = vrot.slane %v1277_v5, 2  ;;  %v1292_v61 = vrot.slane %v1291_v53, 2  ;;  %v1306_v62 = vrot.slane %v1305_v32, 2 }
 0x3a7   :  { %v1270_v9 = vrot.slane %v1269_v31, 2  ;;  %v1284_v17 = vrot.slane %v1283_v56, 2  ;;  %v1298_v18 = vrot.slane %v1297_v58, 2  ;;  %v1312_v24 = vrot.slane %v1311_v60, 2 }
 0x3a8   :  { %v1265_v55 = vadd.f32 %v1264_v2, %v1263_v52  ;;  %v1279_v30 = vadd.f32 %v1278_v59, %v1277_v5  ;;  %v1293_v54 = vadd.f32 %v1292_v61, %v1291_v53  ;;  %v1307_v33 = vadd.f32 %v1306_v62, %v1305_v32 }
 0x3a9   :  { %v1271_v34 = vadd.f32 %v1270_v9, %v1269_v31  ;;  %v1285_v35 = vadd.f32 %v1284_v17, %v1283_v56  ;;  %v1299_v36 = vadd.f32 %v1298_v18, %v1297_v58  ;;  %v1313_v42 = vadd.f32 %v1312_v24, %v1311_v60 }
 0x3aa   :  { %v1266_v37 = vrot.slane %v1265_v55, 1  ;;  %v1280_v47 = vrot.slane %v1279_v30, 1  ;;  %v1294_v48 = vrot.slane %v1293_v54, 1  ;;  %v1308_v49 = vrot.slane %v1307_v33, 1 }
 0x3ab   :  { %v1272_v50 = vrot.slane %v1271_v34, 1  ;;  %v1286_v57 = vrot.slane %v1285_v35, 1  ;;  %v1300_v51 = vrot.slane %v1299_v36, 1  ;;  %v1314_v63 = vrot.slane %v1313_v42, 1 }
 0x3ac   :  { %v1267_v52 = vadd.f32 %v1266_v37, %v1265_v55  ;;  %v1281_v5 = vadd.f32 %v1280_v47, %v1279_v30  ;;  %v5430_v53 = vadd.f32 %v1294_v48, %v1293_v54  ;;  %v1403_v32 = vstv %s5422_s21  ;;  %s5660_s21 = sld [smem:[#allocation14 + $0x28]] }
 0x3ad   :  { %v1273_v31 = vadd.f32 %v1272_v50, %v1271_v34  ;;  %v1287_v56 = vadd.f32 %v1286_v57, %v1285_v35  ;;  %v5433_v58 = vadd.f32 %v1300_v51, %v1299_v36  ;;  %v1409_v60 = vstv %s5426_s23  ;;  %s5664_s23 = sld [smem:[#allocation14 + $0x29]] }
 0x3ae   :  { %v5436_v2 = vadd.f32 %v1308_v49, %v1307_v33  ;;  %v1319_v59 = vmul.f32 %v1318_v0, %v1267_v52  ;;  %v1399_v61 = vstv %s5424_s22  ;;  %v1415_v62 = vstv %s5428_s24  ;;  %s5662_s22 = sld [smem:[#allocation14 + $0x39]]  ;;  %s5666_s24 = sld [smem:[#allocation14 + $0x2a]] }
 0x3af   :  { %v5442_v9 = vadd.f32 %v1314_v63, %v1313_v42  ;;  %v1320_v17 = vmul.f32 %v1318_v0, %v1273_v31  ;;  %v1326_v18 = vmul.f32 %v1325_v1, %v1281_v5  ;;  %v1332_v24 = vmul.f32 %v1331_v4, %v5430_v53 }
 0x3b0   :  { %v1322_v55 = vadd.f32 %v1321_v3, %v1319_v59  ;;  %v1327_v30 = vmul.f32 %v1325_v1, %v1287_v56  ;;  %v1345_v54 = vmul.f32 %v1344_v7, %v1267_v52  ;;  %v1346_v33 = vmul.f32 %v1344_v7, %v1273_v31 }
 0x3b1   :  { %v1323_v34 = vadd.f32 %v1321_v3, %v1320_v17  ;;  %v1333_v0 = vmul.f32 %v1331_v4, %v5433_v58  ;;  %v1352_v35 = vmul.f32 %v1351_v13, %v1281_v5  ;;  %v1353_v36 = vmul.f32 %v1351_v13, %v1287_v56 }
 0x3b2   :  { %v1328_v42 = vadd.f32 %v1326_v18, %v1322_v55  ;;  %v1348_v1 = vadd.f32 %v1347_v10, %v1345_v54  ;;  %v1349_v7 = vadd.f32 %v1347_v10, %v1346_v33  ;;  %v1358_v3 = vmul.f32 %v1357_v14, %v5430_v53  ;;  %7821 = sst [smem:[#allocation47_spill]] %s5660_s21  ;;  %s5681_s21 = sld [smem:[#allocation14 + $0x2e]] }
 0x3b3   :  { %v1329_v37 = vadd.f32 %v1327_v30, %v1323_v34  ;;  %v1359_v4 = vmul.f32 %v1357_v14, %v5433_v58  ;;  %v1371_v47 = vmul.f32 %v1370_v20, %v1267_v52  ;;  %v1372_v13 = vmul.f32 %v1370_v20, %v1273_v31  ;;  %7823 = sst [smem:[#allocation49_spill]] %s5664_s23  ;;  %s5685_s23 = sld [smem:[#allocation14 + $0x30]] }
 0x3b4   :  { %v1334_v48 = vadd.f32 %v1332_v24, %v1328_v42  ;;  %v1354_v49 = vadd.f32 %v1352_v35, %v1348_v1  ;;  %v1355_v50 = vadd.f32 %v1353_v36, %v1349_v7  ;;  %v1378_v57 = vmul.f32 %v1377_v21, %v1281_v5  ;;  %7822 = sst [smem:[#allocation48_spill]] %s5662_s22  ;;  %s5683_s22 = sld [smem:[#allocation14 + $0x2f]] }
 0x3b5   :  { %v1335_v10 = vadd.f32 %v1333_v0, %v1329_v37  ;;  %v1374_v51 = vadd.f32 %v1373_v26, %v1371_v47  ;;  %v1375_v63 = vadd.f32 %v1373_v26, %v1372_v13  ;;  %v1379_v14 = vmul.f32 %v1377_v21, %v1287_v56  ;;  %7824 = sst [smem:[#allocation50_spill]] %s5666_s24 }
 0x3b6   :  { %v1338_v20 = vmul.f32 %v1337_v6, %v5436_v2  ;;  %v1339_v59 = vmul.f32 %v1337_v6, %v5442_v9  ;;  %v1360_v17 = vadd.f32 %v1358_v3, %v1354_v49  ;;  %v1361_v18 = vadd.f32 %v1359_v4, %v1355_v50 }
 0x3b7   :  { %v1364_v24 = vmul.f32 %v1363_v16, %v5436_v2  ;;  %v1380_v55 = vadd.f32 %v1378_v57, %v1374_v51  ;;  %v1381_v30 = vadd.f32 %v1379_v14, %v1375_v63  ;;  %v1384_v26 = vmul.f32 %v1383_v22, %v5430_v53 }
 0x3b8   :  { %v1340_v21 = vadd.f32 %v1338_v20, %v1334_v48  ;;  %v1341_v54 = vadd.f32 %v1339_v59, %v1335_v10  ;;  %v1365_v33 = vmul.f32 %v1363_v16, %v5442_v9  ;;  %v1385_v6 = vmul.f32 %v1383_v22, %v5433_v58  ;;  %7828 = sst [smem:[#allocation54_spill]] %s5681_s21  ;;  %s7883_s21 = sld [smem:[#allocation29_spill]] }
 0x3b9   :  { %v1366_v34 = vadd.f32 %v1364_v24, %v1360_v17  ;;  %v1386_v0 = vadd.f32 %v1384_v26, %v1380_v55  ;;  %v1397_v35 = vmul.f32 %v1396_v29, %v1267_v52  ;;  %v1398_v36 = vmul.f32 %v1396_v29, %v1273_v31 }
 0x3ba   :  { %v1367_v42 = vadd.f32 %v1365_v33, %v1361_v18  ;;  %v1387_v1 = vadd.f32 %v1385_v6, %v1381_v30  ;;  %v1390_v7 = vmul.f32 %v1389_v28, %v5436_v2  ;;  %v1391_v3 = vmul.f32 %v1389_v28, %v5442_v9 }
 0x3bb   :  { %v1400_v37 = vadd.f32 %v1399_v61, %v1397_v35  ;;  %v1401_v16 = vadd.f32 %v1399_v61, %v1398_v36  ;;  %v1404_v4 = vmul.f32 %v1403_v32, %v1281_v5  ;;  %v1405_v22 = vmul.f32 %v1403_v32, %v1287_v56 }
 0x3bc   :  { %v1392_v47 = vadd.f32 %v1390_v7, %v1386_v0  ;;  %v1410_v52 = vmul.f32 %v1409_v60, %v5430_v53  ;;  %v1423_v29 = vrot.slane %v1340_v21, %v5294_v38  ;;  %v1427_v31 = vrot.slane %v1341_v54, %v5294_v38 }
 0x3bd   :  { %v1406_v13 = vadd.f32 %v1404_v4, %v1400_v37  ;;  %v1407_v48 = vadd.f32 %v1405_v22, %v1401_v16  ;;  %v1411_v49 = vmul.f32 %v1409_v60, %v5433_v58  ;;  %v1431_v28 = vrot.slane %v1366_v34, %v5294_v38 }
 0x3be   :  { %v1393_v61 = vadd.f32 %v1391_v3, %v1387_v1  ;;  %v1435_v5 = vrot.slane %v1367_v42, %v5294_v38  ;;  %v5529_v32 = vadd.f32 %v1423_v29, %v5230_v8  ;;  %v5532_v56 = vadd.f32 %v1427_v31, %v5232_v11 }
 0x3bf   :  { %v1412_v53 = vadd.f32 %v1410_v52, %v1406_v13  ;;  %v1413_v50 = vadd.f32 %v1411_v49, %v1407_v48  ;;  %v1416_v57 = vmul.f32 %v1415_v62, %v5436_v2  ;;  %v1417_v10 = vmul.f32 %v1415_v62, %v5442_v9  ;;  %v5677_v13 = vld [vmem:[%s7601_s5] ss:$2 sm:$0xff]  ;;  %s5711_s5 = sld [smem:[#allocation14 + $0x3c]] }
 0x3c0   :  { %v1439_v58 = vrot.slane %v1392_v47, %v5294_v38  ;;  %v5542_v60 = vadd.f32 %v1431_v28, %v5234_v12  ;;  %v1460_v8 = vadd.f32 %v5532_v56, %v5529_v32  ;;  %v1443_v11 = vrot.slane %v1393_v61, %v5294_v38  ;;  %v5687_v48 = vld [vmem:[#allocation12] ss:$2 sm:$0xff] }
 0x3c1   :  { %v1418_v51 = vadd.f32 %v1416_v57, %v1412_v53  ;;  %v1419_v63 = vadd.f32 %v1417_v10, %v1413_v50  ;;  %v5548_v14 = vadd.f32 %v1435_v5, %v5236_v15  ;;  %v1511_v49 = vrot.slane %v5677_v13, %v5294_v38 }
 0x3c2   :  { %v1461_v2 = vadd.f32 %v1460_v8, %v5542_v60  ;;  %v5553_v62 = vadd.f32 %v1439_v58, %v5240_v19  ;;  %v5558_v59 = vadd.f32 %v1443_v11, %v5243_v23  ;;  %v1515_v28 = vrot.slane %v5677_v13, %v5296_v39 }
 0x3c3   :  { %v1447_v20 = vrot.slane %v1418_v51, %v5294_v38  ;;  %v1451_v9 = vrot.slane %v1419_v63, %v5294_v38  ;;  %v1519_v61 = vrot.slane %v5677_v13, %v5300_v41  ;;  %v1523_v5 = vrot.slane %v5677_v13, %v5298_v40 }
 0x3c4   :  { %v1462_v12 = vadd.f32 %v1461_v2, %v5548_v14  ;;  %v1527_v53 = vrot.slane %v5677_v13, %v5304_v44  ;;  %v1531_v50 = vrot.slane %v5677_v13, %v5302_v43  ;;  %v1535_v57 = vrot.slane %v5677_v13, %v5308_v46 }
 0x3c5   :  { %v5562_v18 = vadd.f32 %v1447_v20, %v5246_v25  ;;  %v5566_v24 = vadd.f32 %v1451_v9, %v5249_v27  ;;  %7833 = sst [smem:[#allocation59_spill]] %s5711_s5  ;;  %v1539_v10 = vrot.slane %v5677_v13, %v5306_v45  ;;  %v1561_v58 = vrot.slane %v5687_v48, %v5294_v38  ;;  %s5725_s5 = sld [smem:[#allocation14 + $0x3f]] }
 0x3c6   :  { %v1463_v17 = vadd.f32 %v1462_v12, %v5553_v62  ;;  %v1565_v8 = vrot.slane %v5687_v48, %v5296_v39  ;;  %v1569_v51 = vrot.slane %v5687_v48, %v5300_v41  ;;  %v1573_v63 = vrot.slane %v5687_v48, %v5298_v40  ;;  %s7862_s28 = sld [smem:[#allocation59_spill]] }
 0x3c7   :  { %v1577_v11 = vrot.slane %v5687_v48, %v5304_v44  ;;  %v1581_v2 = vrot.slane %v5687_v48, %v5302_v43  ;;  %v1585_v20 = vrot.slane %v5687_v48, %v5308_v46  ;;  %v1589_v12 = vrot.slane %v5687_v48, %v5306_v45 }
 0x3c8   :  { %v1464_v15 = vadd.f32 %v1463_v17, %v5558_v59  ;;  %v1608_v9 = vstv %s5612_s26  ;;  %s5754_s26 = sld [smem:[#allocation14 + $0x5d]] }
 0x3ca   :  { %v1465_v19 = vadd.f32 %v1464_v15, %v5562_v18  ;;  %v1615_v15 = vstv %s5614_s0  ;;  %s7858_s0 = sld [smem:[#allocation56_spill]] }
 0x3cb   :  { %7836 = sst [smem:[#allocation62_spill]] %s5725_s5  ;;  %s5744_s5 = sld [smem:[#allocation14 + $0x41]] }
 0x3cc   :  { %v1466_v55 = vadd.f32 %v1465_v19, %v5566_v24  ;;  %7861 = sst [smem:[#allocation56_spill]] %s5797_s16  ;;  %s7866_s14 = sld [smem:[#allocation62_spill]] }
 0x3cd   :  { %s7882_s16 = sld [smem:[#allocation27_spill]]  ;;  %7907 = sst [smem:[#allocation62_spill]] %s5985_s12 }
 0x3ce   :  { %1467 = vadd.xlane.f32.xlu1 %v1466_v55  ;;  %v1621_v55 = vstv %s5616_s1  ;;  %7839 = sst [smem:[#allocation65_spill]] %s5754_s26  ;;  %s5761_s1 = sld [smem:[#allocation14 + $0x45]] }
 0x3cf   :  { %s5799_s26 = sld [smem:[#allocation14 + $0x4e]]  ;;  %s7930_s12 = sld [smem:[#allocation42_spill]] }
 0x3d4   :  { %7841 = sst [smem:[#allocation66_spill]] %s5761_s1  ;;  %s5807_s1 = sld [smem:[#allocation14 + $0x50]] }
 0x3d5   :  { %7863 = sst [smem:[#allocation57_spill]] %s5799_s26  ;;  %s7872_s24 = sld [smem:[#allocation66_spill]] }
 0x3d6   :  { %s7871_s26 = sld [smem:[#allocation65_spill]] }
 0x3da   :  { %7869 = sst [smem:[#allocation59_spill]] %s5807_s1  ;;  %s7888_s1 = sld [smem:[#allocation31_spill]] }
 0x45b   :  { %v1468_v30 = vpop.xlane.xlu1 %1467 }
 0x45c   :  { %v1469_v26 = vmul.f32 0.0009765625, %v1468_v30  ;;  %v1627_v30 = vstv %s5618_s4  ;;  %s5767_s4 = sld [smem:[#allocation14 + $0x46]] }
 0x45e   :  { %v5571_v23 = vsub.f32 %v5529_v32, %v1469_v26  ;;  %v5574_v21 = vsub.f32 %v5532_v56, %v1469_v26  ;;  %v5577_v25 = vsub.f32 %v5542_v60, %v1469_v26  ;;  %v5580_v54 = vsub.f32 %v5548_v14, %v1469_v26 }
 0x45f   :  { %v5587_v6 = vsub.f32 %v5553_v62, %v1469_v26  ;;  %v5592_v35 = vsub.f32 %v5558_v59, %v1469_v26  ;;  %v5597_v1 = vsub.f32 %v5562_v18, %v1469_v26  ;;  %v5602_v37 = vsub.f32 %v5566_v24, %v1469_v26 }
 0x460   :  { %v1478_v27 = vmul.f32 %v5571_v23, %v5571_v23  ;;  %v1479_v33 = vmul.f32 %v5574_v21, %v5574_v21  ;;  %v1480_v34 = vmul.f32 %v5577_v25, %v5577_v25  ;;  %v1481_v36 = vmul.f32 %v5580_v54, %v5580_v54 }
 0x461   :  { %v1482_v7 = vmul.f32 %v5587_v6, %v5587_v6  ;;  %v1483_v16 = vmul.f32 %v5592_v35, %v5592_v35  ;;  %v1484_v22 = vmul.f32 %v5597_v1, %v5597_v1  ;;  %v1485_v52 = vmul.f32 %v5602_v37, %v5602_v37 }
 0x462   :  { %v1486_v0 = vadd.f32 %v1479_v33, %v1478_v27 }
 0x464   :  { %v1487_v42 = vadd.f32 %v1486_v0, %v1480_v34 }
 0x466   :  { %v1488_v3 = vadd.f32 %v1487_v42, %v1481_v36  ;;  %v1923_v42 = vstv %s7872_s24  ;;  %v1935_v36 = vstv %s7873_s13  ;;  %s8014_s13 = sld [smem:[#allocation70_spill]] }
 0x467   :  { %s8037_s24 = sld [smem:[#allocation62_spill]] }
 0x468   :  { %v1489_v4 = vadd.f32 %v1488_v3, %v1482_v7 }
 0x46a   :  { %v1490_v47 = vadd.f32 %v1489_v4, %v1483_v16 }
 0x46c   :  { %v1491_v29 = vadd.f32 %v1490_v47, %v1484_v22 }
 0x46e   :  { %v1492_v31 = vadd.f32 %v1491_v29, %v1485_v52 }
 0x470   :  { %1493 = vadd.xlane.f32.xlu1 %v1492_v31  ;;  %v1968_v31 = vstv %s5791_s10  ;;  %s7885_s10 = sld [smem:[#allocation28_spill]] }
 0x4fd   :  { %v1494_v19 = vpop.xlane.xlu1 %1493 }
 0x4fe   :  { %v1495_v33 = vmul.f32 0.0009765625, %v1494_v19  ;;  %v1916_v19 = vstv %s5759_s25  ;;  %s8005_s25 = sld [smem:[#allocation68_spill]] }
 0x500   :  { %v1496_v4 = vadd.f32 1e-05, %v1495_v33 }
 0x502   :  { %4908 = vrsqrt.f32 %v1496_v4 }
 0x50c   :  { %v4909_v16 = vpop.eup %4908 }
 0x50d   :  { %v1498_v47 = vmul.f32 %v4909_v16, %v5571_v23  ;;  %v1499_v33 = vmul.f32 %v4909_v16, %v5574_v21  ;;  %v1500_v52 = vmul.f32 %v4909_v16, %v5577_v25  ;;  %v1501_v22 = vmul.f32 %v4909_v16, %v5580_v54 }
 0x50e   :  { %v1502_v3 = vmul.f32 %v4909_v16, %v5587_v6  ;;  %v1503_v29 = vmul.f32 %v4909_v16, %v5592_v35  ;;  %v1504_v0 = vmul.f32 %v4909_v16, %v5597_v1  ;;  %v1505_v27 = vmul.f32 %v4909_v16, %v5602_v37 }
 0x50f   :  { %v1548_v17 = vmul.f32 %v1511_v49, %v1498_v47  ;;  %v1549_v23 = vmul.f32 %v1515_v28, %v1499_v33  ;;  %v1550_v21 = vmul.f32 %v1519_v61, %v1500_v52  ;;  %v1551_v25 = vmul.f32 %v1523_v5, %v1501_v22 }
 0x510   :  { %v1552_v54 = vmul.f32 %v1527_v53, %v1502_v3  ;;  %v1553_v6 = vmul.f32 %v1531_v50, %v1503_v29  ;;  %v1554_v35 = vmul.f32 %v1535_v57, %v1504_v0  ;;  %v1555_v1 = vmul.f32 %v1539_v10, %v1505_v27 }
 0x511   :  { %v5876_v37 = vadd.f32 %v1561_v58, %v1548_v17  ;;  %v5881_v49 = vadd.f32 %v1565_v8, %v1549_v23  ;;  %v5886_v28 = vadd.f32 %v1569_v51, %v1550_v21  ;;  %v5891_v13 = vadd.f32 %v1573_v63, %v1551_v25 }
 0x512   :  { %v5896_v61 = vadd.f32 %v1577_v11, %v1552_v54  ;;  %v5901_v5 = vadd.f32 %v1581_v2, %v1553_v6  ;;  %v5906_v53 = vadd.f32 %v1585_v20, %v1554_v35  ;;  %v5911_v50 = vadd.f32 %v1589_v12, %v1555_v1 }
 0x513   :  { %v1609_v57 = vmul.f32 %v1608_v9, %v5876_v37  ;;  %v1610_v10 = vmul.f32 %v1608_v9, %v5881_v49  ;;  %v1616_v58 = vmul.f32 %v1615_v15, %v5886_v28  ;;  %v1617_v8 = vmul.f32 %v1615_v15, %v5891_v13 }
 0x514   :  { %v1622_v48 = vmul.f32 %v1621_v55, %v5896_v61  ;;  %v1623_v51 = vmul.f32 %v1621_v55, %v5901_v5  ;;  %v1628_v63 = vmul.f32 %v1627_v30, %v5906_v53  ;;  %v1629_v11 = vmul.f32 %v1627_v30, %v5911_v50 }
 0x515   :  { %v7886_v2 = vstv %s7881_s9  ;;  %v7889_v17 = vstv %s7882_s16  ;;  %v7893_v30 = vstv %s7883_s21  ;;  %v7895_v22 = vstv %s7884_s11  ;;  %s7900_s9 = sld [smem:[#allocation34_spill]]  ;;  %s5967_s16 = sld [smem:[#allocation14 + $0x53]] }
 0x516   :  { %v1612_v20 = vadd.f32 %v7886_v2, %v1609_v57  ;;  %v7887_v12 = vmov %v7886_v2  ;;  %v1641_v15 = vmul.f32 %v7889_v17, %v5876_v37  ;;  %v7890_v27 = vmov %v7889_v17  ;;  %s5969_s21 = sld [smem:[#allocation14 + $0x54]]  ;;  %s5983_s11 = sld [smem:[#allocation14 + $0x55]] }
 0x517   :  { %v1613_v9 = vadd.f32 %v7887_v12, %v1610_v10  ;;  %v1642_v55 = vmul.f32 %v7890_v27, %v5881_v49  ;;  %v1648_v0 = vmul.f32 %v7893_v30, %v5886_v28  ;;  %v7894_v3 = vmov %v7893_v30 }
 0x518   :  { %v1649_v16 = vmul.f32 %v7894_v3, %v5891_v13  ;;  %v1654_v47 = vmul.f32 %v7895_v22, %v5896_v61  ;;  %v7896_v52 = vmov %v7895_v22  ;;  %v1618_v33 = vadd.f32 %v1616_v58, %v1612_v20 }
 0x519   :  { %v1655_v29 = vmul.f32 %v7896_v52, %v5901_v5  ;;  %v1619_v23 = vadd.f32 %v1617_v8, %v1613_v9  ;;  %v7898_v21 = vstv %s7885_s10  ;;  %v7902_v35 = vstv %s7888_s1  ;;  %s7906_s10 = sld [smem:[#allocation35_spill]]  ;;  %s7912_s1 = sld [smem:[#allocation36_spill]] }
 0x51a   :  { %v1644_v25 = vadd.f32 %v7898_v21, %v1641_v15  ;;  %v7899_v54 = vmov %v7898_v21  ;;  %v1660_v1 = vmul.f32 %v7902_v35, %v5906_v53  ;;  %v7903_v57 = vmov %v7902_v35 }
 0x51b   :  { %v1645_v6 = vadd.f32 %v7899_v54, %v1642_v55  ;;  %7901 = sst [smem:[#allocation61_spill]] %s5967_s16  ;;  %v1661_v10 = vmul.f32 %v7903_v57, %v5911_v50  ;;  %v7904_v58 = vstv %s7891_s27  ;;  %v1624_v12 = vadd.f32 %v1622_v48, %v1618_v33  ;;  %s7915_s27 = sld [smem:[#allocation38_spill]] }
 0x51c   :  { %v1673_v8 = vmul.f32 %v7904_v58, %v5876_v37  ;;  %v7905_v2 = vmov %v7904_v58  ;;  %v1625_v9 = vadd.f32 %v1623_v51, %v1619_v23  ;;  %v1650_v17 = vadd.f32 %v1648_v0, %v1644_v25  ;;  %s7924_s16 = sld [smem:[#allocation41_spill]] }
 0x51d   :  { %v1674_v20 = vmul.f32 %v7905_v2, %v5881_v49  ;;  %v1651_v15 = vadd.f32 %v1649_v16, %v1645_v6  ;;  %v7908_v27 = vstv %s7897_s8  ;;  %v7910_v22 = vstv %s7900_s9  ;;  %s7918_s8 = sld [smem:[#allocation39_spill]]  ;;  %s7919_s9 = sld [smem:[#allocation37_spill]] }
 0x51e   :  { %v1676_v55 = vadd.f32 %v7908_v27, %v1673_v8  ;;  %v7909_v30 = vmov %v7908_v27  ;;  %v1680_v52 = vmul.f32 %v7910_v22, %v5886_v28  ;;  %v7911_v21 = vmov %v7910_v22 }
 0x51f   :  { %v1677_v3 = vadd.f32 %v7909_v30, %v1674_v20  ;;  %v1681_v54 = vmul.f32 %v7911_v21, %v5891_v13  ;;  %v1630_v35 = vadd.f32 %v1628_v63, %v1624_v12  ;;  %v1631_v57 = vadd.f32 %v1629_v11, %v1625_v9 }
 0x520   :  { %v1656_v58 = vadd.f32 %v1654_v47, %v1650_v17  ;;  %v1657_v48 = vadd.f32 %v1655_v29, %v1651_v15  ;;  %v1682_v51 = vadd.f32 %v1680_v52, %v1676_v55  ;;  %v7913_v16 = vstv %s7906_s10  ;;  %s7922_s10 = sld [smem:[#allocation40_spill]] }
 0x521   :  { %v1683_v0 = vadd.f32 %v1681_v54, %v1677_v3  ;;  %v1686_v33 = vmul.f32 %v7913_v16, %v5896_v61  ;;  %v7914_v23 = vmov %v7913_v16  ;;  %v1634_v6 = vmul.f32 0.01, %v1630_v35 }
 0x522   :  { %v1687_v25 = vmul.f32 %v7914_v23, %v5901_v5  ;;  %v1635_v8 = vmul.f32 0.01, %v1631_v57  ;;  %v1662_v47 = vadd.f32 %v1660_v1, %v1656_v58  ;;  %v1663_v29 = vadd.f32 %v1661_v10, %v1657_v48 }
 0x523   :  { %v1688_v2 = vadd.f32 %v1686_v33, %v1682_v51  ;;  %vm1632_vm0 = vcmp.ge.f32.partialorder %v1630_v35, 0.0  ;;  %vm1633_vm1 = vcmp.ge.f32.partialorder %v1631_v57, 0.0  ;;  %v7916_v12 = vstv %s7912_s1  ;;  %s7923_s1 = sld [smem:[#allocation43_spill]] }
 0x524   :  { %v1689_v20 = vadd.f32 %v1687_v25, %v1683_v0  ;;  %v1692_v9 = vmul.f32 %v7916_v12, %v5906_v53  ;;  %v7917_v17 = vmov %v7916_v12  ;;  %v7920_v22 = vstv %s7915_s27  ;;  %s7927_s27 = sld [smem:[#allocation44_spill]] }
 0x525   :  { %v1693_v15 = vmul.f32 %v7917_v17, %v5911_v50  ;;  %v1705_v52 = vmul.f32 %v7920_v22, %v5876_v37  ;;  %v7921_v21 = vmov %v7920_v22  ;;  %v6021_v58 = vsel %vm1632_vm0, %v1630_v35, %v1634_v6 }
 0x526   :  { %v1694_v1 = vadd.f32 %v1692_v9, %v1688_v2  ;;  %v1706_v54 = vmul.f32 %v7921_v21, %v5881_v49  ;;  %v6023_v48 = vsel %vm1633_vm1, %v1631_v57, %v1635_v8  ;;  %vm1664_vm2 = vcmp.ge.f32.partialorder %v1662_v47, 0.0 }
 0x527   :  { %v1695_v10 = vadd.f32 %v1693_v15, %v1689_v20  ;;  %vm1665_vm3 = vcmp.ge.f32.partialorder %v1663_v29, 0.0  ;;  %v1666_v51 = vmul.f32 0.01, %v1662_v47  ;;  %v1667_v0 = vmul.f32 0.01, %v1663_v29 }
 0x528   :  { %v7925_v16 = vstv %s7918_s8  ;;  %vm1696_vm4 = vcmp.ge.f32.partialorder %v1694_v1, 0.0  ;;  %v7928_v35 = vstv %s7919_s9  ;;  %v1698_v2 = vmul.f32 0.01, %v1694_v1  ;;  %s7934_s8 = sld [smem:[#allocation47_spill]]  ;;  %s7939_s9 = sld [smem:[#allocation48_spill]] }
 0x529   :  { %v1712_v33 = vmul.f32 %v7925_v16, %v5886_v28  ;;  %v7926_v23 = vmov %v7925_v16  ;;  %vm1697_vm5 = vcmp.ge.f32.partialorder %v1695_v10, 0.0  ;;  %v1708_v57 = vadd.f32 %v7928_v35, %v1705_v52 }
 0x52a   :  { %v1713_v25 = vmul.f32 %v7926_v23, %v5891_v13  ;;  %v7929_v6 = vmov %v7928_v35  ;;  %v1699_v20 = vmul.f32 0.01, %v1695_v10  ;;  %v7932_v12 = vstv %s7922_s10  ;;  %s7942_s10 = sld [smem:[#allocation49_spill]] }
 0x52b   :  { %v1709_v8 = vadd.f32 %v7929_v6, %v1706_v54  ;;  %v1718_v9 = vmul.f32 %v7932_v12, %v5896_v61  ;;  %v7933_v17 = vmov %v7932_v12  ;;  %v1714_v22 = vadd.f32 %v1712_v33, %v1708_v57 }
 0x52c   :  { %v1719_v15 = vmul.f32 %v7933_v17, %v5901_v5  ;;  %v7935_v52 = vstv %s7923_s1  ;;  %v7937_v35 = vstv %s7924_s16  ;;  %v7940_v3 = vstv %s7927_s27  ;;  %s7945_s1 = sld [smem:[#allocation46_spill]]  ;;  %s7950_s16 = sld [smem:[#allocation50_spill]] }
 0x52d   :  { %v1715_v21 = vadd.f32 %v1713_v25, %v1709_v8  ;;  %v1737_v16 = vmul.f32 %v7935_v52, %v5876_v37  ;;  %v7936_v54 = vmov %v7935_v52  ;;  %v1724_v6 = vmul.f32 %v7937_v35, %v5906_v53  ;;  %s7965_s27 = sld [smem:[#allocation54_spill]] }
 0x52e   :  { %v1738_v23 = vmul.f32 %v7936_v54, %v5881_v49  ;;  %v7938_v27 = vmov %v7937_v35  ;;  %v1744_v17 = vmul.f32 %v7940_v3, %v5886_v28  ;;  %v7941_v33 = vmov %v7940_v3 }
 0x52f   :  { %v1725_v12 = vmul.f32 %v7938_v27, %v5911_v50  ;;  %v1745_v25 = vmul.f32 %v7941_v33, %v5891_v13  ;;  %v1720_v57 = vadd.f32 %v1718_v9, %v1714_v22  ;;  %v1721_v8 = vadd.f32 %v1719_v15, %v1715_v21 }
 0x530   :  { %v7943_v52 = vstv %s7930_s12  ;;  %v7946_v30 = vstv %s7931_s29  ;;  %v7948_v3 = vstv %s7934_s8  ;;  %s7957_s29 = sld [smem:[#allocation51_spill]]  ;;  %s7960_s12 = sld [smem:[#allocation53_spill]] }
 0x531   :  { %v1740_v54 = vadd.f32 %v7943_v52, %v1737_v16  ;;  %v7944_v11 = vmov %v7943_v52  ;;  %v1750_v27 = vmul.f32 %v7946_v30, %v5896_v61  ;;  %v7947_v63 = vmov %v7946_v30  ;;  %s6537_s8 = sld [smem:[#allocation14 + $0x81]] }
 0x532   :  { %v1741_v35 = vadd.f32 %v7944_v11, %v1738_v23  ;;  %v1751_v55 = vmul.f32 %v7947_v63, %v5901_v5  ;;  %v1769_v4 = vmul.f32 %v7948_v3, %v5876_v37  ;;  %v7949_v33 = vmov %v7948_v3 }
 0x533   :  { %v1770_v26 = vmul.f32 %v7949_v33, %v5881_v49  ;;  %v1726_v9 = vadd.f32 %v1724_v6, %v1720_v57  ;;  %v1727_v15 = vadd.f32 %v1725_v12, %v1721_v8  ;;  %v1746_v22 = vadd.f32 %v1744_v17, %v1740_v54 }
 0x534   :  { %v1747_v21 = vadd.f32 %v1745_v25, %v1741_v35  ;;  %v7951_v16 = vstv %s7939_s9  ;;  %v7953_v30 = vstv %s7942_s10  ;;  %v6086_v3 = vsel %vm1664_vm2, %v1662_v47, %v1666_v51  ;;  %s6539_s9 = sld [smem:[#allocation14 + $0x82]]  ;;  %s6541_s10 = sld [smem:[#allocation14 + $0x83]] }
 0x535   :  { %v1772_v11 = vadd.f32 %v7951_v16, %v1769_v4  ;;  %v7952_v23 = vmov %v7951_v16  ;;  %v1776_v7 = vmul.f32 %v7953_v30, %v5886_v28  ;;  %v7954_v63 = vmov %v7953_v30 }
 0x536   :  { %v1773_v52 = vadd.f32 %v7952_v23, %v1770_v26  ;;  %v1777_v34 = vmul.f32 %v7954_v63, %v5891_v13  ;;  %v6089_v6 = vsel %vm1665_vm3, %v1663_v29, %v1667_v0  ;;  %v7955_v12 = vstv %s7945_s1  ;;  %s6543_s1 = sld [smem:[#allocation14 + $0x91]] }
 0x537   :  { %v1756_v17 = vmul.f32 %v7955_v12, %v5906_v53  ;;  %v7956_v25 = vmov %v7955_v12  ;;  %v1752_v26 = vadd.f32 %v1750_v27, %v1746_v22  ;;  %v1753_v57 = vadd.f32 %v1751_v55, %v1747_v21 }
 0x538   :  { %v1757_v4 = vmul.f32 %v7956_v25, %v5911_v50  ;;  %v1778_v8 = vadd.f32 %v1776_v7, %v1772_v11  ;;  %v1779_v54 = vadd.f32 %v1777_v34, %v1773_v52  ;;  %v6098_v47 = vsel %vm1696_vm4, %v1694_v1, %v1698_v2 }
 0x539   :  { %v6101_v29 = vsel %vm1697_vm5, %v1695_v10, %v1699_v20  ;;  %v7958_v51 = vstv %s7950_s16  ;;  %v1730_v27 = vmul.f32 0.01, %v1726_v9  ;;  %v1731_v55 = vmul.f32 0.01, %v1727_v15  ;;  %s6545_s16 = sld [smem:[#allocation14 + $0x84]] }
 0x53a   :  { %v1782_v0 = vmul.f32 %v7958_v51, %v5896_v61  ;;  %v7959_v35 = vmov %v7958_v51  ;;  %v1758_v7 = vadd.f32 %v1756_v17, %v1752_v26  ;;  %v1759_v34 = vadd.f32 %v1757_v4, %v1753_v57 }
 0x53b   :  { %v1783_v33 = vmul.f32 %v7959_v35, %v5901_v5  ;;  %v7961_v2 = vstv %s7854_s18  ;;  %vm1728_vm6 = vcmp.ge.f32.partialorder %v1726_v9, 0.0  ;;  %vm1729_vm7 = vcmp.ge.f32.partialorder %v1727_v15, 0.0  ;;  %s8047_s18 = sld [smem:[#allocation61_spill]] }
 0x53c   :  { %v1784_v22 = vadd.f32 %v1782_v0, %v1778_v8  ;;  %v1801_v10 = vmul.f32 %v7961_v2, %v5876_v37  ;;  %v7962_v20 = vmov %v7961_v2  ;;  %v7963_v16 = vstv %s7957_s29  ;;  %s6547_s29 = sld [smem:[#allocation14 + $0x85]] }
 0x53d   :  { %v1785_v1 = vadd.f32 %v1783_v33, %v1779_v54  ;;  %v1802_v21 = vmul.f32 %v7962_v20, %v5881_v49  ;;  %v1788_v11 = vmul.f32 %v7963_v16, %v5906_v53  ;;  %v7964_v23 = vmov %v7963_v16 }
 0x53e   :  { %v1789_v52 = vmul.f32 %v7964_v23, %v5911_v50  ;;  %v1762_v30 = vmul.f32 0.01, %v1758_v7  ;;  %v1763_v63 = vmul.f32 0.01, %v1759_v34  ;;  %v7966_v12 = vstv %s5679_s20  ;;  %s7972_s20 = sld [smem:[#allocation55_spill]] }
 0x53f   :  { %v1804_v17 = vadd.f32 %v7966_v12, %v1801_v10  ;;  %v7967_v25 = vmov %v7966_v12  ;;  %vm1760_vm8 = vcmp.ge.f32.partialorder %v1758_v7, 0.0  ;;  %vm1761_vm9 = vcmp.ge.f32.partialorder %v1759_v34, 0.0 }
 0x540   :  { %v1805_v4 = vadd.f32 %v7967_v25, %v1802_v21  ;;  %v7968_v26 = vstv %s7960_s12  ;;  %v6131_v51 = vsel %vm1728_vm6, %v1726_v9, %v1730_v27  ;;  %v6133_v0 = vsel %vm1729_vm7, %v1727_v15, %v1731_v55  ;;  %s6549_s12 = sld [smem:[#allocation14 + $0x86]] }
 0x541   :  { %v1808_v57 = vmul.f32 %v7968_v26, %v5886_v28  ;;  %v7969_v8 = vmov %v7968_v26  ;;  %v1790_v35 = vadd.f32 %v1788_v11, %v1784_v22  ;;  %v1791_v33 = vadd.f32 %v1789_v52, %v1785_v1 }
 0x542   :  { %v1809_v54 = vmul.f32 %v7969_v8, %v5891_v13  ;;  %v7970_v20 = vstv %s7965_s27  ;;  %v6141_v12 = vsel %vm1760_vm8, %v1758_v7, %v1762_v30  ;;  %v6143_v25 = vsel %vm1761_vm9, %v1759_v34, %v1763_v63  ;;  %s6551_s27 = sld [smem:[#allocation14 + $0x87]] }
 0x543   :  { %v1810_v2 = vadd.f32 %v1808_v57, %v1804_v17  ;;  %v1814_v21 = vmul.f32 %v7970_v20, %v5896_v61  ;;  %v7971_v16 = vmov %v7970_v20  ;;  %v7973_v9 = vstv %s5683_s22  ;;  %s8026_s22 = sld [smem:[#allocation59_spill]] }
 0x544   :  { %v1811_v10 = vadd.f32 %v1809_v54, %v1805_v4  ;;  %v1815_v23 = vmul.f32 %v7971_v16, %v5901_v5  ;;  %v1820_v15 = vmul.f32 %v7973_v9, %v5906_v53  ;;  %v7974_v27 = vmov %v7973_v9 }
 0x545   :  { %v1821_v55 = vmul.f32 %v7974_v27, %v5911_v50  ;;  %v1816_v22 = vadd.f32 %v1814_v21, %v1810_v2  ;;  %v7975_v11 = vstv %s5685_s23  ;;  %vm1792_vm10 = vcmp.ge.f32.partialorder %v1790_v35, 0.0  ;;  %s8036_s23 = sld [smem:[#allocation60_spill]] }
 0x546   :  { %v1817_v1 = vadd.f32 %v1815_v23, %v1811_v10  ;;  %v1833_v7 = vmul.f32 %v7975_v11, %v5876_v37  ;;  %v7976_v52 = vmov %v7975_v11  ;;  %vm1793_vm11 = vcmp.ge.f32.partialorder %v1791_v33, 0.0 }
 0x547   :  { %v1834_v34 = vmul.f32 %v7976_v52, %v5881_v49  ;;  %v1794_v30 = vmul.f32 0.01, %v1790_v35  ;;  %v1795_v63 = vmul.f32 0.01, %v1791_v33  ;;  %v1822_v17 = vadd.f32 %v1820_v15, %v1816_v22 }
 0x548   :  { %v1823_v4 = vadd.f32 %v1821_v55, %v1817_v1  ;;  %v7977_v26 = vstv %s7972_s20  ;;  %v7979_v37 = vstv %s7858_s0  ;;  %v7981_v20 = vstv %s7862_s28  ;;  %s6213_s0 = sld [smem:[#allocation14 + $0x5f]]  ;;  %s6232_s28 = sld [smem:[#allocation14 + $0x58]] }
 0x549   :  { %v1836_v57 = vadd.f32 %v7977_v26, %v1833_v7  ;;  %v7978_v8 = vmov %v7977_v26  ;;  %v1840_v2 = vmul.f32 %v7979_v37, %v5886_v28  ;;  %v7980_v49 = vmov %v7979_v37  ;;  %s6553_s20 = sld [smem:[#allocation14 + $0x92]] }
 0x54a   :  { %v1837_v54 = vadd.f32 %v7978_v8, %v1834_v34  ;;  %v1841_v10 = vmul.f32 %v7980_v49, %v5891_v13  ;;  %v1865_v21 = vmul.f32 %v7981_v20, %v6021_v58  ;;  %v7982_v16 = vmov %v7981_v20 }
 0x54b   :  { %v1866_v23 = vmul.f32 %v7982_v16, %v6023_v48  ;;  %v7983_v9 = vstv %s7859_s7  ;;  %v7985_v22 = vstv %s7860_s2  ;;  %v1842_v13 = vadd.f32 %v1840_v2, %v1836_v57  ;;  %s6227_s7 = sld [smem:[#allocation14 + $0x57]]  ;;  %s8016_s2 = sld [smem:[#allocation57_spill]] }
 0x54c   :  { %v1846_v15 = vmul.f32 %v7983_v9, %v5896_v61  ;;  %v7984_v27 = vmov %v7983_v9  ;;  %v1852_v1 = vmul.f32 %v7985_v22, %v5906_v53  ;;  %v7986_v28 = vmov %v7985_v22 }
 0x54d   :  { %v1847_v55 = vmul.f32 %v7984_v27, %v5901_v5  ;;  %v1853_v11 = vmul.f32 %v7986_v28, %v5911_v50  ;;  %v1843_v7 = vadd.f32 %v1841_v10, %v1837_v54  ;;  %v7987_v52 = vstv %s5735_s17  ;;  %s8019_s17 = sld [smem:[#allocation52_spill]] }
 0x54e   :  { %v1868_v34 = vadd.f32 %v7987_v52, %v1865_v21  ;;  %v7988_v26 = vmov %v7987_v52  ;;  %vm1824_vm12 = vcmp.ge.f32.partialorder %v1822_v17, 0.0  ;;  %vm1825_vm13 = vcmp.ge.f32.partialorder %v1823_v4, 0.0 }
 0x54f   :  { %v1869_v8 = vadd.f32 %v7988_v26, %v1866_v23  ;;  %v7989_v61 = vstv %s7864_s19  ;;  %v1826_v49 = vmul.f32 0.01, %v1822_v17  ;;  %v1827_v20 = vmul.f32 0.01, %v1823_v4  ;;  %s8024_s19 = sld [smem:[#allocation58_spill]] }
 0x550   :  { %v1872_v5 = vmul.f32 %v7989_v61, %v6086_v3  ;;  %v7990_v37 = vmov %v7989_v61  ;;  %v1848_v50 = vadd.f32 %v1846_v15, %v1842_v13  ;;  %v1849_v16 = vadd.f32 %v1847_v55, %v1843_v7 }
 0x551   :  { %v1873_v53 = vmul.f32 %v7990_v37, %v6089_v6  ;;  %v7991_v2 = vstv %s7865_s15  ;;  %v6202_v9 = vsel %vm1792_vm10, %v1790_v35, %v1794_v30  ;;  %v6205_v27 = vsel %vm1793_vm11, %v1791_v33, %v1795_v63  ;;  %s8011_s15 = sld [smem:[#allocation56_spill]] }
 0x552   :  { %v1874_v57 = vadd.f32 %v1872_v5, %v1868_v34  ;;  %v1878_v10 = vmul.f32 %v7991_v2, %v6098_v47  ;;  %v7992_v21 = vmov %v7991_v2  ;;  %v1854_v22 = vadd.f32 %v1852_v1, %v1848_v50 }
 0x553   :  { %v1875_v54 = vadd.f32 %v1873_v53, %v1869_v8  ;;  %v1879_v23 = vmul.f32 %v7992_v21, %v6101_v29  ;;  %v7993_v15 = vstv %s7866_s14  ;;  %v1855_v28 = vadd.f32 %v1853_v11, %v1849_v16  ;;  %s6234_s14 = sld [smem:[#allocation14 + $0x59]] }
 0x554   :  { %v1884_v55 = vmul.f32 %v7993_v15, %v6131_v51  ;;  %v1880_v13 = vadd.f32 %v1878_v10, %v1874_v57  ;;  %v7994_v52 = vmov %v7993_v15  ;;  %v6216_v35 = vsel %vm1824_vm12, %v1822_v17, %v1826_v49 }
 0x555   :  { %v1881_v7 = vadd.f32 %v1879_v23, %v1875_v54  ;;  %v1885_v34 = vmul.f32 %v7994_v52, %v6133_v0  ;;  %v6219_v33 = vsel %vm1825_vm13, %v1823_v4, %v1827_v20  ;;  %v7995_v30 = vstv %s7867_s6  ;;  %s8010_s6 = sld [smem:[#allocation71_spill]] }
 0x556   :  { %v1890_v63 = vmul.f32 %v7995_v30, %v6141_v12  ;;  %v7996_v1 = vmov %v7995_v30  ;;  %v1858_v26 = vmul.f32 0.01, %v1854_v22  ;;  %v1886_v8 = vadd.f32 %v1884_v55, %v1880_v13 }
 0x557   :  { %v1891_v11 = vmul.f32 %v7996_v1, %v6143_v25  ;;  %v1887_v61 = vadd.f32 %v1885_v34, %v1881_v7  ;;  %v7997_v17 = vstv %s5744_s5  ;;  %vm1856_vm14 = vcmp.ge.f32.partialorder %v1854_v22, 0.0  ;;  %s8001_s5 = sld [smem:[#allocation64_spill]] }
 0x558   :  { %v1896_v5 = vmul.f32 %v7997_v17, %v6202_v9  ;;  %v7998_v4 = vmov %v7997_v17  ;;  %v1917_v53 = vmul.f32 %v1916_v19, %v6021_v58  ;;  %v1918_v49 = vmul.f32 %v1916_v19, %v6023_v48 }
 0x559   :  { %v1897_v37 = vmul.f32 %v7998_v4, %v6205_v27  ;;  %vm1857_vm15 = vcmp.ge.f32.partialorder %v1855_v28, 0.0  ;;  %v1859_v20 = vmul.f32 0.01, %v1855_v28  ;;  %v1892_v50 = vadd.f32 %v1890_v63, %v1886_v8 }
 0x55a   :  { %v1893_v16 = vadd.f32 %v1891_v11, %v1887_v61  ;;  %v7999_v57 = vstv %s7871_s26  ;;  %v1924_v21 = vmul.f32 %v1923_v42, %v6086_v3  ;;  %v1925_v23 = vmul.f32 %v1923_v42, %v6089_v6  ;;  %s6591_s26 = sld [smem:[#allocation14 + $0x8d]] }
 0x55b   :  { %v1920_v54 = vadd.f32 %v7999_v57, %v1917_v53  ;;  %v8000_v2 = vmov %v7999_v57  ;;  %v6255_v19 = vsel %vm1856_vm14, %v1854_v22, %v1858_v26  ;;  %v1898_v15 = vadd.f32 %v1896_v5, %v1892_v50 }
 0x55c   :  { %v1921_v10 = vadd.f32 %v8000_v2, %v1918_v49  ;;  %v1899_v55 = vadd.f32 %v1897_v37, %v1893_v16  ;;  %v8002_v13 = vstv %s5746_s30  ;;  %v8003_v30 = vstv %s5767_s4  ;;  %s8008_s4 = sld [smem:[#allocation69_spill]]  ;;  %s6349_s30 = sld [smem:[#allocation14 + $0x5a]] }
 0x55d   :  { %v1902_v7 = vmul.f32 %v8002_v13, %v6216_v35  ;;  %v1926_v52 = vadd.f32 %v1924_v21, %v1920_v54  ;;  %v1930_v63 = vmul.f32 %v8003_v30, %v6098_v47  ;;  %v8004_v1 = vmov %v8003_v30 }
 0x55e   :  { %v1927_v34 = vadd.f32 %v1925_v23, %v1921_v10  ;;  %v1931_v42 = vmul.f32 %v8004_v1, %v6101_v29  ;;  %v6267_v22 = vsel %vm1857_vm15, %v1855_v28, %v1859_v20  ;;  %v8006_v11 = vmov %v8002_v13 }
 0x55f   :  { %v1903_v26 = vmul.f32 %v8006_v11, %v6219_v33  ;;  %v1936_v8 = vmul.f32 %v1935_v36, %v6131_v51  ;;  %v2023_v61 = vstv %s6213_s0  ;;  %v1904_v17 = vadd.f32 %v1902_v7, %v1898_v15  ;;  %s6555_s0 = sld [smem:[#allocation14 + $0x88]] }
 0x560   :  { %v1932_v5 = vadd.f32 %v1930_v63, %v1926_v52  ;;  %v1933_v4 = vadd.f32 %v1931_v42, %v1927_v34  ;;  %v1937_v37 = vmul.f32 %v1935_v36, %v6133_v0  ;;  %v8009_v28 = vstv %s8001_s5  ;;  %s6563_s5 = sld [smem:[#allocation14 + $0x8c]] }
 0x561   :  { %v1908_v53 = vmul.f32 %v8009_v28, %v6255_v19  ;;  %v2039_v49 = vstv %s6227_s7  ;;  %v2045_v20 = vstv %s6232_s28  ;;  %v2051_v50 = vstv %s6234_s14  ;;  %s6557_s7 = sld [smem:[#allocation14 + $0x89]]  ;;  %s6559_s28 = sld [smem:[#allocation14 + $0x8a]] }
 0x562   :  { %v1905_v16 = vadd.f32 %v1903_v26, %v1899_v55  ;;  %v1938_v57 = vadd.f32 %v1936_v8, %v1932_v5  ;;  %v1939_v54 = vadd.f32 %v1937_v37, %v1933_v4  ;;  %v8012_v2 = vstv %s8005_s25  ;;  %s6561_s14 = sld [smem:[#allocation14 + $0x8b]] }
 0x563   :  { %v1942_v10 = vmul.f32 %v8012_v2, %v6141_v12  ;;  %v8013_v21 = vmov %v8009_v28  ;;  %v8015_v23 = vmov %v8012_v2  ;;  %v1969_v13 = vmul.f32 %v1968_v31, %v6021_v58  ;;  %s6589_s25 = sld [smem:[#allocation14 + $0x93]] }
 0x564   :  { %v1909_v36 = vmul.f32 %v8013_v21, %v6267_v22  ;;  %v1943_v15 = vmul.f32 %v8015_v23, %v6143_v25  ;;  %v1970_v7 = vmul.f32 %v1968_v31, %v6023_v48  ;;  %v1910_v55 = vadd.f32 %v1908_v53, %v1904_v17 }
 0x565   :  { %v1944_v52 = vadd.f32 %v1942_v10, %v1938_v57  ;;  %v8017_v34 = vstv %s8008_s4  ;;  %v8020_v42 = vstv %s8010_s6  ;;  %v8022_v5 = vstv %s8011_s15  ;;  %s6593_s4 = sld [smem:[#allocation14 + $0x8e]]  ;;  %s6595_s6 = sld [smem:[#allocation14 + $0x8f]] }
 0x566   :  { %v1948_v30 = vmul.f32 %v8017_v34, %v6202_v9  ;;  %v8018_v63 = vmov %v8017_v34  ;;  %v1972_v11 = vadd.f32 %v8020_v42, %v1969_v13  ;;  %v8021_v26 = vmov %v8020_v42  ;;  %s6773_s15 = sld [smem:[#allocation14 + $0xb4]] }
 0x567   :  { %v1949_v1 = vmul.f32 %v8018_v63, %v6205_v27  ;;  %v1973_v8 = vadd.f32 %v8021_v26, %v1970_v7  ;;  %v1976_v4 = vmul.f32 %v8022_v5, %v6086_v3  ;;  %v8023_v31 = vmov %v8022_v5 }
 0x568   :  { %v1977_v17 = vmul.f32 %v8023_v31, %v6089_v6  ;;  %v1911_v37 = vadd.f32 %v1909_v36, %v1905_v16  ;;  %v1945_v28 = vadd.f32 %v1943_v15, %v1939_v54  ;;  %v1950_v53 = vadd.f32 %v1948_v30, %v1944_v52 }
 0x569   :  { %v8025_v57 = vstv %s8014_s13  ;;  %v1978_v10 = vadd.f32 %v1976_v4, %v1972_v11  ;;  %v8027_v23 = vstv %s8016_s2  ;;  %v6326_v63 = vadd.f32 %v1910_v55, %v5529_v32  ;;  %s6775_s13 = sld [smem:[#allocation14 + $0x94]]  ;;  %s6777_s2 = sld [smem:[#allocation14 + $0x95]] }
 0x56a   :  { %v1954_v2 = vmul.f32 %v8025_v57, %v6216_v35  ;;  %v1979_v21 = vadd.f32 %v1977_v17, %v1973_v8  ;;  %v1982_v13 = vmul.f32 %v8027_v23, %v6098_v47  ;;  %v8028_v7 = vmov %v8027_v23 }
 0x56b   :  { %v1983_v34 = vmul.f32 %v8028_v7, %v6101_v29  ;;  %v8029_v16 = vmov %v8025_v57  ;;  %v8030_v36 = vstv %s8019_s17  ;;  %v8032_v26 = vstv %s8024_s19  ;;  %s6779_s17 = sld [smem:[#allocation14 + $0x96]]  ;;  %s6781_s19 = sld [smem:[#allocation14 + $0x97]] }
 0x56c   :  { %v1955_v54 = vmul.f32 %v8029_v16, %v6219_v33  ;;  %v1960_v15 = vmul.f32 %v8030_v36, %v6255_v19  ;;  %v8031_v52 = vmov %v8030_v36  ;;  %v1984_v42 = vadd.f32 %v1982_v13, %v1978_v10  ;;  %8051 = sst [smem:[#allocation63_spill]] %s6773_s15  ;;  %s6927_s15 = sld [smem:[#allocation14 + $0xc7]] }
 0x56d   :  { %v1961_v30 = vmul.f32 %v8031_v52, %v6267_v22  ;;  %v1985_v11 = vadd.f32 %v1983_v34, %v1979_v21  ;;  %v1988_v32 = vmul.f32 %v8032_v26, %v6131_v51  ;;  %v8033_v55 = vmov %v8032_v26 }
 0x56e   :  { %v1989_v8 = vmul.f32 %v8033_v55, %v6133_v0  ;;  %v1951_v5 = vadd.f32 %v1949_v1, %v1945_v28  ;;  %v1956_v4 = vadd.f32 %v1954_v2, %v1950_v53  ;;  %v8034_v31 = vstv %s8026_s22  ;;  %s6783_s22 = sld [smem:[#allocation14 + $0x98]] }
 0x56f   :  { %v1994_v17 = vmul.f32 %v8034_v31, %v6141_v12  ;;  %v8035_v57 = vmov %v8034_v31  ;;  %v1990_v10 = vadd.f32 %v1988_v32, %v1984_v42  ;;  %v8038_v13 = vstv %s5969_s21  ;;  %s6533_s21 = sld [smem:[#allocation14 + $0x90]]  ;;  %8052 = sst [smem:[#allocation65_spill]] %s6775_s13 }
 0x570   :  { %v1995_v23 = vmul.f32 %v8035_v57, %v6143_v25  ;;  %v1991_v21 = vadd.f32 %v1989_v8, %v1985_v11  ;;  %v2021_v7 = vmul.f32 %v8038_v13, %v6021_v58  ;;  %v8039_v34 = vmov %v8038_v13  ;;  %8053 = sst [smem:[#allocation66_spill]] %s6777_s2 }
 0x571   :  { %v2022_v1 = vmul.f32 %v8039_v34, %v6023_v48  ;;  %v8040_v28 = vstv %s5947_s3  ;;  %v8042_v36 = vstv %s5983_s11  ;;  %v1996_v42 = vadd.f32 %v1994_v17, %v1990_v10  ;;  %s6378_s3 = sld [smem:[#allocation14 + $0x5b]]  ;;  %s6535_s11 = sld [smem:[#allocation14 + $0x80]] }
 0x572   :  { %v2000_v53 = vmul.f32 %v8040_v28, %v6202_v9  ;;  %v8041_v2 = vmov %v8040_v28  ;;  %v2028_v52 = vmul.f32 %v8042_v36, %v6086_v3  ;;  %v8043_v26 = vmov %v8042_v36  ;;  %8054 = sst [smem:[#allocation67_spill]] %s6779_s17 }
 0x573   :  { %v2001_v16 = vmul.f32 %v8041_v2, %v6205_v27  ;;  %v2029_v55 = vmul.f32 %v8043_v26, %v6089_v6  ;;  %v1997_v11 = vadd.f32 %v1995_v23, %v1991_v21  ;;  %v2024_v58 = vadd.f32 %v2023_v61, %v2021_v7  ;;  %8055 = sst [smem:[#allocation23_spill]] %s6781_s19 }
 0x574   :  { %v2025_v32 = vadd.f32 %v2023_v61, %v2022_v1  ;;  %v1957_v8 = vadd.f32 %v1955_v54, %v1951_v5  ;;  %v8044_v48 = vstv %s8036_s23  ;;  %v8045_v57 = vstv %s8037_s24  ;;  %8056 = sst [smem:[#allocation24_spill]] %s6783_s22  ;;  %s6785_s23 = sld [smem:[#allocation14 + $0x99]] }
 0x575   :  { %v2006_v31 = vmul.f32 %v8044_v48, %v6216_v35  ;;  %v2034_v13 = vmul.f32 %v8045_v57, %v6098_v47  ;;  %v8046_v34 = vmov %v8045_v57  ;;  %v2002_v6 = vadd.f32 %v2000_v53, %v1996_v42  ;;  %s6787_s24 = sld [smem:[#allocation14 + $0x9a]]  ;;  %8099 = sst [smem:[#allocation59_spill]] %s6927_s15 }
 0x576   :  { %v2035_v3 = vmul.f32 %v8046_v34, %v6101_v29  ;;  %v2003_v17 = vadd.f32 %v2001_v16, %v1997_v11  ;;  %v2030_v23 = vadd.f32 %v2028_v52, %v2024_v58  ;;  %v2031_v61 = vadd.f32 %v2029_v55, %v2025_v32  ;;  %s6972_s15 = sld [smem:[#allocation14 + $0xd2]] }
 0x577   :  { %v6381_v54 = vadd.f32 %v1911_v37, %v5532_v56  ;;  %v1962_v5 = vadd.f32 %v1960_v15, %v1956_v4  ;;  %v8048_v10 = vmov %v8044_v48  ;;  %v2040_v29 = vmul.f32 %v2039_v49, %v6131_v51 }
 0x578   :  { %v2007_v47 = vmul.f32 %v8048_v10, %v6219_v33  ;;  %v2008_v21 = vadd.f32 %v2006_v31, %v2002_v6  ;;  %v2036_v7 = vadd.f32 %v2034_v13, %v2030_v23  ;;  %v2037_v1 = vadd.f32 %v2035_v3, %v2031_v61  ;;  %v4709_v61 = vld [vmem:[#allocation11 + $0x414] ss:$8 sps:$4 sm:$0xff]   ;;  %v4712_v10 = vld [vmem:[#allocation11 + $0x424] ss:$8 sps:$4 sm:$0xff]  }
 0x579   :  { %v2041_v28 = vmul.f32 %v2039_v49, %v6133_v0  ;;  %v1963_v53 = vadd.f32 %v1961_v30, %v1957_v8  ;;  %v8049_v56 = vstv %s8047_s18  ;;  %v2057_v15 = vstv %s6349_s30  ;;  %s6789_s30 = sld [smem:[#allocation14 + $0xb5]]  ;;  %s6791_s18 = sld [smem:[#allocation14 + $0x9b]] }
 0x57a   :  { %v2009_v2 = vadd.f32 %v2007_v47, %v2003_v17  ;;  %v2012_v37 = vmul.f32 %v8049_v56, %v6255_v19  ;;  %v2042_v4 = vadd.f32 %v2040_v29, %v2036_v7  ;;  %v2046_v51 = vmul.f32 %v2045_v20, %v6141_v12  ;;  %v4714_v47 = vld [vmem:[#allocation11 + $0x420] ss:$8 sps:$4 sm:$0xff]   ;;  %v4718_v29 = vld [vmem:[#allocation11 + $0x444] ss:$8 sps:$4 sm:$0xff]   ;;  %v4721_v7 = vld [vmem:[#allocation11 + $0x454] ss:$8 sps:$4 sm:$0xff]  }
 0x57b   :  { %v2043_v16 = vadd.f32 %v2041_v28, %v2037_v1  ;;  %v2047_v36 = vmul.f32 %v2045_v20, %v6143_v25  ;;  %v6403_v52 = vadd.f32 %v1962_v5, %v5542_v60  ;;  %v8050_v0 = vmov %v8049_v56  ;;  %v4711_v5 = vld [vmem:[#allocation11 + $0x410] ss:$8 sps:$4 sm:$0xff]   ;;  %v4724_v28 = vld [vmem:[#allocation11 + $0x464] ss:$8 sps:$4 sm:$0xff]   ;;  %8057 = sst [smem:[#allocation25_spill]] %s6785_s23 }
 0x57c   :  { %v2013_v49 = vmul.f32 %v8050_v0, %v6267_v22  ;;  %v2014_v30 = vadd.f32 %v2012_v37, %v2008_v21  ;;  %v2070_v26 = vadd.f32 %v6381_v54, %v6326_v63  ;;  %v2048_v55 = vadd.f32 %v2046_v51, %v2042_v4  ;;  %v4720_v21 = vld [vmem:[#allocation11 + $0x440] ss:$8 sps:$4 sm:$0xff]   ;;  %v4723_v1 = vld [vmem:[#allocation11 + $0x450] ss:$8 sps:$4 sm:$0xff]   ;;  %v4730_v37 = vld [vmem:[#allocation11 + $0x484] ss:$8 sps:$4 sm:$0xff]  }
 0x57d   :  { %v2049_v42 = vadd.f32 %v2047_v36, %v2043_v16  ;;  %v2052_v11 = vmul.f32 %v2051_v50, %v6202_v9  ;;  %v2053_v12 = vmul.f32 %v2051_v50, %v6205_v27  ;;  %v6417_v25 = vadd.f32 %v1963_v53, %v5548_v14  ;;  %v4726_v53 = vld [vmem:[#allocation11 + $0x460] ss:$8 sps:$4 sm:$0xff]   ;;  %v4729_v56 = vld [vmem:[#allocation11 + $0x470] ss:$8 sps:$4 sm:$0xff]   ;;  %v4733_v4 = vld [vmem:[#allocation11 + $0x494] ss:$8 sps:$4 sm:$0xff]  }
 0x57e   :  { %v2015_v60 = vadd.f32 %v2013_v49, %v2009_v2  ;;  %v2063_v20 = vstv %s6378_s3  ;;  %v2071_v58 = vadd.f32 %v2070_v26, %v6403_v52  ;;  %v2058_v48 = vmul.f32 %v2057_v15, %v6216_v35  ;;  %v4727_v2 = vld [vmem:[#allocation11 + $0x474] ss:$8 sps:$4 sm:$0xff]   ;;  %v4735_v16 = vld [vmem:[#allocation11 + $0x490] ss:$8 sps:$4 sm:$0xff]   ;;  %v4736_v51 = vld [vmem:[#allocation11 + $0x4a4] ss:$8 sps:$4 sm:$0xff]  }
 0x57f   :  { %v2054_v32 = vadd.f32 %v2052_v11, %v2048_v55  ;;  %v2055_v8 = vadd.f32 %v2053_v12, %v2049_v42  ;;  %v2059_v31 = vmul.f32 %v2057_v15, %v6219_v33  ;;  %v6424_v57 = vadd.f32 %v2014_v30, %v5553_v62  ;;  %v4732_v15 = vld [vmem:[#allocation11 + $0x480] ss:$8 sps:$4 sm:$0xff]   ;;  %8058 = sst [smem:[#allocation26_spill]] %s6787_s24  ;;  %s6793_s3 = sld [smem:[#allocation14 + $0xb6]] }
 0x580   :  { %v2072_v9 = vadd.f32 %v2071_v58, %v6417_v25  ;;  %v2064_v14 = vmul.f32 %v2063_v20, %v6255_v19  ;;  %v2065_v50 = vmul.f32 %v2063_v20, %v6267_v22  ;;  %v6430_v34 = vadd.f32 %v2015_v60, %v5558_v59  ;;  %v4706_v22 = vld [vmem:[#allocation11 + $0x404] ss:$8 sps:$4 sm:$0xff]   ;;  %v4708_v59 = vld [vmem:[#allocation11 + $0x400] ss:$8 sps:$4 sm:$0xff]   ;;  %8059 = sst [smem:[#allocation22_spill]] %s6789_s30  ;;  %s6935_s30 = sld [smem:[#allocation14 + $0xc9]] }
 0x581   :  { %v2060_v13 = vadd.f32 %v2058_v48, %v2054_v32  ;;  %v2061_v27 = vadd.f32 %v2059_v31, %v2055_v8  ;;  %2995 = vmatprep.subr.bf16.mxu1 %v4706_v22  ;;  %v4741_v22 = vld [vmem:[#allocation11 + $0x4b0] ss:$8 sps:$4 sm:$0xff]   ;;  %8060 = sst [smem:[#allocation27_spill]] %s6791_s18  ;;  %s6942_s18 = sld [smem:[#allocation14 + $0xcb]] }
 0x582   :  { %v2073_v3 = vadd.f32 %v2072_v9, %v6424_v57  ;;  %2996 = vmatpush1.bf16.msra.mxu1 %v4708_v59  ;;  %v4742_v59 = vld [vmem:[#allocation11 + $0x4c4] ss:$8 sps:$4 sm:$0xff]   ;;  %s6970_s24 = sld [smem:[#allocation14 + $0xd1]]  ;;  %s8151_s22 = sld [smem:[#allocation27_spill]] }
 0x583   :  { %v2066_v6 = vadd.f32 %v2064_v14, %v2060_v13  ;;  %v2067_v35 = vadd.f32 %v2065_v50, %v2061_v27  ;;  %2997 = vmatprep.subr.bf16.mxu1 %v4709_v61  ;;  %v4744_v61 = vld [vmem:[#allocation11 + $0x4c0] ss:$8 sps:$4 sm:$0xff]  }
 0x584   :  { %v2074_v33 = vadd.f32 %v2073_v3, %v6430_v34 }
 0x585   :  { %v6435_v62 = vadd.f32 %v2066_v6, %v5562_v18  ;;  %v6438_v17 = vadd.f32 %v2067_v35, %v5566_v24  ;;  %v4715_v18 = vld [vmem:[#allocation11 + $0x434] ss:$8 sps:$4 sm:$0xff]   ;;  %v4717_v24 = vld [vmem:[#allocation11 + $0x430] ss:$8 sps:$4 sm:$0xff]   ;;  %8061 = sst [smem:[#allocation29_spill]] %s6793_s3 }
 0x586   :  { %2998 = vmatpush1.bf16.msra.mxu1 %v4711_v5  ;;  %v4745_v5 = vld [vmem:[#allocation11 + $0x4d4] ss:$8 sps:$4 sm:$0xff]   ;;  %8103 = sst [smem:[#allocation60_spill]] %s6935_s30  ;;  %s6950_s30 = sld [smem:[#allocation14 + $0xcc]] }
 0x587   :  { %v2075_v23 = vadd.f32 %v2074_v33, %v6435_v62  ;;  %2999 = vmatprep.subr.bf16.mxu1 %v4712_v10  ;;  %v4747_v10 = vld [vmem:[#allocation11 + $0x4d0] ss:$8 sps:$4 sm:$0xff]   ;;  %8108 = sst [smem:[#allocation61_spill]] %s6942_s18 }
 0x588   :  { %8119 = sst [smem:[#allocation76_spill]] %s6970_s24  ;;  %s8147_s24 = sld [smem:[#allocation24_spill]] }
 0x589   :  { %v2076_v19 = vadd.f32 %v2075_v23, %v6438_v17  ;;  %v4738_v23 = vld [vmem:[#allocation11 + $0x4a0] ss:$8 sps:$4 sm:$0xff]  }
 0x58a   :  { %3000 = vmatpush1.bf16.msra.mxu1 %v4714_v47  ;;  %v4748_v47 = vld [vmem:[#allocation11 + $0x4e4] ss:$8 sps:$4 sm:$0xff]  }
 0x58b   :  { %2077 = vadd.xlane.f32.xlu0 %v2076_v19  ;;  %3001 = vmatprep.subr.bf16.mxu1 %v4715_v18  ;;  %v4739_v19 = vld [vmem:[#allocation11 + $0x4b4] ss:$8 sps:$4 sm:$0xff]   ;;  %v4750_v18 = vld [vmem:[#allocation11 + $0x4e0] ss:$8 sps:$4 sm:$0xff]  }
 0x58e   :  { %3002 = vmatpush1.bf16.msra.mxu1 %v4717_v24  ;;  %v4751_v24 = vld [vmem:[#allocation11 + $0x4f4] ss:$8 sps:$4 sm:$0xff]  }
 0x58f   :  { %3003 = vmatprep.subr.bf16.mxu1 %v4718_v29  ;;  %v4753_v29 = vld [vmem:[#allocation11 + $0x4f0] ss:$8 sps:$4 sm:$0xff]  }
 0x592   :  { %3004 = vmatpush1.bf16.msra.mxu1 %v4720_v21  ;;  %v4756_v21 = vld [vmem:[#allocation11 + $0x504] ss:$8 sps:$4 sm:$0xff]  }
 0x593   :  { %3005 = vmatprep.subr.bf16.mxu1 %v4721_v7 }
 0x596   :  { %3006 = vmatpush1.bf16.msra.mxu1 %v4723_v1 }
 0x597   :  { %3007 = vmatprep.subr.bf16.mxu1 %v4724_v28 }
 0x59a   :  { %3008 = vmatpush1.bf16.msra.mxu1 %v4726_v53  ;;  %v2117_v53 = vld [vmem:[#allocation8 + $0x1] ss:$2 sm:$0xff] }
 0x59b   :  { %3009 = vmatprep.subr.bf16.mxu1 %v4727_v2  ;;  %v2168_v2 = vld [vmem:[#allocation9 + $0x1] ss:$2 sm:$0xff] }
 0x59e   :  { %3010 = vmatpush1.bf16.msra.mxu1 %v4729_v56  ;;  %v2126_v56 = vrot.slane %v2117_v53, %v5296_v39 }
 0x59f   :  { %3011 = vmatprep.subr.bf16.mxu1 %v4730_v37  ;;  %v2177_v37 = vrot.slane %v2168_v2, %v5296_v39 }
 0x5a2   :  { %3012 = vmatpush1.bf16.msra.mxu1 %v4732_v15  ;;  %v2122_v15 = vrot.slane %v2117_v53, %v5294_v38 }
 0x5a3   :  { %3013 = vmatprep.subr.bf16.mxu1 %v4733_v4  ;;  %v2173_v4 = vrot.slane %v2168_v2, %v5294_v38 }
 0x5a6   :  { %3014 = vmatpush1.bf16.msra.mxu1 %v4735_v16  ;;  %v2134_v16 = vrot.slane %v2117_v53, %v5298_v40 }
 0x5a7   :  { %3015 = vmatprep.subr.bf16.mxu1 %v4736_v51  ;;  %v2185_v51 = vrot.slane %v2168_v2, %v5298_v40 }
 0x5aa   :  { %3016 = vmatpush1.bf16.msra.mxu1 %v4738_v23 }
 0x5ab   :  { %3017 = vmatprep.subr.bf16.mxu1 %v4739_v19 }
 0x5ae   :  { %3018 = vmatpush1.bf16.msra.mxu1 %v4741_v22 }
 0x5af   :  { %3019 = vmatprep.subr.bf16.mxu1 %v4742_v59 }
 0x5b2   :  { %3020 = vmatpush1.bf16.msra.mxu1 %v4744_v61 }
 0x5b3   :  { %3021 = vmatprep.subr.bf16.mxu1 %v4745_v5 }
 0x5b6   :  { %3022 = vmatpush1.bf16.msra.mxu1 %v4747_v10 }
 0x5b7   :  { %3023 = vmatprep.subr.bf16.mxu1 %v4748_v47 }
 0x5ba   :  { %3024 = vmatpush1.bf16.msra.mxu1 %v4750_v18 }
 0x5bb   :  { %3025 = vmatprep.subr.bf16.mxu1 %v4751_v24 }
 0x5be   :  { %3026 = vmatpush1.bf16.msra.mxu1 %v4753_v29 }
 0x5bf   :  { %3036 = vmatprep.subr.bf16.mxu1 %v4756_v21  ;;  %v4754_v21 = vld [vmem:[#allocation11 + $0x500] ss:$8 sps:$4 sm:$0xff]  }
 0x618   :  { %v2078_v36 = vpop.xlane.xlu0 %2077 }
 0x619   :  { %v2079_v0 = vmul.f32 0.0009765625, %v2078_v36  ;;  %v2130_v36 = vrot.slane %v2117_v53, %v5300_v41 }
 0x61b   :  { %v6443_v49 = vsub.f32 %v6326_v63, %v2079_v0  ;;  %v6446_v30 = vsub.f32 %v6381_v54, %v2079_v0  ;;  %v6449_v26 = vsub.f32 %v6403_v52, %v2079_v0  ;;  %v6452_v55 = vsub.f32 %v6417_v25, %v2079_v0 }
 0x61c   :  { %v6459_v12 = vsub.f32 %v6424_v57, %v2079_v0  ;;  %v6464_v58 = vsub.f32 %v6430_v34, %v2079_v0  ;;  %v6469_v48 = vsub.f32 %v6435_v62, %v2079_v0  ;;  %v2087_v13 = vsub.f32 %v6438_v17, %v2079_v0 }
 0x61d   :  { %v2088_v42 = vmul.f32 %v6443_v49, %v6443_v49  ;;  %v2089_v11 = vmul.f32 %v6446_v30, %v6446_v30  ;;  %v2090_v60 = vmul.f32 %v6449_v26, %v6449_v26  ;;  %v2091_v32 = vmul.f32 %v6452_v55, %v6452_v55 }
 0x61e   :  { %v2092_v31 = vmul.f32 %v6459_v12, %v6459_v12  ;;  %v2093_v27 = vmul.f32 %v6464_v58, %v6464_v58  ;;  %v2094_v50 = vmul.f32 %v6469_v48, %v6469_v48  ;;  %v2095_v6 = vmul.f32 %v2087_v13, %v2087_v13 }
 0x61f   :  { %v2096_v20 = vadd.f32 %v2089_v11, %v2088_v42  ;;  %v2142_v0 = vrot.slane %v2117_v53, %v5302_v43  ;;  %v2181_v42 = vrot.slane %v2168_v2, %v5300_v41  ;;  %v2138_v11 = vrot.slane %v2117_v53, %v5304_v44 }
 0x621   :  { %v2097_v8 = vadd.f32 %v2096_v20, %v2090_v60  ;;  %v2150_v60 = vrot.slane %v2117_v53, %v5306_v45  ;;  %v2146_v20 = vrot.slane %v2117_v53, %v5308_v46  ;;  %v4757_v53 = vld [vmem:[#allocation11 + $0x510] ss:$8 sps:$4 sm:$0xff]  }
 0x623   :  { %v2098_v9 = vadd.f32 %v2097_v8, %v2091_v32  ;;  %v2193_v8 = vrot.slane %v2168_v2, %v5302_v43 }
 0x625   :  { %v2099_v14 = vadd.f32 %v2098_v9, %v2092_v31  ;;  %v2189_v31 = vrot.slane %v2168_v2, %v5304_v44  ;;  %v2201_v9 = vrot.slane %v2168_v2, %v5306_v45 }
 0x627   :  { %v2100_v3 = vadd.f32 %v2099_v14, %v2093_v27  ;;  %v2197_v27 = vrot.slane %v2168_v2, %v5308_v46  ;;  %v4762_v2 = vld [vmem:[#allocation11 + $0x524] ss:$8 sps:$4 sm:$0xff]  }
 0x629   :  { %v2101_v35 = vadd.f32 %v2100_v3, %v2094_v50 }
 0x62b   :  { %v2102_v33 = vadd.f32 %v2101_v35, %v2095_v6 }
 0x62d   :  { %2103 = vadd.xlane.f32.xlu1 %v2102_v33 }
 0x6ba   :  { %v2104_v7 = vpop.xlane.xlu1 %2103 }
 0x6bb   :  { %v2105_v1 = vmul.f32 0.0009765625, %v2104_v7 }
 0x6bd   :  { %v2106_v28 = vadd.f32 1e-05, %v2105_v1  ;;  %v4759_v1 = vld [vmem:[#allocation11 + $0x514] ss:$8 sps:$4 sm:$0xff]  }
 0x6bf   :  { %4910 = vrsqrt.f32 %v2106_v28 }
 0x6c9   :  { %v4911_v32 = vpop.eup %4910 }
 0x6ca   :  { %v2109_v14 = vmul.f32 %v4911_v32, %v6446_v30  ;;  %v2108_v50 = vmul.f32 %v4911_v32, %v6443_v49  ;;  %v2111_v3 = vmul.f32 %v4911_v32, %v6452_v55  ;;  %v2110_v6 = vmul.f32 %v4911_v32, %v6449_v26 }
 0x6cb   :  { %v2113_v35 = vmul.f32 %v4911_v32, %v6464_v58  ;;  %v2112_v33 = vmul.f32 %v4911_v32, %v6459_v12  ;;  %v2115_v23 = vmul.f32 %v4911_v32, %v2087_v13  ;;  %v2114_v19 = vmul.f32 %v4911_v32, %v6469_v48  ;;  %v4778_v32 = vld [vmem:[#allocation11 + $0x580] ss:$8 sps:$4 sm:$0xff]  }
 0x6cc   :  { %v2160_v22 = vmul.f32 %v2126_v56, %v2109_v14  ;;  %v2159_v59 = vmul.f32 %v2122_v15, %v2108_v50  ;;  %v2162_v61 = vmul.f32 %v2134_v16, %v2111_v3  ;;  %v2161_v5 = vmul.f32 %v2130_v36, %v2110_v6  ;;  %v4760_v56 = vld [vmem:[#allocation11 + $0x520] ss:$8 sps:$4 sm:$0xff]   ;;  %v4763_v15 = vld [vmem:[#allocation11 + $0x530] ss:$8 sps:$4 sm:$0xff]   ;;  %v4789_v14 = vld [vmem:[#allocation11 + $0x5b4] ss:$8 sps:$4 sm:$0xff]  }
 0x6cd   :  { %v2164_v10 = vmul.f32 %v2142_v0, %v2113_v35  ;;  %v2163_v47 = vmul.f32 %v2138_v11, %v2112_v33  ;;  %v2166_v30 = vmul.f32 %v2150_v60, %v2115_v23  ;;  %v2165_v18 = vmul.f32 %v2146_v20, %v2114_v19  ;;  %v4766_v16 = vld [vmem:[#allocation11 + $0x540] ss:$8 sps:$4 sm:$0xff]   ;;  %v4769_v36 = vld [vmem:[#allocation11 + $0x550] ss:$8 sps:$4 sm:$0xff]   ;;  %v4774_v0 = vld [vmem:[#allocation11 + $0x564] ss:$8 sps:$4 sm:$0xff]  }
 0x6ce   :  { %v6501_v49 = vadd.f32 %v2177_v37, %v2160_v22  ;;  %v6503_v55 = vadd.f32 %v2173_v4, %v2159_v59  ;;  %v6505_v26 = vadd.f32 %v2185_v51, %v2162_v61  ;;  %v6507_v58 = vadd.f32 %v2181_v42, %v2161_v5  ;;  %v4765_v37 = vld [vmem:[#allocation11 + $0x534] ss:$8 sps:$4 sm:$0xff]   ;;  %v4768_v4 = vld [vmem:[#allocation11 + $0x544] ss:$8 sps:$4 sm:$0xff]   ;;  %v4772_v42 = vld [vmem:[#allocation11 + $0x560] ss:$8 sps:$4 sm:$0xff]  }
 0x6cf   :  { %v6509_v12 = vadd.f32 %v2193_v8, %v2164_v10  ;;  %v6511_v13 = vadd.f32 %v2189_v31, %v2163_v47  ;;  %v6513_v48 = vadd.f32 %v2201_v9, %v2166_v30  ;;  %v6515_v24 = vadd.f32 %v2197_v27, %v2165_v18  ;;  %v4771_v51 = vld [vmem:[#allocation11 + $0x554] ss:$8 sps:$4 sm:$0xff]   ;;  %v4775_v60 = vld [vmem:[#allocation11 + $0x570] ss:$8 sps:$4 sm:$0xff]   ;;  %v4780_v20 = vld [vmem:[#allocation11 + $0x584] ss:$8 sps:$4 sm:$0xff]  }
 0x6d0   :  { %v2219_v29 = vpack.c.bf16 %v6501_v49, %v6501_v49  ;;  %v2218_v7 = vpack.c.bf16 %v6503_v55, %v6503_v55  ;;  %v2221_v28 = vpack.c.bf16 %v6505_v26, %v6505_v26  ;;  %v4777_v11 = vld [vmem:[#allocation11 + $0x574] ss:$8 sps:$4 sm:$0xff]   ;;  %v4781_v31 = vld [vmem:[#allocation11 + $0x590] ss:$8 sps:$4 sm:$0xff]   ;;  %v4786_v9 = vld [vmem:[#allocation11 + $0x5a4] ss:$8 sps:$4 sm:$0xff]   ;;  %v2220_v10 = vpack.c.bf16 %v6507_v58, %v6507_v58 }
 0x6d1   :  { %v4783_v8 = vld [vmem:[#allocation11 + $0x594] ss:$8 sps:$4 sm:$0xff]   ;;  %v4784_v27 = vld [vmem:[#allocation11 + $0x5a0] ss:$8 sps:$4 sm:$0xff]   ;;  %v4787_v50 = vld [vmem:[#allocation11 + $0x5b0] ss:$8 sps:$4 sm:$0xff]   ;;  %v2223_v30 = vpack.c.bf16 %v6509_v12, %v6509_v12 }
 0x6d2   :  { %3027 = vmatprep.mubr.bf16.mxu1 %v2219_v29  ;;  %v4792_v3 = vld [vmem:[#allocation11 + $0x5c4] ss:$8 sps:$4 sm:$0xff]   ;;  %v4790_v6 = vld [vmem:[#allocation11 + $0x5c0] ss:$8 sps:$4 sm:$0xff]   ;;  %v4795_v35 = vld [vmem:[#allocation11 + $0x5d4] ss:$8 sps:$4 sm:$0xff]  }
 0x6d3   :  { %3028 = vmatmul.mubr.bf16.vlgmr.msra.gmra.mrb[0].mxu1 %v2218_v7  ;;  %v4793_v33 = vld [vmem:[#allocation11 + $0x5d0] ss:$8 sps:$4 sm:$0xff]   ;;  %v4798_v23 = vld [vmem:[#allocation11 + $0x5e4] ss:$8 sps:$4 sm:$0xff]   ;;  %v4796_v19 = vld [vmem:[#allocation11 + $0x5e0] ss:$8 sps:$4 sm:$0xff]  }
 0x6d4   :  { %3037 = vmatpush1.bf16.msra.mxu1 %v4754_v21  ;;  %3068 = vmatprep.mubr.bf16.mxu1 %v2221_v28  ;;  %v4801_v22 = vld [vmem:[#allocation11 + $0x5f4] ss:$8 sps:$4 sm:$0xff]   ;;  %v4799_v59 = vld [vmem:[#allocation11 + $0x5f0] ss:$8 sps:$4 sm:$0xff]   ;;  %v4804_v61 = vld [vmem:[#allocation11 + $0x604] ss:$8 sps:$4 sm:$0xff]  }
 0x6d5   :  { %3038 = vmatprep.subr.bf16.mxu1 %v4759_v1  ;;  %v4802_v5 = vld [vmem:[#allocation11 + $0x600] ss:$8 sps:$4 sm:$0xff]   ;;  %v4807_v47 = vld [vmem:[#allocation11 + $0x614] ss:$8 sps:$4 sm:$0xff]   ;;  %v4805_v18 = vld [vmem:[#allocation11 + $0x610] ss:$8 sps:$4 sm:$0xff]  }
 0x6d6   :  { %v4810_v29 = vld [vmem:[#allocation11 + $0x624] ss:$8 sps:$4 sm:$0xff]   ;;  %v4808_v21 = vld [vmem:[#allocation11 + $0x620] ss:$8 sps:$4 sm:$0xff]   ;;  %v4813_v7 = vld [vmem:[#allocation11 + $0x634] ss:$8 sps:$4 sm:$0xff]  }
 0x6d7   :  { %v4811_v1 = vld [vmem:[#allocation11 + $0x630] ss:$8 sps:$4 sm:$0xff]   ;;  %v4816_v28 = vld [vmem:[#allocation11 + $0x644] ss:$8 sps:$4 sm:$0xff]  }
 0x6d8   :  { %3039 = vmatpush1.bf16.msra.mxu1 %v4757_v53  ;;  %v4814_v53 = vld [vmem:[#allocation11 + $0x640] ss:$8 sps:$4 sm:$0xff]  }
 0x6d9   :  { %3040 = vmatprep.subr.bf16.mxu1 %v4762_v2  ;;  %v4819_v2 = vld [vmem:[#allocation11 + $0x654] ss:$8 sps:$4 sm:$0xff]  }
 0x6dc   :  { %3041 = vmatpush1.bf16.msra.mxu1 %v4760_v56  ;;  %v4817_v56 = vld [vmem:[#allocation11 + $0x650] ss:$8 sps:$4 sm:$0xff]  }
 0x6dd   :  { %3042 = vmatprep.subr.bf16.mxu1 %v4765_v37  ;;  %v4822_v37 = vld [vmem:[#allocation11 + $0x664] ss:$8 sps:$4 sm:$0xff]  }
 0x6e0   :  { %3043 = vmatpush1.bf16.msra.mxu1 %v4763_v15  ;;  %v4820_v15 = vld [vmem:[#allocation11 + $0x660] ss:$8 sps:$4 sm:$0xff]  }
 0x6e1   :  { %3044 = vmatprep.subr.bf16.mxu1 %v4768_v4  ;;  %v4825_v4 = vld [vmem:[#allocation11 + $0x674] ss:$8 sps:$4 sm:$0xff]  }
 0x6e4   :  { %3045 = vmatpush1.bf16.msra.mxu1 %v4766_v16  ;;  %v4823_v16 = vld [vmem:[#allocation11 + $0x670] ss:$8 sps:$4 sm:$0xff]  }
 0x6e5   :  { %3046 = vmatprep.subr.bf16.mxu1 %v4771_v51  ;;  %v4828_v51 = vld [vmem:[#allocation11 + $0x684] ss:$8 sps:$4 sm:$0xff]  }
 0x6e8   :  { %3047 = vmatpush1.bf16.msra.mxu1 %v4769_v36  ;;  %v4826_v36 = vld [vmem:[#allocation11 + $0x680] ss:$8 sps:$4 sm:$0xff]  }
 0x6e9   :  { %3048 = vmatprep.subr.bf16.mxu1 %v4774_v0  ;;  %v4831_v0 = vld [vmem:[#allocation11 + $0x694] ss:$8 sps:$4 sm:$0xff]  }
 0x6ec   :  { %3049 = vmatpush1.bf16.msra.mxu1 %v4772_v42  ;;  %v4829_v42 = vld [vmem:[#allocation11 + $0x690] ss:$8 sps:$4 sm:$0xff]  }
 0x6ed   :  { %3050 = vmatprep.subr.bf16.mxu1 %v4777_v11  ;;  %v4834_v11 = vld [vmem:[#allocation11 + $0x6a4] ss:$8 sps:$4 sm:$0xff]  }
 0x6f0   :  { %3051 = vmatpush1.bf16.msra.mxu1 %v4775_v60  ;;  %v4832_v60 = vld [vmem:[#allocation11 + $0x6a0] ss:$8 sps:$4 sm:$0xff]  }
 0x6f1   :  { %3052 = vmatprep.subr.bf16.mxu1 %v4780_v20  ;;  %v4837_v20 = vld [vmem:[#allocation11 + $0x6b4] ss:$8 sps:$4 sm:$0xff]  }
 0x6f4   :  { %3053 = vmatpush1.bf16.msra.mxu1 %v4778_v32  ;;  %v4835_v32 = vld [vmem:[#allocation11 + $0x6b0] ss:$8 sps:$4 sm:$0xff]  }
 0x6f5   :  { %3054 = vmatprep.subr.bf16.mxu1 %v4783_v8  ;;  %v4840_v8 = vld [vmem:[#allocation11 + $0x6c4] ss:$8 sps:$4 sm:$0xff]  }
 0x6f8   :  { %3055 = vmatpush1.bf16.msra.mxu1 %v4781_v31  ;;  %v4838_v31 = vld [vmem:[#allocation11 + $0x6c0] ss:$8 sps:$4 sm:$0xff]  }
 0x6f9   :  { %3056 = vmatprep.subr.bf16.mxu1 %v4786_v9  ;;  %v4843_v9 = vld [vmem:[#allocation11 + $0x6d4] ss:$8 sps:$4 sm:$0xff]  }
 0x6fc   :  { %3057 = vmatpush1.bf16.msra.mxu1 %v4784_v27  ;;  %v4841_v27 = vld [vmem:[#allocation11 + $0x6d0] ss:$8 sps:$4 sm:$0xff]  }
 0x6fd   :  { %3058 = vmatprep.subr.bf16.mxu1 %v4789_v14  ;;  %v4846_v14 = vld [vmem:[#allocation11 + $0x6e4] ss:$8 sps:$4 sm:$0xff]  }
 0x700   :  { %3059 = vmatpush1.bf16.msra.mxu1 %v4787_v50  ;;  %v4844_v50 = vld [vmem:[#allocation11 + $0x6e0] ss:$8 sps:$4 sm:$0xff]  }
 0x701   :  { %3060 = vmatprep.subr.bf16.mxu1 %v4792_v3  ;;  %v4849_v3 = vld [vmem:[#allocation11 + $0x6f4] ss:$8 sps:$4 sm:$0xff]  }
 0x704   :  { %3061 = vmatpush1.bf16.msra.mxu1 %v4790_v6  ;;  %v4847_v6 = vld [vmem:[#allocation11 + $0x6f0] ss:$8 sps:$4 sm:$0xff]  }
 0x705   :  { %3062 = vmatprep.subr.bf16.mxu1 %v4795_v35  ;;  %v4852_v35 = vld [vmem:[#allocation11 + $0x704] ss:$8 sps:$4 sm:$0xff]  }
 0x708   :  { %3063 = vmatpush1.bf16.msra.mxu1 %v4793_v33  ;;  %v4850_v33 = vld [vmem:[#allocation11 + $0x700] ss:$8 sps:$4 sm:$0xff]  }
 0x709   :  { %3064 = vmatprep.subr.bf16.mxu1 %v4798_v23  ;;  %v2222_v23 = vpack.c.bf16 %v6511_v13, %v6511_v13 }
 0x70c   :  { %3065 = vmatpush1.bf16.msra.mxu1 %v4796_v19  ;;  %v4855_v19 = vld [vmem:[#allocation11 + $0x714] ss:$8 sps:$4 sm:$0xff]  }
 0x70d   :  { %3066 = vmatprep.subr.bf16.mxu1 %v4801_v22  ;;  %v2225_v22 = vpack.c.bf16 %v6513_v48, %v6513_v48 }
 0x710   :  { %3067 = vmatpush1.bf16.msra.mxu1 %v4799_v59  ;;  %v4853_v59 = vld [vmem:[#allocation11 + $0x710] ss:$8 sps:$4 sm:$0xff]  }
 0x711   :  { %3077 = vmatprep.subr.bf16.mxu1 %v4804_v61  ;;  %v4858_v61 = vld [vmem:[#allocation11 + $0x724] ss:$8 sps:$4 sm:$0xff]  }
 0x713   :  { %3069 = vmatmul.mubr.bf16.vlgmr.msra.gmra.mrb[0].mxu1 %v2220_v10  ;;  %v4861_v10 = vld [vmem:[#allocation11 + $0x734] ss:$8 sps:$4 sm:$0xff]  }
 0x714   :  { %3078 = vmatpush1.bf16.msra.mxu1 %v4802_v5  ;;  %3109 = vmatprep.mubr.bf16.mxu1 %v2223_v30  ;;  %v4856_v5 = vld [vmem:[#allocation11 + $0x720] ss:$8 sps:$4 sm:$0xff]   ;;  %v4864_v30 = vld [vmem:[#allocation11 + $0x744] ss:$8 sps:$4 sm:$0xff]  }
 0x715   :  { %3079 = vmatprep.subr.bf16.mxu1 %v4807_v47  ;;  %v4859_v47 = vld [vmem:[#allocation11 + $0x730] ss:$8 sps:$4 sm:$0xff]  }
 0x718   :  { %3080 = vmatpush1.bf16.msra.mxu1 %v4805_v18  ;;  %v4862_v18 = vld [vmem:[#allocation11 + $0x740] ss:$8 sps:$4 sm:$0xff]  }
 0x719   :  { %3081 = vmatprep.subr.bf16.mxu1 %v4810_v29  ;;  %v4867_v29 = vld [vmem:[#allocation11 + $0x754] ss:$8 sps:$4 sm:$0xff]  }
 0x71c   :  { %3082 = vmatpush1.bf16.msra.mxu1 %v4808_v21  ;;  %v4865_v21 = vld [vmem:[#allocation11 + $0x750] ss:$8 sps:$4 sm:$0xff]  }
 0x71d   :  { %3083 = vmatprep.subr.bf16.mxu1 %v4813_v7  ;;  %v4870_v7 = vld [vmem:[#allocation11 + $0x764] ss:$8 sps:$4 sm:$0xff]  }
 0x720   :  { %3084 = vmatpush1.bf16.msra.mxu1 %v4811_v1  ;;  %v4868_v1 = vld [vmem:[#allocation11 + $0x760] ss:$8 sps:$4 sm:$0xff]  }
 0x721   :  { %3085 = vmatprep.subr.bf16.mxu1 %v4816_v28  ;;  %v4873_v28 = vld [vmem:[#allocation11 + $0x774] ss:$8 sps:$4 sm:$0xff]  }
 0x724   :  { %3086 = vmatpush1.bf16.msra.mxu1 %v4814_v53  ;;  %v4871_v53 = vld [vmem:[#allocation11 + $0x770] ss:$8 sps:$4 sm:$0xff]  }
 0x725   :  { %3087 = vmatprep.subr.bf16.mxu1 %v4819_v2  ;;  %v4876_v2 = vld [vmem:[#allocation11 + $0x784] ss:$8 sps:$4 sm:$0xff]  }
 0x728   :  { %3088 = vmatpush1.bf16.msra.mxu1 %v4817_v56  ;;  %v4874_v56 = vld [vmem:[#allocation11 + $0x780] ss:$8 sps:$4 sm:$0xff]  }
 0x729   :  { %3089 = vmatprep.subr.bf16.mxu1 %v4822_v37  ;;  %v4879_v37 = vld [vmem:[#allocation11 + $0x794] ss:$8 sps:$4 sm:$0xff]  }
 0x72c   :  { %3090 = vmatpush1.bf16.msra.mxu1 %v4820_v15  ;;  %v4877_v15 = vld [vmem:[#allocation11 + $0x790] ss:$8 sps:$4 sm:$0xff]  }
 0x72d   :  { %3091 = vmatprep.subr.bf16.mxu1 %v4825_v4  ;;  %v4882_v4 = vld [vmem:[#allocation11 + $0x7a4] ss:$8 sps:$4 sm:$0xff]  }
 0x730   :  { %3092 = vmatpush1.bf16.msra.mxu1 %v4823_v16  ;;  %v4880_v16 = vld [vmem:[#allocation11 + $0x7a0] ss:$8 sps:$4 sm:$0xff]  }
 0x731   :  { %3093 = vmatprep.subr.bf16.mxu1 %v4828_v51  ;;  %v4885_v51 = vld [vmem:[#allocation11 + $0x7b4] ss:$8 sps:$4 sm:$0xff]  }
 0x734   :  { %3094 = vmatpush1.bf16.msra.mxu1 %v4826_v36  ;;  %v4883_v36 = vld [vmem:[#allocation11 + $0x7b0] ss:$8 sps:$4 sm:$0xff]  }
 0x735   :  { %3095 = vmatprep.subr.bf16.mxu1 %v4831_v0  ;;  %v4888_v0 = vld [vmem:[#allocation11 + $0x7c4] ss:$8 sps:$4 sm:$0xff]  }
 0x738   :  { %3096 = vmatpush1.bf16.msra.mxu1 %v4829_v42  ;;  %v4886_v42 = vld [vmem:[#allocation11 + $0x7c0] ss:$8 sps:$4 sm:$0xff]  }
 0x739   :  { %3097 = vmatprep.subr.bf16.mxu1 %v4834_v11  ;;  %v4891_v11 = vld [vmem:[#allocation11 + $0x7d4] ss:$8 sps:$4 sm:$0xff]  }
 0x73c   :  { %3098 = vmatpush1.bf16.msra.mxu1 %v4832_v60  ;;  %v4889_v60 = vld [vmem:[#allocation11 + $0x7d0] ss:$8 sps:$4 sm:$0xff]  }
 0x73d   :  { %3099 = vmatprep.subr.bf16.mxu1 %v4837_v20  ;;  %v4894_v20 = vld [vmem:[#allocation11 + $0x7e4] ss:$8 sps:$4 sm:$0xff]  }
 0x740   :  { %3100 = vmatpush1.bf16.msra.mxu1 %v4835_v32  ;;  %v4892_v32 = vld [vmem:[#allocation11 + $0x7e0] ss:$8 sps:$4 sm:$0xff]  }
 0x741   :  { %3101 = vmatprep.subr.bf16.mxu1 %v4840_v8  ;;  %v4897_v8 = vld [vmem:[#allocation11 + $0x7f4] ss:$8 sps:$4 sm:$0xff]  }
 0x744   :  { %3102 = vmatpush1.bf16.msra.mxu1 %v4838_v31  ;;  %v4895_v31 = vld [vmem:[#allocation11 + $0x7f0] ss:$8 sps:$4 sm:$0xff]  }
 0x745   :  { %3103 = vmatprep.subr.bf16.mxu1 %v4843_v9  ;;  %v2224_v9 = vpack.c.bf16 %v6515_v24, %v6515_v24 }
 0x748   :  { %3104 = vmatpush1.bf16.msra.mxu1 %v4841_v27 }
 0x749   :  { %3105 = vmatprep.subr.bf16.mxu1 %v4846_v14 }
 0x74c   :  { %3106 = vmatpush1.bf16.msra.mxu1 %v4844_v50 }
 0x74d   :  { %3107 = vmatprep.subr.bf16.mxu1 %v4849_v3 }
 0x750   :  { %3108 = vmatpush1.bf16.msra.mxu1 %v4847_v6 }
 0x751   :  { %3118 = vmatprep.subr.bf16.mxu1 %v4852_v35 }
 0x753   :  { %3110 = vmatmul.mubr.bf16.vlgmr.msra.gmra.mrb[0].mxu1 %v2222_v23 }
 0x754   :  { %3119 = vmatpush1.bf16.msra.mxu1 %v4850_v33  ;;  %3150 = vmatprep.mubr.bf16.mxu1 %v2225_v22 }
 0x755   :  { %3120 = vmatprep.subr.bf16.mxu1 %v4855_v19 }
 0x758   :  { %3121 = vmatpush1.bf16.msra.mxu1 %v4853_v59 }
 0x759   :  { %3122 = vmatprep.subr.bf16.mxu1 %v4858_v61 }
 0x75c   :  { %3123 = vmatpush1.bf16.msra.mxu1 %v4856_v5 }
 0x75d   :  { %3124 = vmatprep.subr.bf16.mxu1 %v4861_v10 }
 0x760   :  { %3125 = vmatpush1.bf16.msra.mxu1 %v4859_v47 }
 0x761   :  { %3126 = vmatprep.subr.bf16.mxu1 %v4864_v30 }
 0x764   :  { %3127 = vmatpush1.bf16.msra.mxu1 %v4862_v18 }
 0x765   :  { %3128 = vmatprep.subr.bf16.mxu1 %v4867_v29 }
 0x768   :  { %3129 = vmatpush1.bf16.msra.mxu1 %v4865_v21 }
 0x769   :  { %3130 = vmatprep.subr.bf16.mxu1 %v4870_v7 }
 0x76c   :  { %3131 = vmatpush1.bf16.msra.mxu1 %v4868_v1 }
 0x76d   :  { %3132 = vmatprep.subr.bf16.mxu1 %v4873_v28 }
 0x770   :  { %3133 = vmatpush1.bf16.msra.mxu1 %v4871_v53 }
 0x771   :  { %3134 = vmatprep.subr.bf16.mxu1 %v4876_v2 }
 0x774   :  { %3135 = vmatpush1.bf16.msra.mxu1 %v4874_v56 }
 0x775   :  { %3136 = vmatprep.subr.bf16.mxu1 %v4879_v37 }
 0x778   :  { %3137 = vmatpush1.bf16.msra.mxu1 %v4877_v15 }
 0x779   :  { %3138 = vmatprep.subr.bf16.mxu1 %v4882_v4 }
 0x77c   :  { %3139 = vmatpush1.bf16.msra.mxu1 %v4880_v16 }
 0x77d   :  { %3140 = vmatprep.subr.bf16.mxu1 %v4885_v51 }
 0x780   :  { %3141 = vmatpush1.bf16.msra.mxu1 %v4883_v36 }
 0x781   :  { %3142 = vmatprep.subr.bf16.mxu1 %v4888_v0 }
 0x784   :  { %3143 = vmatpush1.bf16.msra.mxu1 %v4886_v42 }
 0x785   :  { %3144 = vmatprep.subr.bf16.mxu1 %v4891_v11 }
 0x788   :  { %3145 = vmatpush1.bf16.msra.mxu1 %v4889_v60  ;;  %v3251_v60 = vstv %s6535_s11  ;;  %s6797_s11 = sld [smem:[#allocation14 + $0x9d]] }
 0x789   :  { %3146 = vmatprep.subr.bf16.mxu1 %v4894_v20  ;;  %v3254_v20 = vstv %s6533_s21  ;;  %s6795_s21 = sld [smem:[#allocation14 + $0x9c]] }
 0x78c   :  { %3147 = vmatpush1.bf16.msra.mxu1 %v4892_v32  ;;  %v3258_v32 = vstv %s6537_s8  ;;  %s6799_s8 = sld [smem:[#allocation14 + $0x9e]] }
 0x78d   :  { %3148 = vmatprep.subr.bf16.mxu1 %v4897_v8  ;;  %v3264_v8 = vstv %s6539_s9  ;;  %s6801_s9 = sld [smem:[#allocation14 + $0x9f]] }
 0x78e   :  { %8063 = sst [smem:[#allocation28_spill]] %s6797_s11  ;;  %s6980_s11 = sld [smem:[#allocation14 + $0xd4]] }
 0x78f   :  { %8062 = sst [smem:[#allocation30_spill]] %s6795_s21  ;;  %s6948_s21 = sld [smem:[#allocation14 + $0xde]] }
 0x790   :  { %3149 = vmatpush1.bf16.msra.mxu1 %v4895_v31  ;;  %v3270_v31 = vstv %s6541_s10  ;;  %s6803_s10 = sld [smem:[#allocation14 + $0xb7]] }
 0x792   :  { %8064 = sst [smem:[#allocation31_spill]] %s6799_s8  ;;  %s6986_s8 = sld [smem:[#allocation14 + $0xd5]] }
 0x793   :  { %3151 = vmatmul.mubr.bf16.vlgmr.msra.gmra.mrb[0].mxu1 %v2224_v9  ;;  %v3277_v9 = vstv %s6545_s16  ;;  %8065 = sst [smem:[#allocation33_spill]] %s6801_s9  ;;  %s6807_s16 = sld [smem:[#allocation14 + $0xa1]] }
 0x796   :  { %8066 = sst [smem:[#allocation32_spill]] %s6803_s10  ;;  %s6988_s10 = sld [smem:[#allocation14 + $0xd6]] }
 0x799   :  { %8068 = sst [smem:[#allocation35_spill]] %s6807_s16 }
 0x866   :  { %v3152_v27 = vpop.f32.mrb[0].mxu1 }
 0x867   :  { %v3159_v14 = vrot.slane %v3152_v27, 4  ;;  %v3154_v50 = vpop.f32.mrb[1].mxu1 }
 0x868   :  { %v3165_v3 = vrot.slane %v3154_v50, 4  ;;  %v3156_v6 = vpop.f32.mrb[2].mxu1 }
 0x869   :  { %v3160_v35 = vmax.f32 %v3152_v27, %v3159_v14  ;;  %v3157_v33 = vpop.f32.mrb[3].mxu1  ;;  %v3280_v14 = vstv %s6543_s1  ;;  %v3296_v6 = vstv %s6551_s27  ;;  %s6805_s1 = sld [smem:[#allocation14 + $0xa0]] }
 0x86a   :  { %v3166_v23 = vmax.f32 %v3154_v50, %v3165_v3  ;;  %v3290_v3 = vstv %s6549_s12  ;;  %s6811_s12 = sld [smem:[#allocation14 + $0xa3]]  ;;  %s6813_s27 = sld [smem:[#allocation14 + $0xb8]] }
 0x86b   :  { %v3161_v19 = vrot.slane %v3160_v35, 2 }
 0x86c   :  { %v3167_v22 = vrot.slane %v3166_v23, 2 }
 0x86d   :  { %v3162_v59 = vmax.f32 %v3160_v35, %v3161_v19  ;;  %v3306_v19 = vstv %s6553_s20  ;;  %s6815_s20 = sld [smem:[#allocation14 + $0xa4]] }
 0x86e   :  { %v3168_v61 = vmax.f32 %v3166_v23, %v3167_v22  ;;  %v3303_v23 = vstv %s6555_s0  ;;  %v3310_v22 = vstv %s6557_s7  ;;  %s6817_s0 = sld [smem:[#allocation14 + $0xa5]]  ;;  %s6819_s7 = sld [smem:[#allocation14 + $0xa6]] }
 0x86f   :  { %v3163_v5 = vrot.slane %v3162_v59, 1  ;;  %8067 = sst [smem:[#allocation34_spill]] %s6805_s1  ;;  %s6957_s1 = sld [smem:[#allocation14 + $0xce]] }
 0x870   :  { %v3169_v10 = vrot.slane %v3168_v61, 1  ;;  %8070 = sst [smem:[#allocation38_spill]] %s6811_s12  ;;  %s8085_s12 = sld [smem:[#allocation77_spill]] }
 0x871   :  { %v3164_v47 = vmax.f32 %v3162_v59, %v3163_v5  ;;  %v3322_v5 = vstv %s6561_s14  ;;  %8071 = sst [smem:[#allocation39_spill]] %s6813_s27  ;;  %s6823_s14 = sld [smem:[#allocation14 + $0xa8]] }
 0x872   :  { %v3170_v30 = vmax.f32 %v3168_v61, %v3169_v10  ;;  %v3316_v61 = vstv %s6559_s28  ;;  %v3329_v10 = vstv %s6563_s5  ;;  %s6821_s28 = sld [smem:[#allocation14 + $0xa7]]  ;;  %s6825_s5 = sld [smem:[#allocation14 + $0xb9]] }
 0x873   :  { %v3171_v18 = vsub.f32 %v3152_v27, %v3164_v47  ;;  %8072 = sst [smem:[#allocation37_spill]] %s6815_s20  ;;  %s6835_s27 = sld [smem:[#allocation14 + $0xad]] }
 0x874   :  { %v3172_v29 = vsub.f32 %v3154_v50, %v3170_v30  ;;  %v3284_v50 = vstv %s6547_s29  ;;  %s6809_s29 = sld [smem:[#allocation14 + $0xa2]]  ;;  %8074 = sst [smem:[#allocation43_spill]] %s6819_s7 }
 0x875   :  { %v3173_v21 = vmul.f32 1.442695, %v3171_v18  ;;  %8073 = sst [smem:[#allocation40_spill]] %s6817_s0  ;;  %s6839_s0 = sld [smem:[#allocation14 + $0xae]] }
 0x876   :  { %v3175_v7 = vmul.f32 1.442695, %v3172_v29  ;;  %s6837_s20 = sld [smem:[#allocation14 + $0xba]]  ;;  %s6862_s7 = sld [smem:[#allocation14 + $0xbc]] }
 0x877   :  { %4912 = vpow2.f32 %v3173_v21  ;;  %8076 = sst [smem:[#allocation44_spill]] %s6823_s14 }
 0x878   :  { %4914 = vpow2.f32 %v3175_v7  ;;  %8075 = sst [smem:[#allocation41_spill]] %s6821_s28  ;;  %s6874_s28 = sld [smem:[#allocation14 + $0xbe]] }
 0x879   :  { %8077 = sst [smem:[#allocation42_spill]] %s6825_s5  ;;  %s6846_s5 = sld [smem:[#allocation14 + $0xaf]] }
 0x87a   :  { %8069 = sst [smem:[#allocation36_spill]] %s6809_s29 }
 0x87b   :  { %8082 = sst [smem:[#allocation46_spill]] %s6835_s27  ;;  %s6856_s27 = sld [smem:[#allocation14 + $0xb2]] }
 0x87c   :  { %8083 = sst [smem:[#allocation50_spill]] %s6837_s20  ;;  %s6858_s20 = sld [smem:[#allocation14 + $0xb3]] }
 0x87d   :  { %8084 = sst [smem:[#allocation51_spill]] %s6839_s0 }
 0x87e   :  { %8090 = sst [smem:[#allocation68_spill]] %s6862_s7  ;;  %s6911_s7 = sld [smem:[#allocation14 + $0xdd]] }
 0x87f   :  { %8086 = sst [smem:[#allocation53_spill]] %s6846_s5  ;;  %s8120_s23 = sld [smem:[#allocation68_spill]] }
 0x880   :  { %8092 = sst [smem:[#allocation69_spill]] %s6874_s28  ;;  %s6888_s28 = sld [smem:[#allocation14 + $0xc0]] }
 0x881   :  { %v4913_v1 = vpop.eup %4912  ;;  %8088 = sst [smem:[#allocation55_spill]] %s6856_s27  ;;  %s8124_s29 = sld [smem:[#allocation69_spill]] }
 0x882   :  { %v4915_v28 = vpop.eup %4914  ;;  %v3177_v53 = vrot.slane %v4913_v1, 4  ;;  %8089 = sst [smem:[#allocation64_spill]] %s6858_s20  ;;  %s6876_s20 = sld [smem:[#allocation14 + $0xbf]] }
 0x883   :  { %v3183_v2 = vrot.slane %v4915_v28, 4  ;;  %8115 = sst [smem:[#allocation73_spill]] %s6957_s1  ;;  %s8134_s0 = sld [smem:[#allocation59_spill]] }
 0x884   :  { %v3178_v56 = vadd.f32 %v4913_v1, %v3177_v53  ;;  %8121 = sst [smem:[#allocation68_spill]] %s6972_s15  ;;  %s8149_s27 = sld [smem:[#allocation26_spill]] }
 0x885   :  { %v3184_v37 = vadd.f32 %v4915_v28, %v3183_v2  ;;  %8129 = sst [smem:[#allocation69_spill]] %s6980_s11 }
 0x886   :  { %v3179_v15 = vrot.slane %v3178_v56, 2  ;;  %8095 = sst [smem:[#allocation70_spill]] %s6888_s28  ;;  %s6909_s28 = sld [smem:[#allocation14 + $0xc3]] }
 0x887   :  { %v3185_v4 = vrot.slane %v3184_v37, 2  ;;  %s8141_s14 = sld [smem:[#allocation69_spill]] }
 0x888   :  { %v3180_v16 = vadd.f32 %v3179_v15, %v3178_v56  ;;  %8093 = sst [smem:[#allocation71_spill]] %s6876_s20  ;;  %s7128_s15 = sld [smem:[#allocation14 + $0xdf]] }
 0x889   :  { %v3186_v51 = vadd.f32 %v3185_v4, %v3184_v37  ;;  %s6898_s20 = sld [smem:[#allocation14 + $0xc1]]  ;;  %s7130_s5 = sld [smem:[#allocation14 + $0xd7]] }
 0x88a   :  { %v3181_v36 = vrot.slane %v3180_v16, 1  ;;  %s8125_s16 = sld [smem:[#allocation71_spill]] }
 0x88b   :  { %v3187_v0 = vrot.slane %v3186_v51, 1  ;;  %8131 = sst [smem:[#allocation71_spill]] %s6986_s8 }
 0x88c   :  { %v3182_v42 = vadd.f32 %v3181_v36, %v3180_v16 }
 0x88d   :  { %v3188_v11 = vadd.f32 %v3187_v0, %v3186_v51 }
 0x88e   :  { %4916 = vrcp.f32 %v3182_v42 }
 0x88f   :  { %4918 = vrcp.f32 %v3188_v11  ;;  %8096 = sst [smem:[#allocation57_spill]] %s6898_s20  ;;  %s6919_s20 = sld [smem:[#allocation14 + $0xc5]] }
 0x898   :  { %v4917_v27 = vpop.eup %4916 }
 0x899   :  { %v4919_v35 = vpop.eup %4918  ;;  %v3191_v33 = vmul.f32 %v4917_v27, %v4913_v1 }
 0x89a   :  { %v3192_v59 = vmul.f32 %v4919_v35, %v4915_v28 }
 0x89b   :  { %v3193_v47 = vmul.f32 %v3191_v33, %v6503_v55  ;;  %v3207_v30 = vmul.f32 %v3191_v33, %v6507_v58  ;;  %v3221_v18 = vmul.f32 %v3191_v33, %v6511_v13  ;;  %v3235_v29 = vmul.f32 %v3191_v33, %v6515_v24 }
 0x89c   :  { %v3194_v21 = vmul.f32 %v3192_v59, %v6501_v49  ;;  %v3208_v7 = vmul.f32 %v3192_v59, %v6505_v26  ;;  %v3222_v1 = vmul.f32 %v3192_v59, %v6509_v12  ;;  %v3236_v53 = vmul.f32 %v3192_v59, %v6513_v48 }
 0x89d   :  { %v3195_v28 = vrot.slane %v3193_v47, 4  ;;  %v3209_v2 = vrot.slane %v3207_v30, 4  ;;  %v3223_v56 = vrot.slane %v3221_v18, 4  ;;  %v3237_v37 = vrot.slane %v3235_v29, 4 }
 0x89e   :  { %v3201_v15 = vrot.slane %v3194_v21, 4  ;;  %v3215_v55 = vrot.slane %v3208_v7, 4  ;;  %v3229_v4 = vrot.slane %v3222_v1, 4  ;;  %v3243_v58 = vrot.slane %v3236_v53, 4 }
 0x89f   :  { %v3196_v16 = vadd.f32 %v3195_v28, %v3193_v47  ;;  %v3210_v13 = vadd.f32 %v3209_v2, %v3207_v30  ;;  %v3224_v51 = vadd.f32 %v3223_v56, %v3221_v18  ;;  %v3238_v24 = vadd.f32 %v3237_v37, %v3235_v29 }
 0x8a0   :  { %v3202_v49 = vadd.f32 %v3201_v15, %v3194_v21  ;;  %v3216_v26 = vadd.f32 %v3215_v55, %v3208_v7  ;;  %v3230_v36 = vadd.f32 %v3229_v4, %v3222_v1  ;;  %v3244_v12 = vadd.f32 %v3243_v58, %v3236_v53 }
 0x8a1   :  { %v3197_v48 = vrot.slane %v3196_v16, 2  ;;  %v3211_v0 = vrot.slane %v3210_v13, 2  ;;  %v3225_v42 = vrot.slane %v3224_v51, 2  ;;  %v3239_v11 = vrot.slane %v3238_v24, 2 }
 0x8a2   :  { %v3203_v27 = vrot.slane %v3202_v49, 2  ;;  %v3217_v35 = vrot.slane %v3216_v26, 2  ;;  %v3231_v33 = vrot.slane %v3230_v36, 2  ;;  %v3245_v59 = vrot.slane %v3244_v12, 2 }
 0x8a3   :  { %v3198_v47 = vadd.f32 %v3197_v48, %v3196_v16  ;;  %v3212_v30 = vadd.f32 %v3211_v0, %v3210_v13  ;;  %v3226_v18 = vadd.f32 %v3225_v42, %v3224_v51  ;;  %v3240_v29 = vadd.f32 %v3239_v11, %v3238_v24 }
 0x8a4   :  { %v3204_v21 = vadd.f32 %v3203_v27, %v3202_v49  ;;  %v3218_v7 = vadd.f32 %v3217_v35, %v3216_v26  ;;  %v3232_v1 = vadd.f32 %v3231_v33, %v3230_v36  ;;  %v3246_v53 = vadd.f32 %v3245_v59, %v3244_v12 }
 0x8a5   :  { %v3199_v28 = vrot.slane %v3198_v47, 1  ;;  %v3213_v2 = vrot.slane %v3212_v30, 1  ;;  %v3227_v56 = vrot.slane %v3226_v18, 1  ;;  %v3241_v37 = vrot.slane %v3240_v29, 1 }
 0x8a6   :  { %v3205_v15 = vrot.slane %v3204_v21, 1  ;;  %v3219_v55 = vrot.slane %v3218_v7, 1  ;;  %v3233_v4 = vrot.slane %v3232_v1, 1  ;;  %v3247_v58 = vrot.slane %v3246_v53, 1 }
 0x8a7   :  { %v3200_v16 = vadd.f32 %v3199_v28, %v3198_v47  ;;  %v3214_v13 = vadd.f32 %v3213_v2, %v3212_v30  ;;  %v6597_v51 = vadd.f32 %v3227_v56, %v3226_v18  ;;  %v3332_v24 = vstv %s6589_s25  ;;  %s6827_s25 = sld [smem:[#allocation14 + $0xa9]] }
 0x8a8   :  { %v3206_v49 = vadd.f32 %v3205_v15, %v3204_v21  ;;  %v3220_v26 = vadd.f32 %v3219_v55, %v3218_v7  ;;  %v6600_v36 = vadd.f32 %v3233_v4, %v3232_v1  ;;  %v3336_v12 = vstv %s6591_s26  ;;  %s6829_s26 = sld [smem:[#allocation14 + $0xaa]] }
 0x8a9   :  { %v6603_v48 = vadd.f32 %v3241_v37, %v3240_v29  ;;  %v3252_v0 = vmul.f32 %v3251_v60, %v3200_v16  ;;  %v3342_v42 = vstv %s6593_s4  ;;  %v3348_v11 = vstv %s6595_s6  ;;  %s6831_s4 = sld [smem:[#allocation14 + $0xab]]  ;;  %s6833_s6 = sld [smem:[#allocation14 + $0xac]] }
 0x8aa   :  { %v6609_v27 = vadd.f32 %v3247_v58, %v3246_v53  ;;  %v3253_v35 = vmul.f32 %v3251_v60, %v3206_v49  ;;  %v3259_v33 = vmul.f32 %v3258_v32, %v3214_v13  ;;  %v3265_v59 = vmul.f32 %v3264_v8, %v6597_v51 }
 0x8ab   :  { %v3255_v47 = vadd.f32 %v3254_v20, %v3252_v0  ;;  %v3260_v30 = vmul.f32 %v3258_v32, %v3220_v26  ;;  %v3278_v18 = vmul.f32 %v3277_v9, %v3200_v16  ;;  %v3279_v29 = vmul.f32 %v3277_v9, %v3206_v49 }
 0x8ac   :  { %v3256_v21 = vadd.f32 %v3254_v20, %v3253_v35  ;;  %v3266_v60 = vmul.f32 %v3264_v8, %v6600_v36  ;;  %v3285_v7 = vmul.f32 %v3284_v50, %v3214_v13  ;;  %v3286_v1 = vmul.f32 %v3284_v50, %v3220_v26 }
 0x8ad   :  { %v3261_v53 = vadd.f32 %v3259_v33, %v3255_v47  ;;  %v3281_v32 = vadd.f32 %v3280_v14, %v3278_v18  ;;  %v3282_v9 = vadd.f32 %v3280_v14, %v3279_v29  ;;  %v3291_v20 = vmul.f32 %v3290_v3, %v6597_v51  ;;  %8078 = sst [smem:[#allocation45_spill]] %s6827_s25  ;;  %s6848_s25 = sld [smem:[#allocation14 + $0xb0]] }
 0x8ae   :  { %v3262_v28 = vadd.f32 %v3260_v30, %v3256_v21  ;;  %v3292_v8 = vmul.f32 %v3290_v3, %v6600_v36  ;;  %v3304_v2 = vmul.f32 %v3303_v23, %v3200_v16  ;;  %v3305_v50 = vmul.f32 %v3303_v23, %v3206_v49  ;;  %8079 = sst [smem:[#allocation47_spill]] %s6829_s26  ;;  %s8128_s26 = sld [smem:[#allocation57_spill]] }
 0x8af   :  { %v3267_v56 = vadd.f32 %v3265_v59, %v3261_v53  ;;  %v3287_v37 = vadd.f32 %v3285_v7, %v3281_v32  ;;  %v3288_v15 = vadd.f32 %v3286_v1, %v3282_v9  ;;  %v3311_v55 = vmul.f32 %v3310_v22, %v3214_v13  ;;  %8080 = sst [smem:[#allocation48_spill]] %s6831_s4  ;;  %s6852_s4 = sld [smem:[#allocation14 + $0xbb]] }
 0x8b0   :  { %v3268_v14 = vadd.f32 %v3266_v60, %v3262_v28  ;;  %v3307_v4 = vadd.f32 %v3306_v19, %v3304_v2  ;;  %v3308_v58 = vadd.f32 %v3306_v19, %v3305_v50  ;;  %v3312_v3 = vmul.f32 %v3310_v22, %v3220_v26  ;;  %8081 = sst [smem:[#allocation49_spill]] %s6833_s6  ;;  %s6854_s6 = sld [smem:[#allocation14 + $0xb1]] }
 0x8b1   :  { %v3271_v23 = vmul.f32 %v3270_v31, %v6603_v48  ;;  %v3272_v0 = vmul.f32 %v3270_v31, %v6609_v27  ;;  %v3293_v35 = vadd.f32 %v3291_v20, %v3287_v37  ;;  %v3294_v33 = vadd.f32 %v3292_v8, %v3288_v15 }
 0x8b2   :  { %v3297_v59 = vmul.f32 %v3296_v6, %v6603_v48  ;;  %v3313_v47 = vadd.f32 %v3311_v55, %v3307_v4  ;;  %v3314_v30 = vadd.f32 %v3312_v3, %v3308_v58  ;;  %v3317_v19 = vmul.f32 %v3316_v61, %v6597_v51 }
 0x8b3   :  { %v3273_v22 = vadd.f32 %v3271_v23, %v3267_v56  ;;  %v3274_v18 = vadd.f32 %v3272_v0, %v3268_v14  ;;  %v3298_v29 = vmul.f32 %v3296_v6, %v6609_v27  ;;  %v3318_v31 = vmul.f32 %v3316_v61, %v6600_v36 }
 0x8b4   :  { %v3299_v21 = vadd.f32 %v3297_v59, %v3293_v35  ;;  %v3319_v60 = vadd.f32 %v3317_v19, %v3313_v47  ;;  %v3330_v7 = vmul.f32 %v3329_v10, %v3200_v16  ;;  %v3331_v1 = vmul.f32 %v3329_v10, %v3206_v49 }
 0x8b5   :  { %v3300_v53 = vadd.f32 %v3298_v29, %v3294_v33  ;;  %v3320_v32 = vadd.f32 %v3318_v31, %v3314_v30  ;;  %v3323_v9 = vmul.f32 %v3322_v5, %v6603_v48  ;;  %v3324_v20 = vmul.f32 %v3322_v5, %v6609_v27 }
 0x8b6   :  { %v3333_v28 = vadd.f32 %v3332_v24, %v3330_v7  ;;  %v3334_v8 = vadd.f32 %v3332_v24, %v3331_v1  ;;  %v3337_v6 = vmul.f32 %v3336_v12, %v3214_v13  ;;  %v3338_v2 = vmul.f32 %v3336_v12, %v3220_v26  ;;  %8087 = sst [smem:[#allocation54_spill]] %s6854_s6 }
 0x8b7   :  { %v3325_v61 = vadd.f32 %v3323_v9, %v3319_v60  ;;  %v3343_v50 = vmul.f32 %v3342_v42, %v6597_v51  ;;  %v3356_v16 = vrot.slane %v3273_v22, %v5294_v38  ;;  %v3360_v10 = vrot.slane %v3274_v18, %v5294_v38 }
 0x8b8   :  { %v3339_v49 = vadd.f32 %v3337_v6, %v3333_v28  ;;  %v3340_v56 = vadd.f32 %v3338_v2, %v3334_v8  ;;  %v3344_v37 = vmul.f32 %v3342_v42, %v6600_v36  ;;  %v3364_v15 = vrot.slane %v3299_v21, %v5294_v38 }
 0x8b9   :  { %v3326_v5 = vadd.f32 %v3324_v20, %v3320_v32  ;;  %v3368_v24 = vrot.slane %v3300_v53, %v5294_v38  ;;  %v6692_v13 = vadd.f32 %v3356_v16, %v6326_v63  ;;  %v6695_v26 = vadd.f32 %v3360_v10, %v6381_v54 }
 0x8ba   :  { %v3345_v51 = vadd.f32 %v3343_v50, %v3339_v49  ;;  %v3346_v12 = vadd.f32 %v3344_v37, %v3340_v56  ;;  %v3349_v55 = vmul.f32 %v3348_v11, %v6603_v48  ;;  %v3350_v14 = vmul.f32 %v3348_v11, %v6609_v27  ;;  %v6844_v49 = vld [vmem:[%s8085_s12 + $0x1] ss:$2 sm:$0xff]  ;;  %s6864_s12 = sld [smem:[#allocation14 + $0xbd]] }
 0x8bb   :  { %v3372_v36 = vrot.slane %v3325_v61, %v5294_v38  ;;  %v6705_v42 = vadd.f32 %v3364_v15, %v6403_v52  ;;  %v3393_v63 = vadd.f32 %v6695_v26, %v6692_v13  ;;  %v3376_v54 = vrot.slane %v3326_v5, %v5294_v38  ;;  %v6850_v56 = vld [vmem:[#allocation12 + $0x1] ss:$2 sm:$0xff] }
 0x8bc   :  { %v3351_v4 = vadd.f32 %v3349_v55, %v3345_v51  ;;  %v3352_v58 = vadd.f32 %v3350_v14, %v3346_v12  ;;  %v6711_v3 = vadd.f32 %v3368_v24, %v6417_v25  ;;  %v3449_v37 = vrot.slane %v6844_v49, %v5296_v39 }
 0x8bd   :  { %v3394_v48 = vadd.f32 %v3393_v63, %v6705_v42  ;;  %v6716_v11 = vadd.f32 %v3372_v36, %v6424_v57  ;;  %v6721_v0 = vadd.f32 %v3376_v54, %v6430_v34  ;;  %v3500_v15 = vrot.slane %v6850_v56, %v5296_v39 }
 0x8be   :  { %v3380_v23 = vrot.slane %v3351_v4, %v5294_v38  ;;  %v3384_v27 = vrot.slane %v3352_v58, %v5294_v38  ;;  %v3457_v5 = vrot.slane %v6844_v49, %v5298_v40  ;;  %v3508_v24 = vrot.slane %v6850_v56, %v5298_v40 }
 0x8bf   :  { %v3395_v52 = vadd.f32 %v3394_v48, %v6711_v3  ;;  %v3465_v51 = vrot.slane %v6844_v49, %v5302_v43  ;;  %v3445_v12 = vrot.slane %v6844_v49, %v5294_v38  ;;  %v3453_v55 = vrot.slane %v6844_v49, %v5300_v41 }
 0x8c0   :  { %v6725_v33 = vadd.f32 %v3380_v23, %v6435_v62  ;;  %v6729_v59 = vadd.f32 %v3384_v27, %v6438_v17  ;;  %8091 = sst [smem:[#allocation72_spill]] %s6864_s12  ;;  %v3461_v14 = vrot.slane %v6844_v49, %v5304_v44  ;;  %v3469_v36 = vrot.slane %v6844_v49, %v5308_v46  ;;  %s6886_s12 = sld [smem:[#allocation14 + $0xdc]] }
 0x8c1   :  { %v3396_v35 = vadd.f32 %v3395_v52, %v6716_v11  ;;  %v3473_v63 = vrot.slane %v6844_v49, %v5306_v45  ;;  %v3496_v4 = vrot.slane %v6850_v56, %v5294_v38  ;;  %v3504_v58 = vrot.slane %v6850_v56, %v5300_v41 }
 0x8c2   :  { %v3512_v54 = vrot.slane %v6850_v56, %v5304_v44  ;;  %v3516_v48 = vrot.slane %v6850_v56, %v5302_v43  ;;  %v3520_v23 = vrot.slane %v6850_v56, %v5308_v46  ;;  %v3524_v52 = vrot.slane %v6850_v56, %v5306_v45 }
 0x8c3   :  { %v3397_v25 = vadd.f32 %v3396_v35, %v6721_v0  ;;  %v3543_v27 = vstv %s6775_s13  ;;  %s6925_s13 = sld [smem:[#allocation14 + $0xc6]]  ;;  %v3968_v35 = vstv %s6988_s10 }
 0x8c5   :  { %v3398_v57 = vadd.f32 %v3397_v25, %v6725_v33  ;;  %v3550_v25 = vstv %s6777_s2  ;;  %s6933_s2 = sld [smem:[#allocation14 + $0xc8]] }
 0x8c6   :  { %8094 = sst [smem:[#allocation56_spill]] %s6886_s12 }
 0x8c7   :  { %v3399_v47 = vadd.f32 %v3398_v57, %v6729_v59  ;;  %s6900_s12 = sld [smem:[#allocation14 + $0xc2]]  ;;  %v3556_v57 = vstv %s6779_s17  ;;  %s6965_s17 = sld [smem:[#allocation14 + $0xd0]] }
 0x8c8   :  { %s8123_s3 = sld [smem:[#allocation56_spill]] }
 0x8c9   :  { %3400 = vadd.xlane.f32.xlu0 %v3399_v47  ;;  %v3562_v47 = vstv %s6781_s19  ;;  %8098 = sst [smem:[#allocation58_spill]] %s6925_s13  ;;  %s6940_s13 = sld [smem:[#allocation14 + $0xca]] }
 0x8ca   :  { %s6963_s19 = sld [smem:[#allocation14 + $0xcf]]  ;;  %s8132_s18 = sld [smem:[#allocation58_spill]] }
 0x8cd   :  { %8097 = sst [smem:[#allocation52_spill]] %s6900_s12  ;;  %s6917_s12 = sld [smem:[#allocation14 + $0xc4]] }
 0x8ce   :  { %8117 = sst [smem:[#allocation75_spill]] %s6965_s17  ;;  %s8126_s17 = sld [smem:[#allocation70_spill]] }
 0x8cf   :  { %8107 = sst [smem:[#allocation62_spill]] %s6940_s13  ;;  %s6955_s13 = sld [smem:[#allocation14 + $0xcd]] }
 0x8d0   :  { %8116 = sst [smem:[#allocation74_spill]] %s6963_s19  ;;  %s6978_s19 = sld [smem:[#allocation14 + $0xd3]] }
 0x8d1   :  { %s8130_s9 = sld [smem:[#allocation52_spill]]  ;;  %8133 = sst [smem:[#allocation70_spill]] %s6988_s10 }
 0x8d2   :  { %s8136_s11 = sld [smem:[#allocation62_spill]]  ;;  %s8139_s6 = sld [smem:[#allocation75_spill]] }
 0x8d3   :  { %s8154_s10 = sld [smem:[#allocation30_spill]] }
 0x8d6   :  { %8127 = sst [smem:[#allocation56_spill]] %s6978_s19  ;;  %s8135_s19 = sld [smem:[#allocation60_spill]] }
 0x956   :  { %v3401_v30 = vpop.xlane.xlu0 %3400 }
 0x957   :  { %v3402_v19 = vmul.f32 0.0009765625, %v3401_v30  ;;  %v3955_v30 = vstv %s8141_s14  ;;  %s8146_s14 = sld [smem:[#allocation63_spill]] }
 0x959   :  { %v6734_v34 = vsub.f32 %v6692_v13, %v3402_v19  ;;  %v6737_v22 = vsub.f32 %v6695_v26, %v3402_v19  ;;  %v6740_v62 = vsub.f32 %v6705_v42, %v3402_v19  ;;  %v6743_v18 = vsub.f32 %v6711_v3, %v3402_v19 }
 0x95a   :  { %v6750_v31 = vsub.f32 %v6716_v11, %v3402_v19  ;;  %v6755_v7 = vsub.f32 %v6721_v0, %v3402_v19  ;;  %v6760_v32 = vsub.f32 %v6725_v33, %v3402_v19  ;;  %v6765_v28 = vsub.f32 %v6729_v59, %v3402_v19 }
 0x95b   :  { %v3411_v17 = vmul.f32 %v6734_v34, %v6734_v34  ;;  %v3412_v29 = vmul.f32 %v6737_v22, %v6737_v22  ;;  %v3413_v21 = vmul.f32 %v6740_v62, %v6740_v62  ;;  %v3414_v1 = vmul.f32 %v6743_v18, %v6743_v18 }
 0x95c   :  { %v3415_v9 = vmul.f32 %v6750_v31, %v6750_v31  ;;  %v3416_v8 = vmul.f32 %v6755_v7, %v6755_v7  ;;  %v3417_v2 = vmul.f32 %v6760_v32, %v6760_v32  ;;  %v3418_v50 = vmul.f32 %v6765_v28, %v6765_v28 }
 0x95d   :  { %v3419_v60 = vadd.f32 %v3412_v29, %v3411_v17  ;;  %v3916_v19 = vstv %s6957_s1  ;;  %v3928_v29 = vstv %s8139_s6  ;;  %s8148_s6 = sld [smem:[#allocation25_spill]]  ;;  %s8150_s1 = sld [smem:[#allocation22_spill]] }
 0x95f   :  { %v3420_v53 = vadd.f32 %v3419_v60, %v3413_v21  ;;  %v3906_v60 = vstv %s6948_s21 }
 0x961   :  { %v3421_v20 = vadd.f32 %v3420_v53, %v3414_v1 }
 0x963   :  { %v3422_v6 = vadd.f32 %v3421_v20, %v3415_v9 }
 0x965   :  { %v3423_v61 = vadd.f32 %v3422_v6, %v3416_v8 }
 0x967   :  { %v3424_v16 = vadd.f32 %v3423_v61, %v3417_v2  ;;  %v3903_v2 = vstv %s6950_s30  ;;  %s8295_s30 = sld [smem:[#allocation76_spill]] }
 0x969   :  { %v3425_v10 = vadd.f32 %v3424_v16, %v3418_v50  ;;  %v3882_v16 = vstv %s8135_s19  ;;  %s8289_s19 = sld [smem:[#allocation74_spill]] }
 0x96b   :  { %3426 = vadd.xlane.f32.xlu1 %v3425_v10 }
 0x9f8   :  { %v3427_v21 = vpop.xlane.xlu1 %3426 }
 0x9f9   :  { %v3428_v20 = vmul.f32 0.0009765625, %v3427_v21 }
 0x9fb   :  { %v3429_v21 = vadd.f32 1e-05, %v3428_v20 }
 0x9fd   :  { %4920 = vrsqrt.f32 %v3429_v21  ;;  %v3962_v21 = vstv %s6986_s8  ;;  %s8159_s8 = sld [smem:[#allocation29_spill]] }
 0xa07   :  { %v4921_v61 = vpop.eup %4920 }
 0xa08   :  { %v3431_v8 = vmul.f32 %v4921_v61, %v6734_v34  ;;  %v3432_v6 = vmul.f32 %v4921_v61, %v6737_v22  ;;  %v3433_v20 = vmul.f32 %v4921_v61, %v6740_v62  ;;  %v3434_v1 = vmul.f32 %v4921_v61, %v6743_v18 }
 0xa09   :  { %v3435_v9 = vmul.f32 %v4921_v61, %v6750_v31  ;;  %v3436_v10 = vmul.f32 %v4921_v61, %v6755_v7  ;;  %v3437_v50 = vmul.f32 %v4921_v61, %v6760_v32  ;;  %v3438_v17 = vmul.f32 %v4921_v61, %v6765_v28 }
 0xa0a   :  { %v3482_v53 = vmul.f32 %v3445_v12, %v3431_v8  ;;  %v3483_v34 = vmul.f32 %v3449_v37, %v3432_v6  ;;  %v3484_v22 = vmul.f32 %v3453_v55, %v3433_v20  ;;  %v3485_v62 = vmul.f32 %v3457_v5, %v3434_v1 }
 0xa0b   :  { %v3486_v18 = vmul.f32 %v3461_v14, %v3435_v9  ;;  %v3487_v31 = vmul.f32 %v3465_v51, %v3436_v10  ;;  %v3488_v7 = vmul.f32 %v3469_v36, %v3437_v50  ;;  %v3489_v32 = vmul.f32 %v3473_v63, %v3438_v17 }
 0xa0c   :  { %v7057_v28 = vadd.f32 %v3496_v4, %v3482_v53  ;;  %v7062_v37 = vadd.f32 %v3500_v15, %v3483_v34  ;;  %v7067_v5 = vadd.f32 %v3504_v58, %v3484_v22  ;;  %v7072_v38 = vadd.f32 %v3508_v24, %v3485_v62 }
 0xa0d   :  { %v7077_v39 = vadd.f32 %v3512_v54, %v3486_v18  ;;  %v7082_v49 = vadd.f32 %v3516_v48, %v3487_v31  ;;  %v7087_v41 = vadd.f32 %v3520_v23, %v3488_v7  ;;  %v7092_v40 = vadd.f32 %v3524_v52, %v3489_v32 }
 0xa0e   :  { %v3544_v44 = vmul.f32 %v3543_v27, %v7057_v28  ;;  %v3545_v43 = vmul.f32 %v3543_v27, %v7062_v37  ;;  %v3551_v46 = vmul.f32 %v3550_v25, %v7067_v5  ;;  %v3552_v15 = vmul.f32 %v3550_v25, %v7072_v38 }
 0xa0f   :  { %v3557_v45 = vmul.f32 %v3556_v57, %v7077_v39  ;;  %v3558_v56 = vmul.f32 %v3556_v57, %v7082_v49  ;;  %v3563_v24 = vmul.f32 %v3562_v47, %v7087_v41  ;;  %v3564_v51 = vmul.f32 %v3562_v47, %v7092_v40 }
 0xa10   :  { %v8152_v12 = vstv %s8146_s14  ;;  %v8155_v63 = vstv %s8147_s24  ;;  %v8157_v48 = vstv %s8148_s6  ;;  %v8160_v25 = vstv %s8149_s27  ;;  %s8162_s14 = sld [smem:[#allocation28_spill]]  ;;  %s8169_s24 = sld [smem:[#allocation31_spill]] }
 0xa11   :  { %v3547_v55 = vadd.f32 %v8152_v12, %v3544_v44  ;;  %v8153_v14 = vmov %v8152_v12  ;;  %v3576_v4 = vmul.f32 %v8155_v63, %v7057_v28  ;;  %v8156_v58 = vmov %v8155_v63  ;;  %s7172_s27 = sld [smem:[#allocation14 + $0xd9]]  ;;  %s8176_s6 = sld [smem:[#allocation33_spill]] }
 0xa12   :  { %v3548_v36 = vadd.f32 %v8153_v14, %v3545_v43  ;;  %v3577_v54 = vmul.f32 %v8156_v58, %v7062_v37  ;;  %v3583_v23 = vmul.f32 %v8157_v48, %v7067_v5  ;;  %v8158_v52 = vmov %v8157_v48 }
 0xa13   :  { %v3584_v27 = vmul.f32 %v8158_v52, %v7072_v38  ;;  %v3589_v57 = vmul.f32 %v8160_v25, %v7077_v39  ;;  %v8161_v47 = vmov %v8160_v25  ;;  %v3553_v1 = vadd.f32 %v3551_v46, %v3547_v55 }
 0xa14   :  { %v3590_v17 = vmul.f32 %v8161_v47, %v7082_v49  ;;  %v3554_v53 = vadd.f32 %v3552_v15, %v3548_v36  ;;  %v8163_v9 = vstv %s8150_s1  ;;  %v8165_v50 = vstv %s8151_s22  ;;  %s7170_s1 = sld [smem:[#allocation14 + $0xd8]]  ;;  %s8179_s22 = sld [smem:[#allocation34_spill]] }
 0xa15   :  { %v3579_v8 = vadd.f32 %v8163_v9, %v3576_v4  ;;  %v8164_v6 = vmov %v8163_v9  ;;  %v3595_v10 = vmul.f32 %v8165_v50, %v7087_v41  ;;  %v8166_v20 = vmov %v8165_v50 }
 0xa16   :  { %v3580_v61 = vadd.f32 %v8164_v6, %v3577_v54  ;;  %v3596_v34 = vmul.f32 %v8166_v20, %v7092_v40  ;;  %v8167_v22 = vstv %s8154_s10  ;;  %v3559_v7 = vadd.f32 %v3557_v45, %v3553_v1  ;;  %s8182_s10 = sld [smem:[#allocation35_spill]] }
 0xa17   :  { %v3608_v62 = vmul.f32 %v8167_v22, %v7057_v28  ;;  %v8168_v18 = vmov %v8167_v22  ;;  %v3560_v32 = vadd.f32 %v3558_v56, %v3554_v53  ;;  %v3585_v44 = vadd.f32 %v3583_v23, %v3579_v8  ;;  %8175 = sst [smem:[#allocation52_spill]] %s7172_s27 }
 0xa18   :  { %v3609_v31 = vmul.f32 %v8168_v18, %v7062_v37  ;;  %v3586_v43 = vadd.f32 %v3584_v27, %v3580_v61  ;;  %v8170_v46 = vstv %s8159_s8  ;;  %v8172_v14 = vstv %s8162_s14  ;;  %s8183_s8 = sld [smem:[#allocation32_spill]]  ;;  %s8186_s14 = sld [smem:[#allocation36_spill]] }
 0xa19   :  { %v3611_v15 = vadd.f32 %v8170_v46, %v3608_v62  ;;  %v8171_v12 = vmov %v8170_v46  ;;  %v3615_v36 = vmul.f32 %v8172_v14, %v7067_v5  ;;  %v8173_v63 = vmov %v8172_v14 }
 0xa1a   :  { %v3612_v55 = vadd.f32 %v8171_v12, %v3609_v31  ;;  %v3616_v4 = vmul.f32 %v8173_v63, %v7072_v38  ;;  %8174 = sst [smem:[#allocation57_spill]] %s7170_s1  ;;  %v3565_v45 = vadd.f32 %v3563_v24, %v3559_v7  ;;  %v3566_v56 = vadd.f32 %v3564_v51, %v3560_v32 }
 0xa1b   :  { %v3591_v58 = vadd.f32 %v3589_v57, %v3585_v44  ;;  %v3592_v54 = vadd.f32 %v3590_v17, %v3586_v43  ;;  %v3617_v48 = vadd.f32 %v3615_v36, %v3611_v15  ;;  %v8177_v52 = vstv %s8169_s24  ;;  %s8187_s24 = sld [smem:[#allocation37_spill]] }
 0xa1c   :  { %v3618_v23 = vadd.f32 %v3616_v4, %v3612_v55  ;;  %v3621_v27 = vmul.f32 %v8177_v52, %v7077_v39  ;;  %v8178_v25 = vmov %v8177_v52  ;;  %v3569_v1 = vmul.f32 0.01, %v3565_v45 }
 0xa1d   :  { %v3622_v47 = vmul.f32 %v8178_v25, %v7082_v49  ;;  %v3570_v53 = vmul.f32 0.01, %v3566_v56  ;;  %v3958_v9 = vstv %s7128_s15  ;;  %v3974_v8 = vstv %s7130_s5 }
 0xa1e   :  { %v3597_v24 = vadd.f32 %v3595_v10, %v3591_v58  ;;  %v3598_v51 = vadd.f32 %v3596_v34, %v3592_v54  ;;  %v3623_v57 = vadd.f32 %v3621_v27, %v3617_v48  ;;  %vm3567_vm0 = vcmp.ge.f32.partialorder %v3565_v45, 0.0 }
 0xa1f   :  { %v3624_v17 = vadd.f32 %v3622_v47, %v3618_v23  ;;  %vm3568_vm1 = vcmp.ge.f32.partialorder %v3566_v56, 0.0  ;;  %v8180_v6 = vstv %s8176_s6  ;;  %v8184_v18 = vstv %s8179_s22  ;;  %s8188_s6 = sld [smem:[#allocation38_spill]]  ;;  %s8191_s22 = sld [smem:[#allocation40_spill]] }
 0xa20   :  { %v3627_v61 = vmul.f32 %v8180_v6, %v7087_v41  ;;  %v8181_v50 = vmov %v8180_v6  ;;  %vm3599_vm2 = vcmp.ge.f32.partialorder %v3597_v24, 0.0  ;;  %vm3600_vm3 = vcmp.ge.f32.partialorder %v3598_v51, 0.0 }
 0xa21   :  { %v3628_v20 = vmul.f32 %v8181_v50, %v7092_v40  ;;  %v3601_v22 = vmul.f32 0.01, %v3597_v24  ;;  %v3602_v10 = vmul.f32 0.01, %v3598_v51  ;;  %v3640_v31 = vmul.f32 %v8184_v18, %v7057_v28 }
 0xa22   :  { %v3629_v34 = vadd.f32 %v3627_v61, %v3623_v57  ;;  %v8185_v7 = vmov %v8184_v18  ;;  %v7194_v44 = vsel %vm3567_vm0, %v3565_v45, %v3569_v1  ;;  %v7196_v43 = vsel %vm3568_vm1, %v3566_v56, %v3570_v53 }
 0xa23   :  { %v3630_v62 = vadd.f32 %v3628_v20, %v3624_v17  ;;  %v3641_v32 = vmul.f32 %v8185_v7, %v7062_v37  ;;  %v3980_v46 = vstv %s7170_s1  ;;  %v3986_v15 = vstv %s7172_s27  ;;  %s8194_s27 = sld [smem:[#allocation39_spill]]  ;;  %s8195_s1 = sld [smem:[#allocation43_spill]] }
 0xa24   :  { %v7200_v12 = vsel %vm3599_vm2, %v3597_v24, %v3601_v22  ;;  %v7202_v55 = vsel %vm3600_vm3, %v3598_v51, %v3602_v10  ;;  %v8189_v14 = vstv %s8182_s10  ;;  %vm3631_vm4 = vcmp.ge.f32.partialorder %v3629_v34, 0.0  ;;  %s8198_s10 = sld [smem:[#allocation44_spill]] }
 0xa25   :  { %v3647_v36 = vmul.f32 %v8189_v14, %v7067_v5  ;;  %v8190_v63 = vmov %v8189_v14  ;;  %vm3632_vm5 = vcmp.ge.f32.partialorder %v3630_v62, 0.0  ;;  %v8192_v45 = vstv %s8183_s8  ;;  %s8203_s8 = sld [smem:[#allocation42_spill]] }
 0xa26   :  { %v3648_v4 = vmul.f32 %v8190_v63, %v7072_v38  ;;  %v3643_v56 = vadd.f32 %v8192_v45, %v3640_v31  ;;  %v8193_v58 = vmov %v8192_v45  ;;  %v3633_v48 = vmul.f32 0.01, %v3629_v34 }
 0xa27   :  { %v3644_v54 = vadd.f32 %v8193_v58, %v3641_v32  ;;  %v3634_v23 = vmul.f32 0.01, %v3630_v62  ;;  %v8196_v52 = vstv %s8186_s14  ;;  %v8199_v24 = vstv %s8187_s24  ;;  %s8206_s14 = sld [smem:[#allocation45_spill]]  ;;  %s8209_s24 = sld [smem:[#allocation41_spill]] }
 0xa28   :  { %v3653_v27 = vmul.f32 %v8196_v52, %v7077_v39  ;;  %v8197_v25 = vmov %v8196_v52  ;;  %v3649_v1 = vadd.f32 %v3647_v36, %v3643_v56  ;;  %v3672_v51 = vmul.f32 %v8199_v24, %v7057_v28 }
 0xa29   :  { %v3654_v47 = vmul.f32 %v8197_v25, %v7082_v49  ;;  %v3650_v53 = vadd.f32 %v3648_v4, %v3644_v54  ;;  %v8200_v57 = vmov %v8199_v24  ;;  %v8201_v6 = vstv %s8188_s6  ;;  %s8214_s6 = sld [smem:[#allocation47_spill]] }
 0xa2a   :  { %v3673_v17 = vmul.f32 %v8200_v57, %v7062_v37  ;;  %v3659_v61 = vmul.f32 %v8201_v6, %v7087_v41  ;;  %v8202_v50 = vmov %v8201_v6  ;;  %v8204_v22 = vstv %s8191_s22  ;;  %s8225_s22 = sld [smem:[#allocation50_spill]] }
 0xa2b   :  { %v3660_v20 = vmul.f32 %v8202_v50, %v7092_v40  ;;  %v3679_v10 = vmul.f32 %v8204_v22, %v7067_v5  ;;  %v8205_v18 = vmov %v8204_v22  ;;  %v3655_v7 = vadd.f32 %v3653_v27, %v3649_v1 }
 0xa2c   :  { %v3680_v31 = vmul.f32 %v8205_v18, %v7072_v38  ;;  %v3656_v32 = vadd.f32 %v3654_v47, %v3650_v53  ;;  %v8207_v14 = vstv %s8194_s27  ;;  %v8210_v45 = vstv %s8195_s1  ;;  %s8219_s1 = sld [smem:[#allocation48_spill]]  ;;  %s8222_s27 = sld [smem:[#allocation49_spill]] }
 0xa2d   :  { %v3675_v36 = vadd.f32 %v8207_v14, %v3672_v51  ;;  %v8208_v63 = vmov %v8207_v14  ;;  %v3685_v56 = vmul.f32 %v8210_v45, %v7077_v39  ;;  %v8211_v58 = vmov %v8210_v45 }
 0xa2e   :  { %v3676_v4 = vadd.f32 %v8208_v63, %v3673_v17  ;;  %v3686_v54 = vmul.f32 %v8211_v58, %v7082_v49  ;;  %v8212_v52 = vstv %s8198_s10  ;;  %v3661_v27 = vadd.f32 %v3659_v61, %v3655_v7  ;;  %s8228_s10 = sld [smem:[#allocation46_spill]] }
 0xa2f   :  { %v3704_v25 = vmul.f32 %v8212_v52, %v7057_v28  ;;  %v8213_v24 = vmov %v8212_v52  ;;  %v3662_v47 = vadd.f32 %v3660_v20, %v3656_v32  ;;  %v3681_v1 = vadd.f32 %v3679_v10, %v3675_v36 }
 0xa30   :  { %v3705_v57 = vmul.f32 %v8213_v24, %v7062_v37  ;;  %v3682_v53 = vadd.f32 %v3680_v31, %v3676_v4  ;;  %v8215_v51 = vstv %s8203_s8  ;;  %v8217_v22 = vstv %s8206_s14  ;;  %s8231_s8 = sld [smem:[#allocation51_spill]]  ;;  %s8234_s14 = sld [smem:[#allocation53_spill]] }
 0xa31   :  { %v3707_v17 = vadd.f32 %v8215_v51, %v3704_v25  ;;  %v8216_v6 = vmov %v8215_v51  ;;  %v3711_v18 = vmul.f32 %v8217_v22, %v7067_v5  ;;  %v8218_v14 = vmov %v8217_v22 }
 0xa32   :  { %v3708_v50 = vadd.f32 %v8216_v6, %v3705_v57  ;;  %v3712_v63 = vmul.f32 %v8218_v14, %v7072_v38  ;;  %v7265_v45 = vsel %vm3631_vm4, %v3629_v34, %v3633_v48  ;;  %v7268_v61 = vsel %vm3632_vm5, %v3630_v62, %v3634_v23 }
 0xa33   :  { %v8220_v20 = vstv %s8209_s24  ;;  %v3687_v32 = vadd.f32 %v3685_v56, %v3681_v1  ;;  %v3688_v36 = vadd.f32 %v3686_v54, %v3682_v53  ;;  %v3713_v4 = vadd.f32 %v3711_v18, %v3707_v17  ;;  %s8239_s24 = sld [smem:[#allocation54_spill]] }
 0xa34   :  { %v3691_v10 = vmul.f32 %v8220_v20, %v7087_v41  ;;  %v8221_v31 = vmov %v8220_v20  ;;  %v3714_v58 = vadd.f32 %v3712_v63, %v3708_v50  ;;  %vm3663_vm6 = vcmp.ge.f32.partialorder %v3661_v27, 0.0 }
 0xa35   :  { %v3692_v7 = vmul.f32 %v8221_v31, %v7092_v40  ;;  %vm3664_vm7 = vcmp.ge.f32.partialorder %v3662_v47, 0.0  ;;  %v8223_v34 = vstv %s8214_s6  ;;  %v8226_v24 = vstv %s8219_s1  ;;  %s8244_s6 = sld [smem:[#allocation55_spill]]  ;;  %s8252_s1 = sld [smem:[#allocation64_spill]] }
 0xa36   :  { %v3717_v48 = vmul.f32 %v8223_v34, %v7077_v39  ;;  %v8224_v62 = vmov %v8223_v34  ;;  %v3693_v52 = vadd.f32 %v3691_v10, %v3687_v32  ;;  %v3723_v57 = vmul.f32 %v8226_v24, %v7087_v41 }
 0xa37   :  { %v3718_v23 = vmul.f32 %v8224_v62, %v7082_v49  ;;  %v3694_v25 = vadd.f32 %v3692_v7, %v3688_v36  ;;  %v8227_v56 = vmov %v8226_v24  ;;  %v8229_v51 = vstv %s8222_s27 }
 0xa38   :  { %v3724_v54 = vmul.f32 %v8227_v56, %v7092_v40  ;;  %v3719_v1 = vadd.f32 %v3717_v48, %v3713_v4  ;;  %v3736_v17 = vmul.f32 %v8229_v51, %v7057_v28  ;;  %v8230_v6 = vmov %v8229_v51 }
 0xa39   :  { %v3720_v53 = vadd.f32 %v3718_v23, %v3714_v58  ;;  %v3737_v50 = vmul.f32 %v8230_v6, %v7062_v37  ;;  %v3665_v22 = vmul.f32 0.01, %v3661_v27  ;;  %v3666_v18 = vmul.f32 0.01, %v3662_v47 }
 0xa3a   :  { %vm3695_vm8 = vcmp.ge.f32.partialorder %v3693_v52, 0.0  ;;  %vm3696_vm9 = vcmp.ge.f32.partialorder %v3694_v25, 0.0  ;;  %v3725_v14 = vadd.f32 %v3723_v57, %v3719_v1  ;;  %v8232_v20 = vstv %s8225_s22 }
 0xa3b   :  { %v3726_v63 = vadd.f32 %v3724_v54, %v3720_v53  ;;  %v3739_v10 = vadd.f32 %v8232_v20, %v3736_v17  ;;  %v8233_v31 = vmov %v8232_v20  ;;  %v3697_v32 = vmul.f32 0.01, %v3693_v52 }
 0xa3c   :  { %v3740_v7 = vadd.f32 %v8233_v31, %v3737_v50  ;;  %v3698_v36 = vmul.f32 0.01, %v3694_v25  ;;  %v8235_v4 = vstv %s8228_s10  ;;  %vm3727_vm10 = vcmp.ge.f32.partialorder %v3725_v14, 0.0 }
 0xa3d   :  { %v3743_v58 = vmul.f32 %v8235_v4, %v7067_v5  ;;  %v8236_v34 = vmov %v8235_v4  ;;  %vm3728_vm11 = vcmp.ge.f32.partialorder %v3726_v63, 0.0  ;;  %v3729_v62 = vmul.f32 0.01, %v3725_v14 }
 0xa3e   :  { %v3744_v48 = vmul.f32 %v8236_v34, %v7072_v38  ;;  %v3730_v23 = vmul.f32 0.01, %v3726_v63  ;;  %v8237_v56 = vstv %s8231_s8  ;;  %v7311_v51 = vsel %vm3663_vm6, %v3661_v27, %v3665_v22 }
 0xa3f   :  { %v3745_v24 = vadd.f32 %v3743_v58, %v3739_v10  ;;  %v3749_v54 = vmul.f32 %v8237_v56, %v7077_v39  ;;  %v8238_v1 = vmov %v8237_v56  ;;  %v7314_v17 = vsel %vm3664_vm7, %v3662_v47, %v3666_v18 }
 0xa40   :  { %v3746_v57 = vadd.f32 %v3744_v48, %v3740_v7  ;;  %v3750_v53 = vmul.f32 %v8238_v1, %v7082_v49  ;;  %v8240_v6 = vstv %s8234_s14  ;;  %v8242_v4 = vstv %s6848_s25  ;;  %s8247_s25 = sld [smem:[#allocation72_spill]] }
 0xa41   :  { %v3755_v50 = vmul.f32 %v8240_v6, %v7087_v41  ;;  %v8241_v20 = vmov %v8240_v6  ;;  %v3751_v31 = vadd.f32 %v3749_v54, %v3745_v24  ;;  %v3768_v58 = vmul.f32 %v8242_v4, %v7057_v28 }
 0xa42   :  { %v3756_v10 = vmul.f32 %v8241_v20, %v7092_v40  ;;  %v3752_v7 = vadd.f32 %v3750_v53, %v3746_v57  ;;  %v8243_v27 = vmov %v8242_v4  ;;  %v7329_v47 = vsel %vm3695_vm8, %v3693_v52, %v3697_v32 }
 0xa43   :  { %v3769_v22 = vmul.f32 %v8243_v27, %v7062_v37  ;;  %v7332_v18 = vsel %vm3696_vm9, %v3694_v25, %v3698_v36  ;;  %v7335_v34 = vsel %vm3727_vm10, %v3725_v14, %v3729_v62  ;;  %v7338_v48 = vsel %vm3728_vm11, %v3726_v63, %v3730_v23 }
 0xa44   :  { %v3757_v28 = vadd.f32 %v3755_v50, %v3751_v31  ;;  %v3758_v24 = vadd.f32 %v3756_v10, %v3752_v7  ;;  %v8245_v57 = vstv %s6852_s4  ;;  %v8248_v52 = vstv %s8239_s24 }
 0xa45   :  { %v3771_v56 = vadd.f32 %v8245_v57, %v3768_v58  ;;  %v8246_v37 = vmov %v8245_v57  ;;  %v3775_v25 = vmul.f32 %v8248_v52, %v7067_v5  ;;  %v8249_v32 = vmov %v8248_v52 }
 0xa46   :  { %v3772_v54 = vadd.f32 %v8246_v37, %v3769_v22  ;;  %v3776_v14 = vmul.f32 %v8249_v32, %v7072_v38  ;;  %v8250_v36 = vstv %s8120_s23  ;;  %v3761_v1 = vmul.f32 0.01, %v3757_v28 }
 0xa47   :  { %v3800_v62 = vmul.f32 %v8250_v36, %v7194_v44  ;;  %v8251_v63 = vmov %v8250_v36  ;;  %v3762_v53 = vmul.f32 0.01, %v3758_v24  ;;  %v8253_v6 = vstv %s8244_s6 }
 0xa48   :  { %v3801_v23 = vmul.f32 %v8251_v63, %v7196_v43  ;;  %v3781_v50 = vmul.f32 %v8253_v6, %v7077_v39  ;;  %v8254_v20 = vmov %v8253_v6  ;;  %v3777_v10 = vadd.f32 %v3775_v25, %v3771_v56 }
 0xa49   :  { %v3782_v5 = vmul.f32 %v8254_v20, %v7082_v49  ;;  %v3778_v38 = vadd.f32 %v3776_v14, %v3772_v54  ;;  %v8255_v31 = vstv %s8123_s3  ;;  %vm3759_vm12 = vcmp.ge.f32.partialorder %v3757_v28, 0.0  ;;  %s8301_s3 = sld [smem:[#allocation68_spill]] }
 0xa4a   :  { %v3803_v7 = vadd.f32 %v8255_v31, %v3800_v62  ;;  %v8256_v4 = vmov %v8255_v31  ;;  %vm3760_vm13 = vcmp.ge.f32.partialorder %v3758_v24, 0.0  ;;  %v8257_v27 = vstv %s8247_s25 }
 0xa4b   :  { %v3804_v58 = vadd.f32 %v8256_v4, %v3801_v23  ;;  %v3807_v22 = vmul.f32 %v8257_v27, %v7200_v12  ;;  %v8258_v57 = vmov %v8257_v27  ;;  %v3783_v37 = vadd.f32 %v3781_v50, %v3777_v10 }
 0xa4c   :  { %v3808_v39 = vmul.f32 %v8258_v57, %v7202_v55  ;;  %v3784_v52 = vadd.f32 %v3782_v5, %v3778_v38  ;;  %v8259_v49 = vstv %s8252_s1  ;;  %v8261_v36 = vstv %s8124_s29  ;;  %s7548_s29 = sld [smem:[#allocation14 + $0xdb]] }
 0xa4d   :  { %v3787_v56 = vmul.f32 %v8259_v49, %v7087_v41  ;;  %v8260_v54 = vmov %v8259_v49  ;;  %v3809_v32 = vadd.f32 %v3807_v22, %v3803_v7  ;;  %v3813_v62 = vmul.f32 %v8261_v36, %v7265_v45 }
 0xa4e   :  { %v3788_v25 = vmul.f32 %v8260_v54, %v7092_v40  ;;  %v3810_v14 = vadd.f32 %v3808_v39, %v3804_v58  ;;  %v8262_v63 = vmov %v8261_v36  ;;  %v7384_v6 = vsel %vm3759_vm12, %v3757_v28, %v3761_v1 }
 0xa4f   :  { %v3814_v23 = vmul.f32 %v8262_v63, %v7268_v61  ;;  %v7386_v50 = vsel %vm3760_vm13, %v3758_v24, %v3762_v53  ;;  %v3789_v41 = vadd.f32 %v3787_v56, %v3783_v37  ;;  %v3815_v40 = vadd.f32 %v3813_v62, %v3809_v32 }
 0xa50   :  { %v3790_v20 = vadd.f32 %v3788_v25, %v3784_v52  ;;  %v8263_v10 = vstv %s8125_s16  ;;  %v8265_v4 = vstv %s8126_s17  ;;  %v8267_v57 = vstv %s8128_s26  ;;  %s8285_s17 = sld [smem:[#allocation61_spill]] }
 0xa51   :  { %v3816_v5 = vadd.f32 %v3814_v23, %v3810_v14  ;;  %v3819_v38 = vmul.f32 %v8263_v10, %v7311_v51  ;;  %v8264_v31 = vmov %v8263_v10  ;;  %vm3791_vm14 = vcmp.ge.f32.partialorder %v3789_v41, 0.0 }
 0xa52   :  { %v3820_v7 = vmul.f32 %v8264_v31, %v7314_v17  ;;  %vm3792_vm15 = vcmp.ge.f32.partialorder %v3790_v20, 0.0  ;;  %v3793_v28 = vmul.f32 0.01, %v3789_v41  ;;  %v3794_v24 = vmul.f32 0.01, %v3790_v20 }
 0xa53   :  { %v3821_v1 = vadd.f32 %v3819_v38, %v3815_v40  ;;  %v3825_v58 = vmul.f32 %v8265_v4, %v7329_v47  ;;  %v8266_v27 = vmov %v8265_v4  ;;  %v3831_v39 = vmul.f32 %v8267_v57, %v7335_v34 }
 0xa54   :  { %v3822_v53 = vadd.f32 %v3820_v7, %v3816_v5  ;;  %v3826_v22 = vmul.f32 %v8266_v27, %v7332_v18  ;;  %v8268_v37 = vmov %v8267_v57  ;;  %v8269_v49 = vstv %s6917_s12 }
 0xa55   :  { %v3832_v52 = vmul.f32 %v8268_v37, %v7338_v48  ;;  %v3852_v56 = vmul.f32 %v8269_v49, %v7194_v44  ;;  %v8270_v54 = vmov %v8269_v49  ;;  %v7412_v32 = vsel %vm3791_vm14, %v3789_v41, %v3793_v28 }
 0xa56   :  { %v3853_v25 = vmul.f32 %v8270_v54, %v7196_v43  ;;  %v7414_v14 = vsel %vm3792_vm15, %v3790_v20, %v3794_v24  ;;  %v3827_v36 = vadd.f32 %v3825_v58, %v3821_v1  ;;  %v3828_v62 = vadd.f32 %v3826_v22, %v3822_v53 }
 0xa57   :  { %v8271_v63 = vstv %s6911_s7  ;;  %v8273_v10 = vstv %s6919_s20  ;;  %v8275_v20 = vstv %s8130_s9  ;;  %v8277_v27 = vstv %s8132_s18  ;;  %s8304_s9 = sld [smem:[#allocation56_spill]] }
 0xa58   :  { %v3855_v23 = vadd.f32 %v8271_v63, %v3852_v56  ;;  %v8272_v40 = vmov %v8271_v63  ;;  %v3859_v38 = vmul.f32 %v8273_v10, %v7200_v12  ;;  %v8274_v31 = vmov %v8273_v10 }
 0xa59   :  { %v3856_v5 = vadd.f32 %v8272_v40, %v3853_v25  ;;  %v3860_v7 = vmul.f32 %v8274_v31, %v7202_v55  ;;  %v3833_v41 = vadd.f32 %v3831_v39, %v3827_v36  ;;  %v3834_v28 = vadd.f32 %v3832_v52, %v3828_v62 }
 0xa5a   :  { %v3837_v24 = vmul.f32 %v8275_v20, %v7384_v6  ;;  %v8276_v1 = vmov %v8275_v20  ;;  %v3861_v4 = vadd.f32 %v3859_v38, %v3855_v23  ;;  %v3865_v22 = vmul.f32 %v8277_v27, %v7265_v45 }
 0xa5b   :  { %v3838_v53 = vmul.f32 %v8276_v1, %v7386_v50  ;;  %v3862_v58 = vadd.f32 %v3860_v7, %v3856_v5  ;;  %v8278_v57 = vmov %v8277_v27  ;;  %v8279_v49 = vstv %s6909_s28 }
 0xa5c   :  { %v3866_v37 = vmul.f32 %v8278_v57, %v7268_v61  ;;  %v3839_v39 = vadd.f32 %v3837_v24, %v3833_v41  ;;  %v3843_v56 = vmul.f32 %v8279_v49, %v7412_v32  ;;  %v8280_v54 = vmov %v8279_v49 }
 0xa5d   :  { %v3840_v52 = vadd.f32 %v3838_v53, %v3834_v28  ;;  %v3844_v25 = vmul.f32 %v8280_v54, %v7414_v14  ;;  %v3867_v36 = vadd.f32 %v3865_v22, %v3861_v4  ;;  %v8281_v63 = vstv %s8134_s0  ;;  %s5109_s0 = smov [#allocation15]  }
 0xa5e   :  { %v3868_v62 = vadd.f32 %v3866_v37, %v3862_v58  ;;  %v3871_v23 = vmul.f32 %v8281_v63, %v7311_v51  ;;  %v8282_v40 = vmov %v8281_v63  ;;  %v3845_v10 = vadd.f32 %v3843_v56, %v3839_v39  ;;  %s4019_s5 = sshll.u32 %s5109_s0, 4  ;;  %s4020_s5 = int_to_ptr.vmem [resolvable:$true] %s4019_s5 }
 0xa5f   :  { %v3872_v5 = vmul.f32 %v8282_v40, %v7314_v17  ;;  %v3846_v38 = vadd.f32 %v3844_v25, %v3840_v52  ;;  %v8283_v31 = vstv %s6933_s2  ;;  %v3883_v1 = vmul.f32 %v3882_v16, %v7335_v34  ;;  %s5066_s26 = scalar_lea.vmem %s4020_s5, 1024  ;;  %p5071_p12 = scmp.lt.s32.totalorder %s4020_s5, %s4020_s5 }
 0xa60   :  { %v3877_v7 = vmul.f32 %v8283_v31, %v7329_v47  ;;  %v8284_v41 = vmov %v8283_v31  ;;  %v3873_v20 = vadd.f32 %v3871_v23, %v3867_v36  ;;  %v3884_v53 = vmul.f32 %v3882_v16, %v7338_v48  ;;  %p5067_p11 = scmp.ne.s32.totalorder %s4020_s5, %s5066_s26  ;;  %p5072_p13 = scmp.lt.s32.totalorder %s5066_s26, %s5066_s26 }
 0xa61   :  { %v3878_v28 = vmul.f32 %v8284_v41, %v7332_v18  ;;  %v3874_v24 = vadd.f32 %v3872_v5, %v3868_v62  ;;  %v3847_v4 = vadd.f32 %v3845_v10, %v6692_v13  ;;  %v3848_v58 = vadd.f32 %v3846_v38, %v6695_v26 }
 0xa62   :  { %v3904_v27 = vmul.f32 %v3903_v2, %v7194_v44  ;;  %v3905_v22 = vmul.f32 %v3903_v2, %v7196_v43  ;;  %v3879_v57 = vadd.f32 %v3877_v7, %v3873_v20  ;;  %v8287_v39 = vstv %s8136_s11  ;;  %s7530_s11 = sld [smem:[#allocation14 + $0xda]]  ;;  %p5073_p0 = por %p5072_p13, %p5071_p12 }
 0xa63   :  { %v3880_v37 = vadd.f32 %v3878_v28, %v3874_v24  ;;  %v3889_v52 = vmul.f32 %v8287_v39, %v7384_v6  ;;  %v8288_v16 = vmov %v8287_v39  ;;  %v8290_v56 = vstv %s6955_s13  ;;  %4005 = vst [vmem:[#allocation15] sm:$0xff] %v3847_v4  ;;  %4006 = vst [vmem:[#allocation15 + $0x8] sm:$0xff] %v3848_v58 }
 0xa64   :  { %v3890_v13 = vmul.f32 %v8288_v16, %v7386_v50  ;;  %v3907_v49 = vadd.f32 %v3906_v60, %v3904_v27  ;;  %v3908_v26 = vadd.f32 %v3906_v60, %v3905_v22  ;;  %v3911_v54 = vmul.f32 %v8290_v56, %v7200_v12  ;;  %p5074_p1 = pnand %p5073_p0, %p5067_p11 }
 0xa65   :  { %v8291_v2 = vmov %v8290_v56  ;;  %v3885_v36 = vadd.f32 %v3883_v1, %v3879_v57  ;;  %v3886_v62 = vadd.f32 %v3884_v53, %v3880_v37  ;;  %v8293_v63 = vstv %s8285_s17 }
 0xa66   :  { %v3912_v25 = vmul.f32 %v8291_v2, %v7202_v55  ;;  %v3895_v23 = vmul.f32 %v8293_v63, %v7412_v32  ;;  %v8294_v40 = vmov %v8293_v63  ;;  %v3913_v5 = vadd.f32 %v3911_v54, %v3907_v49 }
 0xa67   :  { %v3896_v60 = vmul.f32 %v8294_v40, %v7414_v14  ;;  %v3917_v38 = vmul.f32 %v3916_v19, %v7265_v45  ;;  %v3918_v31 = vmul.f32 %v3916_v19, %v7268_v61  ;;  %v3891_v7 = vadd.f32 %v3889_v52, %v3885_v36 }
 0xa68   :  { %v3914_v10 = vadd.f32 %v3912_v25, %v3908_v26  ;;  %v3892_v41 = vadd.f32 %v3890_v13, %v3886_v62  ;;  %v8297_v28 = vstv %s8289_s19  ;;  %v3929_v58 = vmul.f32 %v3928_v29, %v7329_v47 }
 0xa69   :  { %v3923_v20 = vmul.f32 %v8297_v28, %v7311_v51  ;;  %v8298_v24 = vmov %v8297_v28  ;;  %v3919_v53 = vadd.f32 %v3917_v38, %v3913_v5  ;;  %v3930_v27 = vmul.f32 %v3928_v29, %v7332_v18 }
 0xa6a   :  { %v3924_v1 = vmul.f32 %v8298_v24, %v7314_v17  ;;  %v3920_v4 = vadd.f32 %v3918_v31, %v3914_v10  ;;  %v3897_v19 = vadd.f32 %v3895_v23, %v3891_v7  ;;  %v3898_v22 = vadd.f32 %v3896_v60, %v3892_v41 }
 0xa6b   :  { %v8300_v57 = vstv %s8295_s30  ;;  %v3925_v16 = vadd.f32 %v3923_v20, %v3919_v53  ;;  %v3956_v49 = vmul.f32 %v3955_v30, %v7194_v44  ;;  %v3957_v29 = vmul.f32 %v3955_v30, %v7196_v43 }
 0xa6c   :  { %v3935_v37 = vmul.f32 %v8300_v57, %v7335_v34  ;;  %v8302_v39 = vmov %v8300_v57  ;;  %v3926_v13 = vadd.f32 %v3924_v1, %v3920_v4  ;;  %v3899_v26 = vadd.f32 %v3897_v19, %v6705_v42 }
 0xa6d   :  { %v3936_v52 = vmul.f32 %v8302_v39, %v7338_v48  ;;  %v3900_v56 = vadd.f32 %v3898_v22, %v6711_v3  ;;  %v3963_v54 = vmul.f32 %v3962_v21, %v7200_v12  ;;  %v3964_v2 = vmul.f32 %v3962_v21, %v7202_v55 }
 0xa6e   :  { %v3931_v25 = vadd.f32 %v3929_v58, %v3925_v16  ;;  %v3932_v36 = vadd.f32 %v3930_v27, %v3926_v13  ;;  %v3959_v44 = vadd.f32 %v3958_v9, %v3956_v49  ;;  %v3960_v42 = vadd.f32 %v3958_v9, %v3957_v29  ;;  %4007 = vst [vmem:[#allocation15 + $0x10] sm:$0xff] %v3899_v26 }
 0xa6f   :  { %v8305_v3 = vstv %s8301_s3  ;;  %v3969_v21 = vmul.f32 %v3968_v35, %v7265_v45  ;;  %v3970_v55 = vmul.f32 %v3968_v35, %v7268_v61  ;;  %4008 = vst [vmem:[#allocation15 + $0x18] sm:$0xff] %v3900_v56  ;;  %v8309_v40 = vstv %s8304_s9 }
 0xa70   :  { %v3941_v30 = vmul.f32 %v8305_v3, %v7384_v6  ;;  %v8306_v43 = vmov %v8305_v3  ;;  %v3937_v62 = vadd.f32 %v3935_v37, %v3931_v25  ;;  %v3938_v9 = vadd.f32 %v3936_v52, %v3932_v36 }
 0xa71   :  { %v3942_v12 = vmul.f32 %v8306_v43, %v7386_v50  ;;  %v3965_v63 = vadd.f32 %v3963_v54, %v3959_v44  ;;  %v3966_v23 = vadd.f32 %v3964_v2, %v3960_v42  ;;  %v3947_v60 = vmul.f32 %v8309_v40, %v7412_v32 }
 0xa72   :  { %v8310_v45 = vmov %v8309_v40  ;;  %v3975_v35 = vmul.f32 %v3974_v8, %v7311_v51  ;;  %v3976_v61 = vmul.f32 %v3974_v8, %v7314_v17  ;;  %v3943_v10 = vadd.f32 %v3941_v30, %v3937_v62 }
 0xa73   :  { %v3948_v5 = vmul.f32 %v8310_v45, %v7414_v14  ;;  %v3944_v38 = vadd.f32 %v3942_v12, %v3938_v9  ;;  %v3971_v31 = vadd.f32 %v3969_v21, %v3965_v63  ;;  %v3972_v7 = vadd.f32 %v3970_v55, %v3966_v23 }
 0xa74   :  { %v3981_v41 = vmul.f32 %v3980_v46, %v7329_v47  ;;  %v3982_v28 = vmul.f32 %v3980_v46, %v7332_v18  ;;  %v3949_v20 = vadd.f32 %v3947_v60, %v3943_v10  ;;  %v3987_v51 = vmul.f32 %v3986_v15, %v7335_v34 }
 0xa75   :  { %v3950_v24 = vadd.f32 %v3948_v5, %v3944_v38  ;;  %v3977_v1 = vadd.f32 %v3975_v35, %v3971_v31  ;;  %v3978_v53 = vadd.f32 %v3976_v61, %v3972_v7  ;;  %v3988_v8 = vmul.f32 %v3986_v15, %v7338_v48 }
 0xa76   :  { %v3992_v17 = vstv %s7530_s11  ;;  %v3951_v4 = vadd.f32 %v3949_v20, %v6716_v11  ;;  %v3998_v19 = vstv %s7548_s29 }
 0xa77   :  { %v3952_v58 = vadd.f32 %v3950_v24, %v6721_v0  ;;  %v3983_v27 = vadd.f32 %v3981_v41, %v3977_v1  ;;  %v3984_v47 = vadd.f32 %v3982_v28, %v3978_v53  ;;  %v3993_v18 = vmul.f32 %v3992_v17, %v7384_v6 }
 0xa78   :  { %v3994_v57 = vmul.f32 %v3992_v17, %v7386_v50  ;;  %4009 = vst [vmem:[#allocation15 + $0x20] sm:$0xff] %v3951_v4  ;;  %v3999_v15 = vmul.f32 %v3998_v19, %v7412_v32  ;;  %v4000_v48 = vmul.f32 %v3998_v19, %v7414_v14 }
 0xa79   :  { %v3989_v22 = vadd.f32 %v3987_v51, %v3983_v27  ;;  %v3990_v46 = vadd.f32 %v3988_v8, %v3984_v47  ;;  %4010 = vst [vmem:[#allocation15 + $0x28] sm:$0xff] %v3952_v58 }
 0xa7b   :  { %v3995_v34 = vadd.f32 %v3993_v18, %v3989_v22  ;;  %v3996_v37 = vadd.f32 %v3994_v57, %v3990_v46 }
 0xa7d   :  { %v4001_v11 = vadd.f32 %v3999_v15, %v3995_v34  ;;  %v4002_v0 = vadd.f32 %v4000_v48, %v3996_v37 }
 0xa7f   :  { %v4003_v39 = vadd.f32 %v4001_v11, %v6725_v33  ;;  %v4004_v52 = vadd.f32 %v4002_v0, %v6729_v59 }
 0xa81   :  { %4011 = vst [vmem:[#allocation15 + $0x30] sm:$0xff] %v4003_v39  ;;  %4012 = vst [vmem:[#allocation15 + $0x38] sm:$0xff] %v4004_v52 }
 0xa82   :  { %5077 = shalt.err (!%p5074_p1)
}
 0xa83   :  { %s8311_s12 = sld [smem:[#allocation78_spill]] }
 0xa89   :  { %s5078_s28 = scalar_lea.hbm %s8311_s12, 1024 }
 0xa8a   :  { %p5079_p2 = scmp.ne.s32.totalorder %s8311_s12, %s5078_s28  ;;  %p5082_p3 = scmp.lt.u32.totalorder %s5078_s28, %s8311_s12 }
 0xa8c   :  { %p5084_p4 = pnand %p5082_p3, %p5079_p2 }
 0xa8e   :  { %5087 = shalt.err (!%p5084_p4)
}
 0xa8f   :  { %4022 = dma.vmem_to_hbm [thread:$0]  %s4020_s5, 1024, %s8311_s12, [#allocation4]  }
 0xa90   :  { %5098 = dma.done.wait [#allocation4], 1024  }
 0xa91   :  { %5099 = vsyncadd [#allocation4], 4294966272 }
 0xa92   :  { %4026 = vsyncpa [#allocation3], 1 }
 0xa93   :  { %4027 = vsyncpa [#allocation7], 1 }
 0xa94   :  { %4028 = vsyncpa [#allocation10], 1 }
 0xa95   :  { %4029 = vsyncpa [#allocation13], 1 }
 0xa96   :  { %4030 = vsyncpa [#allocation4], 1 }
 0xa97   :  { %4031 = vsyncpa [#allocation5], 1 }

</bundles_post_ra>
